<compile_context>
chip_gen: v6e
topology: v6e:2x2x1
jax: 0.10.0
libtpu: 0.0.40
codegen_flags: <defaults>
</compile_context>

<pallas_src>
import functools

import jax
import jax.numpy as jnp
from jax.experimental import pallas as pl
from jax.experimental.pallas import tpu as pltpu

IN_F, H1, H2, OUT = 6, 15, 10, 1
C = 64  # batch elements per lane group -> x rows are C*IN_F = 384 lanes (multiple of 128)


def _round_up(n: int, m: int) -> int:
    return ((n + m - 1) // m) * m


def _mlp_kernel(x_ref, m1_ref, m2_ref, m3_ref, b1_ref, b2_ref, b3_ref, o_ref):
    # x_ref : (rt, C*6)  -- rt lane-group rows, each row = C batch elems (batch-major, feature-minor)
    # m*_ref: block-structured weights (W ⊗ I_C); b*_ref: (1, C*out) pre-tiled biases (resident)
    x = x_ref[...]
    h1 = jnp.dot(x, m1_ref[...], preferred_element_type=jnp.float32) + b1_ref[...]
    h1 = jnp.maximum(h1, 0.0)                                                    # ReLU
    h2 = jnp.dot(h1, m2_ref[...], preferred_element_type=jnp.float32) + b2_ref[...]
    h2 = jnp.maximum(h2, 0.0)                                                    # ReLU
    h3 = jnp.dot(h2, m3_ref[...], preferred_element_type=jnp.float32) + b3_ref[...]
    # Sigmoid: exp runs on the EUP, epilogue on the VPU; lane-dense (rt, C) store.
    o_ref[...] = (1.0 / (1.0 + jnp.exp(-h3))).astype(o_ref.dtype)


def _block_weight(w, c):
    # w: (out, fin) PyTorch layout -> M of shape (c*fin, c*out) with
    #   M[b*fin + f, b'*out + o] = w[o, f] * delta(b, b')
    # so that (batch-major, feature-minor) lane rows map straight through the MXU.
    out_f, fin = w.shape
    eye = jnp.eye(c, dtype=w.dtype)
    return jnp.einsum('of,bd->bfdo', w, eye).reshape(c * fin, c * out_f)


def _block_bias(b, c):
    # bias[o] replicated per lane-group position: big[b'*out + o] = bias[o]
    return jnp.tile(b, c).reshape(1, c * b.shape[0]).astype(jnp.float32)


@functools.partial(jax.jit, static_argnames=("block_rows",))
def base_network_forward(x, params, *, block_rows=2048):
    """x: (B, 6) float32.  params: (w1, b1, w2, b2, w3, b3) in PyTorch (out, in)/(out,) layout."""
    w1, b1, w2, b2, w3, b3 = params
    B, F = x.shape
    assert F == IN_F

    # Pad batch only up to the lane-group size (zeros flow safely through bias/ReLU/sigmoid and are
    # sliced off); for B % 64 == 0 the reshape below is a free bitcast -> no extra HBM traffic.
    b_pad = _round_up(max(B, 1), C)
    if b_pad != B:
        x = jnp.pad(x, ((0, b_pad - B), (0, 0)))
    R = b_pad // C
    xr = x.reshape(R, C * IN_F)                       # (R, 384), lane-dense, native row-major data

    # Block-structured weights/biases (small: ~4 MiB total, VMEM-resident across all grid steps).
    m1 = _block_weight(w1.astype(jnp.float32), C)     # (384, 960)
    m2 = _block_weight(w2.astype(jnp.float32), C)     # (960, 640)
    m3 = _block_weight(w3.astype(jnp.float32), C)     # (640, 64)
    bb1 = _block_bias(b1, C)                          # (1, 960)
    bb2 = _block_bias(b2, C)                          # (1, 640)
    bb3 = _block_bias(b3, C)                          # (1, 64)

    # Rows per grid step: big tiles (2048 rows = 131072 batch elems) amortize per-step overhead while
    # keeping live VMEM ~26 MiB; keep >= 2 grid steps when possible so both v7x TensorCores get work.
    rt = min(_round_up(block_rows, 8), _round_up(pl.cdiv(R, 2), 8))
    rt = max(rt, 8)
    n_blocks = pl.cdiv(R, rt)                         # ragged last block handled by Pallas masking

    out = pl.pallas_call(
        _mlp_kernel,
        out_shape=jax.ShapeDtypeStruct((R, C * OUT), jnp.float32),
        grid=(n_blocks,),
        in_specs=[
            pl.BlockSpec((rt, C * IN_F), lambda i: (i, 0)),   # x tile: streamed / double-buffered
            pl.BlockSpec(m1.shape, lambda i: (0, 0)),         # structured weights: resident
            pl.BlockSpec(m2.shape, lambda i: (0, 0)),
            pl.BlockSpec(m3.shape, lambda i: (0, 0)),
            pl.BlockSpec(bb1.shape, lambda i: (0, 0)),        # biases: resident
            pl.BlockSpec(bb2.shape, lambda i: (0, 0)),
            pl.BlockSpec(bb3.shape, lambda i: (0, 0)),
        ],
        out_specs=pl.BlockSpec((rt, C * OUT), lambda i: (i, 0)),
        compiler_params=pltpu.CompilerParams(
            dimension_semantics=("parallel",),                # batch tiles shard across v7x cores
            vmem_limit_bytes=48 * 1024 * 1024,                # < 64 MiB physical on v7x
        ),
    )(xr, m1, m2, m3, bb1, bb2, bb3)

    # (R, C) lane index == local batch index -> free reshape back to (B, 1); drop padded rows.
    return out.reshape(b_pad, OUT)[:B]


def init_params(key, inputs=IN_F, h1=H1, h2=H2, out=OUT):
    """PyTorch nn.Linear-style init: U(-1/sqrt(fan_in), 1/sqrt(fan_in)), weights in (out, in) layout."""
    def linear(k, fan_in, fan_out):
        kw, kb = jax.random.split(k)
        bound = 1.0 / jnp.sqrt(fan_in)
        w = jax.random.uniform(kw, (fan_out, fan_in), jnp.float32, -bound, bound)
        b = jax.random.uniform(kb, (fan_out,), jnp.float32, -bound, bound)
        return w, b

    k1, k2, k3 = jax.random.split(key, 3)
    w1, b1 = linear(k1, inputs, h1)
    w2, b2 = linear(k2, h1, h2)
    w3, b3 = linear(k3, h2, out)
    return w1, b1, w2, b2, w3, b3


def _ref_forward(x, params):
    w1, b1, w2, b2, w3, b3 = params
    h = jnp.maximum(x @ w1.T + b1, 0.0)
    h = jnp.maximum(h @ w2.T + b2, 0.0)
    return jax.nn.sigmoid(h @ w3.T + b3)


if __name__ == "__main__":
    key = jax.random.PRNGKey(0)
    k_params, k_x, k_x2 = jax.random.split(key, 3)

    params = init_params(k_params)

    # Small batch (single ragged block; padded to one 64-element lane group).
    x_small = jax.random.normal(k_x, (8, IN_F), jnp.float32)
    y_small = base_network_forward(x_small, params)
    jax.block_until_ready(y_small)
    assert y_small.shape == (8, 1)
    assert jnp.allclose(y_small, _ref_forward(x_small, params), atol=5e-5, rtol=1e-5)

    # Non-multiple batch with a tiny block size to exercise the multi-step pipelined path.
    x_big = jax.random.normal(k_x2, (1000, IN_F), jnp.float32)
    y_big = base_network_forward(x_big, params, block_rows=8)
    jax.block_until_ready(y_big)
    assert y_big.shape == (1000, 1)
    assert jnp.allclose(y_big, _ref_forward(x_big, params), atol=5e-5, rtol=1e-5)

    print("KERNEL_OK")
</pallas_src>

<mosaic_0001>
module attributes {stable_mosaic.version = 11 : i64} {
  func.func @_mlp_kernel(%arg0: i32, %arg1: memref<8x384xf32, #tpu.memory_space<vmem>>, %arg2: memref<384x960xf32, #tpu.memory_space<vmem>>, %arg3: memref<960x640xf32, #tpu.memory_space<vmem>>, %arg4: memref<640x64xf32, #tpu.memory_space<vmem>>, %arg5: memref<1x960xf32, #tpu.memory_space<vmem>>, %arg6: memref<1x640xf32, #tpu.memory_space<vmem>>, %arg7: memref<1x64xf32, #tpu.memory_space<vmem>>, %arg8: memref<8x64xf32, #tpu.memory_space<vmem>>) attributes {dimension_semantics = [#tpu.dimension_semantics<parallel>], iteration_bounds = array<i64: 1>, scalar_prefetch = 0 : i64, scratch_operands = 0 : i64, tpu.core_type = #tpu.core_type<tc>, window_params = [{transform_indices = @transform_0, window_bounds = array<i64: 8, 384>}, {pipeline_mode = #tpu.pipeline_mode<synchronous>, transform_indices = @transform_1, window_bounds = array<i64: 384, 960>}, {pipeline_mode = #tpu.pipeline_mode<synchronous>, transform_indices = @transform_2, window_bounds = array<i64: 960, 640>}, {pipeline_mode = #tpu.pipeline_mode<synchronous>, transform_indices = @transform_3, window_bounds = array<i64: 640, 64>}, {pipeline_mode = #tpu.pipeline_mode<synchronous>, transform_indices = @transform_4, window_bounds = array<i64: 1, 960>}, {pipeline_mode = #tpu.pipeline_mode<synchronous>, transform_indices = @transform_5, window_bounds = array<i64: 1, 640>}, {pipeline_mode = #tpu.pipeline_mode<synchronous>, transform_indices = @transform_6, window_bounds = array<i64: 1, 64>}, {transform_indices = @transform_7, window_bounds = array<i64: 8, 64>}]} {
    %c0 = arith.constant 0 : index
    %c0_0 = arith.constant 0 : index
    %0 = vector.load %arg1[%c0, %c0_0] : memref<8x384xf32, #tpu.memory_space<vmem>>, vector<8x384xf32>
    %c0_1 = arith.constant 0 : index
    %c0_2 = arith.constant 0 : index
    %1 = vector.load %arg2[%c0_1, %c0_2] : memref<384x960xf32, #tpu.memory_space<vmem>>, vector<384x960xf32>
    %cst = arith.constant dense<0.000000e+00> : vector<8x960xf32>
    %2 = tpu.matmul %0, %1, %cst {dimension_numbers = #tpu.dot_dimension_numbers<[1], [0], [0], [1], [0, 0, 1, 1], [], []>} : vector<8x384xf32>, vector<384x960xf32>, vector<8x960xf32> -> vector<8x960xf32>
    %c0_3 = arith.constant 0 : index
    %c0_4 = arith.constant 0 : index
    %3 = vector.load %arg5[%c0_3, %c0_4] : memref<1x960xf32, #tpu.memory_space<vmem>>, vector<1x960xf32>
    %4 = vector.broadcast %3 : vector<1x960xf32> to vector<8x960xf32>
    %5 = arith.addf %2, %4 : vector<8x960xf32>
    %cst_5 = arith.constant 0.000000e+00 : f32
    %6 = vector.broadcast %cst_5 : f32 to vector<8x960xf32>
    %7 = arith.maximumf %5, %6 : vector<8x960xf32>
    %c0_6 = arith.constant 0 : index
    %c0_7 = arith.constant 0 : index
    %8 = vector.load %arg3[%c0_6, %c0_7] : memref<960x640xf32, #tpu.memory_space<vmem>>, vector<960x640xf32>
    %cst_8 = arith.constant dense<0.000000e+00> : vector<8x640xf32>
    %9 = tpu.matmul %7, %8, %cst_8 {dimension_numbers = #tpu.dot_dimension_numbers<[1], [0], [0], [1], [0, 0, 1, 1], [], []>} : vector<8x960xf32>, vector<960x640xf32>, vector<8x640xf32> -> vector<8x640xf32>
    %c0_9 = arith.constant 0 : index
    %c0_10 = arith.constant 0 : index
    %10 = vector.load %arg6[%c0_9, %c0_10] : memref<1x640xf32, #tpu.memory_space<vmem>>, vector<1x640xf32>
    %11 = vector.broadcast %10 : vector<1x640xf32> to vector<8x640xf32>
    %12 = arith.addf %9, %11 : vector<8x640xf32>
    %cst_11 = arith.constant 0.000000e+00 : f32
    %13 = vector.broadcast %cst_11 : f32 to vector<8x640xf32>
    %14 = arith.maximumf %12, %13 : vector<8x640xf32>
    %c0_12 = arith.constant 0 : index
    %c0_13 = arith.constant 0 : index
    %15 = vector.load %arg4[%c0_12, %c0_13] : memref<640x64xf32, #tpu.memory_space<vmem>>, vector<640x64xf32>
    %cst_14 = arith.constant dense<0.000000e+00> : vector<8x64xf32>
    %16 = tpu.matmul %14, %15, %cst_14 {dimension_numbers = #tpu.dot_dimension_numbers<[1], [0], [0], [1], [0, 0, 1, 1], [], []>} : vector<8x640xf32>, vector<640x64xf32>, vector<8x64xf32> -> vector<8x64xf32>
    %c0_15 = arith.constant 0 : index
    %c0_16 = arith.constant 0 : index
    %17 = vector.load %arg7[%c0_15, %c0_16] : memref<1x64xf32, #tpu.memory_space<vmem>>, vector<1x64xf32>
    %18 = vector.broadcast %17 : vector<1x64xf32> to vector<8x64xf32>
    %19 = arith.addf %16, %18 : vector<8x64xf32>
    %cst_17 = arith.constant 0.000000e+00 : f32
    %20 = vector.broadcast %cst_17 : f32 to vector<8x64xf32>
    %21 = arith.subf %20, %19 : vector<8x64xf32>
    %22 = math.exp %21 : vector<8x64xf32>
    %cst_18 = arith.constant 1.000000e+00 : f32
    %23 = vector.broadcast %cst_18 : f32 to vector<8x64xf32>
    %24 = arith.addf %23, %22 : vector<8x64xf32>
    %cst_19 = arith.constant 1.000000e+00 : f32
    %25 = vector.broadcast %cst_19 : f32 to vector<8x64xf32>
    %26 = arith.divf %25, %24 : vector<8x64xf32>
    %c0_20 = arith.constant 0 : index
    %c0_21 = arith.constant 0 : index
    %27 = vector.load %arg8[%c0_20, %c0_21] : memref<8x64xf32, #tpu.memory_space<vmem>>, vector<8x64xf32>
    tpu.vector_store %arg8[%c0_20, %c0_21], %26 {strides = array<i32>} : memref<8x64xf32, #tpu.memory_space<vmem>>, vector<8x64xf32>,
    return
  }
  func.func @transform_0(%arg0: i32) -> (i32, i32) {
    %c0_i32 = arith.constant 0 : i32
    %c0_i32_0 = arith.constant 0 : i32
    return %arg0, %c0_i32 : i32, i32
  }
  func.func @transform_1(%arg0: i32) -> (i32, i32) {
    %c0_i32 = arith.constant 0 : i32
    %c0_i32_0 = arith.constant 0 : i32
    %c0_i32_1 = arith.constant 0 : i32
    return %c0_i32, %c0_i32_0 : i32, i32
  }
  func.func @transform_2(%arg0: i32) -> (i32, i32) {
    %c0_i32 = arith.constant 0 : i32
    %c0_i32_0 = arith.constant 0 : i32
    %c0_i32_1 = arith.constant 0 : i32
    return %c0_i32, %c0_i32_0 : i32, i32
  }
  func.func @transform_3(%arg0: i32) -> (i32, i32) {
    %c0_i32 = arith.constant 0 : i32
    %c0_i32_0 = arith.constant 0 : i32
    %c0_i32_1 = arith.constant 0 : i32
    return %c0_i32, %c0_i32_0 : i32, i32
  }
  func.func @transform_4(%arg0: i32) -> (i32, i32) {
    %c0_i32 = arith.constant 0 : i32
    %c0_i32_0 = arith.constant 0 : i32
    %c0_i32_1 = arith.constant 0 : i32
    return %c0_i32, %c0_i32_0 : i32, i32
  }
  func.func @transform_5(%arg0: i32) -> (i32, i32) {
    %c0_i32 = arith.constant 0 : i32
    %c0_i32_0 = arith.constant 0 : i32
    %c0_i32_1 = arith.constant 0 : i32
    return %c0_i32, %c0_i32_0 : i32, i32
  }
  func.func @transform_6(%arg0: i32) -> (i32, i32) {
    %c0_i32 = arith.constant 0 : i32
    %c0_i32_0 = arith.constant 0 : i32
    %c0_i32_1 = arith.constant 0 : i32
    return %c0_i32, %c0_i32_0 : i32, i32
  }
  func.func @transform_7(%arg0: i32) -> (i32, i32) {
    %c0_i32 = arith.constant 0 : i32
    %c0_i32_0 = arith.constant 0 : i32
    return %arg0, %c0_i32 : i32, i32
  }
}

</mosaic_0001>

<bundles_post_ra>
// kernel: tile.18
= control target key start
LH: loop header
LB: loop body
LE: loop exit
PB: predicated region body
PF: predicated region fallthrough
CT: control target
= control target key end

     0   :  { %s64_s0 = inlined_call_operand.vmem [shape: f32[15], index: 0, kind: input, shape index: {}]   ;;  %s65_s1 = inlined_call_operand.vmem [shape: f32[64,15], index: 1, kind: output, shape index: {}]  }
   0x1   :  { %v4_v0 = vld [vmem:[%s64_s0] ss:$0 sm:$0xff] }
   0x2   :  { %5 = vst [vmem:[%s65_s1] sm:$0xff] %v4_v0  ;;  %20 = vst [vmem:[%s65_s1 + $0x8] sm:$0xff] %v4_v0 }
   0x3   :  { %21 = vst [vmem:[%s65_s1 + $0x10] sm:$0xff] %v4_v0  ;;  %22 = vst [vmem:[%s65_s1 + $0x18] sm:$0xff] %v4_v0 }
   0x4   :  { %23 = vst [vmem:[%s65_s1 + $0x20] sm:$0xff] %v4_v0  ;;  %24 = vst [vmem:[%s65_s1 + $0x28] sm:$0xff] %v4_v0 }
   0x5   :  { %25 = vst [vmem:[%s65_s1 + $0x30] sm:$0xff] %v4_v0  ;;  %26 = vst [vmem:[%s65_s1 + $0x38] sm:$0xff] %v4_v0 }

// kernel: tile.19
= control target key start
LH: loop header
LB: loop body
LE: loop exit
PB: predicated region body
PF: predicated region fallthrough
CT: control target
= control target key end

     0   :  { %vm9_vm0 = vcmask 7168   ;;  %vm37_vm1 = vcmask 23552   ;;  %s689_s14 = smov 127   ;;  %vm23_vm2 = vcmask 15360   ;;  %s690_s19 = smov 125   ;;  %vm51_vm3 = vcmask 64512   ;;  %s999_s0 = inlined_call_operand.vmem [shape: f32[64,15], index: 0, kind: input, shape index: {}]   ;;  %s1000_s1 = inlined_call_operand.vmem [shape: f32[1,960], index: 1, kind: output, shape index: {}]  }
   0x1   :  { %v549_v0 = vld [vmem:[%s999_s0 + $0x11] sm:$0x1]   ;;  %v553_v3 = vld [vmem:[%s999_s0 + $0x33] sm:$0x1]   ;;  %v551_v6 = vld [vmem:[%s999_s0 + $0x22] sm:$0x1]  }
   0x2   :  { %v550_v1 = vld [vmem:[%s999_s0 + $0x11] sm:$0x1]   ;;  %v554_v4 = vld [vmem:[%s999_s0 + $0x33] sm:$0x1]   ;;  %v552_v7 = vld [vmem:[%s999_s0 + $0x22] sm:$0x1]  }
   0x3   :  { %v10_v2 = vsel %vm9_vm0, %v550_v1, %v549_v0  ;;  %v38_v5 = vsel %vm37_vm1, %v554_v4, %v553_v3  ;;  %v24_v8 = vsel %vm23_vm2, %v552_v7, %v551_v6  ;;  %v555_v9 = vld [vmem:[%s999_s0 + $0x8] sm:$0x1]   ;;  %v557_v12 = vld [vmem:[%s999_s0 + $0x19] sm:$0x1]   ;;  %vm64_vm4 = vcmask 72704   ;;  %s691_s3 = smov 126  }
   0x4   :  { %11 = vrot.lane.b32.xlu0 %v10_v2, %s689_s14  ;;  %39 = vrot.lane.b32.xlu1 %v38_v5, %s690_s19  ;;  %v556_v10 = vld [vmem:[%s999_s0 + $0x8] sm:$0x1]   ;;  %v558_v13 = vld [vmem:[%s999_s0 + $0x19] sm:$0x1]   ;;  %vm78_vm5 = vcmask 80896   ;;  %s692_s4 = smov 120  }
   0x5   :  { %v52_v11 = vsel %vm51_vm3, %v556_v10, %v555_v9  ;;  %v559_v14 = vld [vmem:[%s999_s0 + $0x2a] sm:$0x1]   ;;  %v65_v16 = vsel %vm64_vm4, %v558_v13, %v557_v12  ;;  %v561_v18 = vld [vmem:[%s999_s0 + $0x3b] sm:$0x1]   ;;  %vm92_vm6 = vcmask 89088   ;;  %s693_s9 = smov 119  }
   0x6   :  { %v560_v15 = vld [vmem:[%s999_s0 + $0x2a] sm:$0x1]   ;;  %v562_v19 = vld [vmem:[%s999_s0 + $0x3b] sm:$0x1]   ;;  %s694_s10 = smov 118   ;;  %s695_s13 = smov 117  }
   0x7   :  { %v79_v17 = vsel %vm78_vm5, %v560_v15, %v559_v14  ;;  %v93_v20 = vsel %vm92_vm6, %v562_v19, %v561_v18  ;;  %v563_v21 = vld [vmem:[%s999_s0 + $0x10] sm:$0x1]   ;;  %s696_s14 = smov 112   ;;  %v564_v22 = vld [vmem:[%s999_s0 + $0x21] sm:$0x1]   ;;  %s697_s19 = smov 111  }
   0x8   :  { %25 = vrot.lane.b32.xlu0 %v24_v8, %s691_s3  ;;  %53 = vrot.lane.b32.xlu1 %v52_v11, %s692_s4  ;;  %v565_v23 = vld [vmem:[%s999_s0 + $0x32] sm:$0x1]   ;;  %s698_s20 = smov 110   ;;  %v566_v24 = vld [vmem:[%s999_s0 + $0x7] sm:$0x1]   ;;  %s699_s25 = smov 105  }
   0x9   :  { %v567_v25 = vld [vmem:[%s999_s0 + $0x18] sm:$0x1]   ;;  %s700_s26 = smov 104   ;;  %v568_v26 = vld [vmem:[%s999_s0 + $0x29] sm:$0x1]   ;;  %s701_s2 = smov 103  }
   0xa   :  { %v569_v27 = vld [vmem:[%s999_s0 + $0x3a] sm:$0x1]   ;;  %s702_s3 = smov 102   ;;  %v570_v28 = vld [vmem:[%s999_s0 + $0xf] sm:$0x1]   ;;  %s703_s8 = smov 97  }
   0xb   :  { %v571_v29 = vld [vmem:[%s999_s0 + $0x20] sm:$0x1]   ;;  %v572_v30 = vld [vmem:[%s999_s0 + $0x31] sm:$0x1]   ;;  %v573_v31 = vld [vmem:[%s999_s0 + $0x6] sm:$0x1]  }
   0xc   :  { %66 = vrot.lane.b32.xlu0 %v65_v16, %s693_s9  ;;  %80 = vrot.lane.b32.xlu1 %v79_v17, %s694_s10  ;;  %s704_s9 = smov 96   ;;  %s706_s15 = smov 90   ;;  %v574_v32 = vld [vmem:[%s999_s0 + $0x17] sm:$0x1]   ;;  %v2_v33 = vld [vmem:[%s999_s0] sm:$0x1]  }
   0xd   :  { %vm3_vm7 = vcmask 121856   ;;  %v575_v34 = vld [vmem:[%s999_s0 + $0x28] sm:$0x1]   ;;  %s707_s22 = smov 89   ;;  %s708_s23 = smov 88   ;;  %vm13_vm8 = vcmask 113664  }
   0xe   :  { %4 = vst.msk [vmem:[#allocation0] sm:$0x1] %vm3_vm7, %v2_v33   ;;  %v576_v35 = vld [vmem:[%s999_s0 + $0x39] sm:$0x1]   ;;  %v577_v36 = vld [vmem:[%s999_s0 + $0xe] sm:$0x1]  }
   0xf   :  { %s709_s28 = smov 87   ;;  %s710_s29 = smov 82   ;;  %v578_v37 = vld [vmem:[%s999_s0 + $0x1f] sm:$0x1]   ;;  %v579_v38 = vld [vmem:[%s999_s0 + $0x30] sm:$0x1]  }
  0x10   :  { %94 = vrot.lane.b32.xlu0 %v93_v20, %s695_s13  ;;  %104 = vrot.lane.b32.xlu1 %v563_v21, %s696_s14  ;;  %s705_s14 = smov 95   ;;  %s711_s5 = smov 81   ;;  %v580_v39 = vld [vmem:[%s999_s0 + $0x5] sm:$0x1]   ;;  %v581_v40 = vld [vmem:[%s999_s0 + $0x16] sm:$0x1]  }
  0x11   :  { %s712_s6 = smov 80   ;;  %s713_s11 = smov 75   ;;  %v582_v41 = vld [vmem:[%s999_s0 + $0x27] sm:$0x1]   ;;  %v583_v42 = vld [vmem:[%s999_s0 + $0x38] sm:$0x1]  }
  0x12   :  { %s714_s12 = smov 74   ;;  %s715_s17 = smov 73   ;;  %v584_v43 = vld [vmem:[%s999_s0 + $0xd] sm:$0x1]   ;;  %v585_v44 = vld [vmem:[%s999_s0 + $0x1e] sm:$0x1]  }
  0x13   :  { %s716_s18 = smov 72   ;;  %s718_s24 = smov 66   ;;  %v586_v45 = vld [vmem:[%s999_s0 + $0x2f] sm:$0x1]   ;;  %v587_v46 = vld [vmem:[%s999_s0 + $0x4] sm:$0x1]  }
  0x14   :  { %111 = vrot.lane.b32.xlu0 %v564_v22, %s697_s19  ;;  %118 = vrot.lane.b32.xlu1 %v565_v23, %s698_s20  ;;  %s720_s30 = smov 60   ;;  %v588_v47 = vld [vmem:[%s999_s0 + $0x15] sm:$0x1]   ;;  %v589_v48 = vld [vmem:[%s999_s0 + $0x26] sm:$0x1]   ;;  %s722_s7 = smov 58  }
  0x15   :  { %v590_v49 = vld [vmem:[%s999_s0 + $0x37] sm:$0x1]   ;;  %v591_v50 = vld [vmem:[%s999_s0 + $0xc] sm:$0x1]   ;;  %s724_s13 = smov 52   ;;  %s726_s19 = smov 50  }
  0x16   :  { %v592_v51 = vld [vmem:[%s999_s0 + $0x1d] sm:$0x1]   ;;  %v593_v52 = vld [vmem:[%s999_s0 + $0x2e] sm:$0x1]   ;;  %v594_v53 = vld [vmem:[%s999_s0 + $0x3f] sm:$0x1]  }
  0x17   :  { %v595_v54 = vld [vmem:[%s999_s0 + $0x3] sm:$0x1]   ;;  %v596_v55 = vld [vmem:[%s999_s0 + $0x14] sm:$0x1]   ;;  %v597_v56 = vld [vmem:[%s999_s0 + $0x25] sm:$0x1]  }
  0x18   :  { %125 = vrot.lane.b32.xlu0 %v566_v24, %s699_s25  ;;  %131 = vrot.lane.b32.xlu1 %v567_v25, %s700_s26  ;;  %s728_s25 = smov 45   ;;  %v598_v57 = vld [vmem:[%s999_s0 + $0x36] sm:$0x1]   ;;  %v599_v58 = vld [vmem:[%s999_s0 + $0xb] sm:$0x1]   ;;  %s736_s20 = smov 30  }
  0x19   :  { %v600_v59 = vld [vmem:[%s999_s0 + $0x1c] sm:$0x1]   ;;  %v601_v60 = vld [vmem:[%s999_s0 + $0x2d] sm:$0x1]   ;;  %v602_v61 = vld [vmem:[%s999_s0 + $0x3e] sm:$0x1]  }
  0x1a   :  { %v603_v62 = vld [vmem:[%s999_s0 + $0x2] sm:$0x1]   ;;  %v604_v63 = vld [vmem:[%s999_s0 + $0x13] sm:$0x1]   ;;  %v605_v0 = vld [vmem:[%s999_s0 + $0x24] sm:$0x1]  }
  0x1b   :  { %s738_s26 = smov 28   ;;  %v606_v1 = vld [vmem:[%s999_s0 + $0x35] sm:$0x1]   ;;  %v607_v2 = vld [vmem:[%s999_s0 + $0xa] sm:$0x1]   ;;  %vm16_vm9 = vcmask 1048568  }
  0x1c   :  { %138 = vrot.lane.b32.xlu0 %v568_v26, %s701_s2  ;;  %145 = vrot.lane.b32.xlu1 %v569_v27, %s702_s3  ;;  %s730_s2 = smov 43   ;;  %s740_s3 = smov 22   ;;  %v608_v3 = vld [vmem:[%s999_s0 + $0x1b] sm:$0x1]   ;;  %v609_v4 = vld [vmem:[%s999_s0 + $0x2c] sm:$0x1]  }
  0x1d   :  { %v610_v5 = vld [vmem:[%s999_s0 + $0x3d] sm:$0x1]   ;;  %v611_v6 = vld [vmem:[%s999_s0 + $0x1] sm:$0x1]   ;;  %v612_v7 = vld [vmem:[%s999_s0 + $0x12] sm:$0x1]  }
  0x1e   :  { %v613_v8 = vld [vmem:[%s999_s0 + $0x23] sm:$0x1]   ;;  %s746_s21 = smov 13   ;;  %v614_v9 = vld [vmem:[%s999_s0 + $0x34] sm:$0x1]   ;;  %vm41_vm10 = vcmask 97280  }
  0x1f   :  { %vm44_vm11 = vcmask 1048552   ;;  %v615_v11 = vld [vmem:[%s999_s0 + $0x9] sm:$0x1]   ;;  %vm27_vm12 = vcmask 105472   ;;  %vm30_vm13 = vcmask 1048560   ;;  %s748_s27 = smov 7  }
  0x20   :  { %152 = vrot.lane.b32.xlu0 %v570_v28, %s703_s8  ;;  %159 = vrot.lane.b32.xlu1 %v571_v29, %s704_s9  ;;  %s732_s8 = smov 37   ;;  %s742_s9 = smov 20   ;;  %v616_v13 = vld [vmem:[%s999_s0 + $0x1a] sm:$0x1]   ;;  %vm55_vm14 = vcmask 56320   ;;  %vm58_vm15 = vcmask 1048512  }
  0x21   :  { %v617_v15 = vld [vmem:[%s999_s0 + $0x2b] sm:$0x1]   ;;  %vm68_vm0 = vcmask 48128   ;;  %vm71_vm1 = vcmask 1048504   ;;  %s750_s4 = smov 5   ;;  %vm82_vm2 = vcmask 39936  }
  0x22   :  { %v618_v17 = vld [vmem:[%s999_s0 + $0x3c] sm:$0x1]   ;;  %vm85_vm3 = vcmask 1048496   ;;  %s751_s0 = smov 4   ;;  %vm96_vm4 = vcmask 31744   ;;  %vm99_vm5 = vcmask 1048488  }
  0x23   :  { %vm106_vm6 = vcmask 1040256   ;;  %vm113_vm7 = vcmask 1032056  }
  0x24   :  { %166 = vrot.lane.b32.xlu0 %v572_v30, %s705_s14  ;;  %173 = vrot.lane.b32.xlu1 %v573_v31, %s706_s15  ;;  %s734_s14 = smov 35   ;;  %s744_s15 = smov 15  }
  0x28   :  { %179 = vrot.lane.b32.xlu0 %v574_v32, %s707_s22  ;;  %186 = vrot.lane.b32.xlu1 %v575_v34, %s708_s23  ;;  %s717_s23 = smov 67  }
  0x2c   :  { %193 = vrot.lane.b32.xlu0 %v576_v35, %s709_s28  ;;  %200 = vrot.lane.b32.xlu1 %v577_v36, %s710_s29  ;;  %s719_s29 = smov 65  }
  0x30   :  { %207 = vrot.lane.b32.xlu0 %v578_v37, %s711_s5  ;;  %214 = vrot.lane.b32.xlu1 %v579_v38, %s712_s6  ;;  %s721_s6 = smov 59  }
  0x34   :  { %221 = vrot.lane.b32.xlu0 %v580_v39, %s713_s11  ;;  %227 = vrot.lane.b32.xlu1 %v581_v40, %s714_s12  ;;  %s723_s12 = smov 57  }
  0x38   :  { %234 = vrot.lane.b32.xlu0 %v582_v41, %s715_s17  ;;  %241 = vrot.lane.b32.xlu1 %v583_v42, %s716_s18  ;;  %s725_s18 = smov 51  }
  0x3c   :  { %248 = vrot.lane.b32.xlu0 %v584_v43, %s717_s23  ;;  %255 = vrot.lane.b32.xlu1 %v585_v44, %s718_s24  ;;  %s727_s24 = smov 49  }
  0x40   :  { %262 = vrot.lane.b32.xlu0 %v586_v45, %s719_s29  ;;  %269 = vrot.lane.b32.xlu1 %v587_v46, %s720_s30  ;;  %s729_s30 = smov 44  }
  0x44   :  { %275 = vrot.lane.b32.xlu0 %v588_v47, %s721_s6  ;;  %282 = vrot.lane.b32.xlu1 %v589_v48, %s722_s7  ;;  %s731_s7 = smov 42  }
  0x48   :  { %289 = vrot.lane.b32.xlu0 %v590_v49, %s723_s12  ;;  %296 = vrot.lane.b32.xlu1 %v591_v50, %s724_s13  ;;  %s733_s13 = smov 36  }
  0x4c   :  { %303 = vrot.lane.b32.xlu0 %v592_v51, %s725_s18  ;;  %310 = vrot.lane.b32.xlu1 %v593_v52, %s726_s19  ;;  %s735_s19 = smov 34  }
  0x50   :  { %317 = vrot.lane.b32.xlu0 %v594_v53, %s727_s24  ;;  %324 = vrot.lane.b32.xlu1 %v595_v54, %s728_s25  ;;  %s737_s25 = smov 29  }
  0x54   :  { %330 = vrot.lane.b32.xlu0 %v596_v55, %s729_s30  ;;  %337 = vrot.lane.b32.xlu1 %v597_v56, %s730_s2  ;;  %s739_s2 = smov 27  }
  0x58   :  { %344 = vrot.lane.b32.xlu0 %v598_v57, %s731_s7  ;;  %351 = vrot.lane.b32.xlu1 %v599_v58, %s732_s8  ;;  %s741_s8 = smov 21  }
  0x5c   :  { %358 = vrot.lane.b32.xlu0 %v600_v59, %s733_s13  ;;  %365 = vrot.lane.b32.xlu1 %v601_v60, %s734_s14  ;;  %s743_s14 = smov 19  }
  0x60   :  { %372 = vrot.lane.b32.xlu0 %v602_v61, %s735_s19  ;;  %379 = vrot.lane.b32.xlu1 %v603_v62, %s736_s20  ;;  %s745_s20 = smov 14  }
  0x64   :  { %385 = vrot.lane.b32.xlu0 %v604_v63, %s737_s25  ;;  %392 = vrot.lane.b32.xlu1 %v605_v0, %s738_s26  ;;  %s747_s26 = smov 12  }
  0x68   :  { %399 = vrot.lane.b32.xlu0 %v606_v1, %s739_s2  ;;  %406 = vrot.lane.b32.xlu1 %v607_v2, %s740_s3  ;;  %s749_s3 = smov 6  }
  0x6c   :  { %413 = vrot.lane.b32.xlu0 %v608_v3, %s741_s8  ;;  %420 = vrot.lane.b32.xlu1 %v609_v4, %s742_s9 }
  0x70   :  { %427 = vrot.lane.b32.xlu0 %v610_v5, %s743_s14  ;;  %434 = vrot.lane.b32.xlu1 %v611_v6, %s744_s15 }
  0x74   :  { %440 = vrot.lane.b32.xlu0 %v612_v7, %s745_s20  ;;  %447 = vrot.lane.b32.xlu1 %v613_v8, %s746_s21 }
  0x76   :  { %v12_v10 = vpop.permute.xlu0 %11   ;;  %v40_v12 = vpop.permute.xlu1 %39  }
  0x77   :  { %15 = vst.msk [vmem:[#allocation0 + $0x10] sm:$0x1] %vm13_vm8, %v12_v10   ;;  %vm120_vm8 = vcmask 1023856  }
  0x78   :  { %18 = vst.msk [vmem:[#allocation0 + $0x8] sm:$0x1] %vm16_vm9, %v12_v10   ;;  %454 = vrot.lane.b32.xlu0 %v614_v9, %s747_s26  ;;  %461 = vrot.lane.b32.xlu1 %v615_v11, %s748_s27  ;;  %vm127_vm9 = vcmask 982856  }
  0x79   :  { %43 = vst.msk [vmem:[#allocation0 + $0x30] sm:$0x1] %vm41_vm10, %v40_v12   ;;  %vm133_vm10 = vcmask 974656  }
  0x7a   :  { %46 = vst.msk [vmem:[#allocation0 + $0x28] sm:$0x1] %vm44_vm11, %v40_v12   ;;  %v26_v14 = vpop.permute.xlu0 %25   ;;  %v54_v16 = vpop.permute.xlu1 %53   ;;  %vm140_vm11 = vcmask 966456  }
  0x7b   :  { %29 = vst.msk [vmem:[#allocation0 + $0x20] sm:$0x1] %vm27_vm12, %v26_v14   ;;  %vm147_vm12 = vcmask 958256  }
  0x7c   :  { %32 = vst.msk [vmem:[#allocation0 + $0x18] sm:$0x1] %vm30_vm13, %v26_v14   ;;  %468 = vrot.lane.b32.xlu0 %v616_v13, %s749_s3  ;;  %475 = vrot.lane.b32.xlu1 %v617_v15, %s750_s4  ;;  %vm154_vm13 = vcmask 917256  }
  0x7d   :  { %57 = vst.msk [vmem:[#allocation0 + $0x8] sm:$0x1] %vm55_vm14, %v54_v16   ;;  %vm161_vm14 = vcmask 909056  }
  0x7e   :  { %59 = vst.msk [vmem:[#allocation0] sm:$0x1] %vm58_vm15, %v54_v16   ;;  %v67_v18 = vpop.permute.xlu0 %66   ;;  %v81_v19 = vpop.permute.xlu1 %80   ;;  %vm168_vm15 = vcmask 900856  }
  0x7f   :  { %70 = vst.msk [vmem:[#allocation0 + $0x18] sm:$0x1] %vm68_vm0, %v67_v18   ;;  %vm175_vm0 = vcmask 859856  }
  0x80   :  { %73 = vst.msk [vmem:[#allocation0 + $0x10] sm:$0x1] %vm71_vm1, %v67_v18   ;;  %482 = vrot.lane.b32.xlu0 %v618_v17, %s751_s0  ;;  %vm181_vm1 = vcmask 851656  }
  0x81   :  { %84 = vst.msk [vmem:[#allocation0 + $0x28] sm:$0x1] %vm82_vm2, %v81_v19   ;;  %vm188_vm2 = vcmask 843456  }
  0x82   :  { %87 = vst.msk [vmem:[#allocation0 + $0x20] sm:$0x1] %vm85_vm3, %v81_v19   ;;  %v95_v20 = vpop.permute.xlu0 %94   ;;  %v105_v21 = vpop.permute.xlu1 %104   ;;  %vm195_vm3 = vcmask 835256  }
  0x83   :  { %98 = vst.msk [vmem:[#allocation0 + $0x38] sm:$0x1] %vm96_vm4, %v95_v20   ;;  %vm202_vm4 = vcmask 794256  }
  0x84   :  { %101 = vst.msk [vmem:[#allocation0 + $0x30] sm:$0x1] %vm99_vm5, %v95_v20   ;;  %vm209_vm5 = vcmask 786056  }
  0x85   :  { %108 = vst.msk [vmem:[#allocation0 + $0x8] sm:$0x1] %vm106_vm6, %v105_v21   ;;  %vm216_vm6 = vcmask 777856  }
  0x86   :  { %v112_v22 = vpop.permute.xlu0 %111   ;;  %v119_v23 = vpop.permute.xlu1 %118  }
  0x87   :  { %115 = vst.msk [vmem:[#allocation0 + $0x18] sm:$0x1] %vm113_vm7, %v112_v22   ;;  %vm223_vm7 = vcmask 736856  }
  0x88   :  { %122 = vst.msk [vmem:[#allocation0 + $0x28] sm:$0x1] %vm120_vm8, %v119_v23   ;;  %vm229_vm8 = vcmask 728656  }
  0x8a   :  { %v126_v24 = vpop.permute.xlu0 %125   ;;  %v132_v25 = vpop.permute.xlu1 %131  }
  0x8b   :  { %128 = vst.msk [vmem:[#allocation0] sm:$0x1] %vm127_vm9, %v126_v24   ;;  %vm236_vm9 = vcmask 720456  }
  0x8c   :  { %135 = vst.msk [vmem:[#allocation0 + $0x10] sm:$0x1] %vm133_vm10, %v132_v25   ;;  %vm243_vm10 = vcmask 712256  }
  0x8e   :  { %v139_v26 = vpop.permute.xlu0 %138   ;;  %v146_v27 = vpop.permute.xlu1 %145  }
  0x8f   :  { %142 = vst.msk [vmem:[#allocation0 + $0x20] sm:$0x1] %vm140_vm11, %v139_v26   ;;  %vm250_vm11 = vcmask 671256  }
  0x90   :  { %149 = vst.msk [vmem:[#allocation0 + $0x30] sm:$0x1] %vm147_vm12, %v146_v27   ;;  %vm257_vm12 = vcmask 663056  }
  0x92   :  { %v153_v28 = vpop.permute.xlu0 %152   ;;  %v160_v29 = vpop.permute.xlu1 %159  }
  0x93   :  { %156 = vst.msk [vmem:[#allocation0 + $0x8] sm:$0x1] %vm154_vm13, %v153_v28   ;;  %vm264_vm13 = vcmask 654856  }
  0x94   :  { %163 = vst.msk [vmem:[#allocation0 + $0x18] sm:$0x1] %vm161_vm14, %v160_v29   ;;  %vm271_vm14 = vcmask 613856  }
  0x96   :  { %v167_v30 = vpop.permute.xlu0 %166   ;;  %v174_v31 = vpop.permute.xlu1 %173  }
  0x97   :  { %170 = vst.msk [vmem:[#allocation0 + $0x28] sm:$0x1] %vm168_vm15, %v167_v30   ;;  %vm277_vm15 = vcmask 605656  }
  0x98   :  { %176 = vst.msk [vmem:[#allocation0] sm:$0x1] %vm175_vm0, %v174_v31   ;;  %vm284_vm0 = vcmask 597456  }
  0x9a   :  { %v180_v32 = vpop.permute.xlu0 %179   ;;  %v187_v33 = vpop.permute.xlu1 %186  }
  0x9b   :  { %183 = vst.msk [vmem:[#allocation0 + $0x10] sm:$0x1] %vm181_vm1, %v180_v32   ;;  %vm291_vm1 = vcmask 589256  }
  0x9c   :  { %190 = vst.msk [vmem:[#allocation0 + $0x20] sm:$0x1] %vm188_vm2, %v187_v33   ;;  %vm298_vm2 = vcmask 548256  }
  0x9e   :  { %v194_v34 = vpop.permute.xlu0 %193   ;;  %v201_v35 = vpop.permute.xlu1 %200  }
  0x9f   :  { %197 = vst.msk [vmem:[#allocation0 + $0x30] sm:$0x1] %vm195_vm3, %v194_v34   ;;  %vm305_vm3 = vcmask 540056  }
  0xa0   :  { %204 = vst.msk [vmem:[#allocation0 + $0x8] sm:$0x1] %vm202_vm4, %v201_v35   ;;  %vm312_vm4 = vcmask 531856  }
  0xa2   :  { %v208_v36 = vpop.permute.xlu0 %207   ;;  %v215_v37 = vpop.permute.xlu1 %214  }
  0xa3   :  { %211 = vst.msk [vmem:[#allocation0 + $0x18] sm:$0x1] %vm209_vm5, %v208_v36   ;;  %vm319_vm5 = vcmask 523656  }
  0xa4   :  { %218 = vst.msk [vmem:[#allocation0 + $0x28] sm:$0x1] %vm216_vm6, %v215_v37   ;;  %vm326_vm6 = vcmask 490856  }
  0xa6   :  { %v222_v38 = vpop.permute.xlu0 %221   ;;  %v228_v39 = vpop.permute.xlu1 %227  }
  0xa7   :  { %224 = vst.msk [vmem:[#allocation0] sm:$0x1] %vm223_vm7, %v222_v38   ;;  %vm332_vm7 = vcmask 482656  }
  0xa8   :  { %231 = vst.msk [vmem:[#allocation0 + $0x10] sm:$0x1] %vm229_vm8, %v228_v39   ;;  %vm339_vm8 = vcmask 474456  }
  0xaa   :  { %v235_v40 = vpop.permute.xlu0 %234   ;;  %v242_v41 = vpop.permute.xlu1 %241  }
  0xab   :  { %238 = vst.msk [vmem:[#allocation0 + $0x20] sm:$0x1] %vm236_vm9, %v235_v40   ;;  %vm346_vm9 = vcmask 466256  }
  0xac   :  { %245 = vst.msk [vmem:[#allocation0 + $0x30] sm:$0x1] %vm243_vm10, %v242_v41   ;;  %vm353_vm10 = vcmask 425256  }
  0xae   :  { %v249_v42 = vpop.permute.xlu0 %248   ;;  %v256_v43 = vpop.permute.xlu1 %255  }
  0xaf   :  { %252 = vst.msk [vmem:[#allocation0 + $0x8] sm:$0x1] %vm250_vm11, %v249_v42   ;;  %vm360_vm11 = vcmask 417056  }
  0xb0   :  { %259 = vst.msk [vmem:[#allocation0 + $0x18] sm:$0x1] %vm257_vm12, %v256_v43   ;;  %vm367_vm12 = vcmask 408856  }
  0xb2   :  { %v263_v44 = vpop.permute.xlu0 %262   ;;  %v270_v45 = vpop.permute.xlu1 %269  }
  0xb3   :  { %266 = vst.msk [vmem:[#allocation0 + $0x28] sm:$0x1] %vm264_vm13, %v263_v44   ;;  %vm374_vm13 = vcmask 400656  }
  0xb4   :  { %272 = vst.msk [vmem:[#allocation0] sm:$0x1] %vm271_vm14, %v270_v45   ;;  %vm381_vm14 = vcmask 367856  }
  0xb6   :  { %v276_v46 = vpop.permute.xlu0 %275   ;;  %v283_v47 = vpop.permute.xlu1 %282  }
  0xb7   :  { %279 = vst.msk [vmem:[#allocation0 + $0x10] sm:$0x1] %vm277_vm15, %v276_v46   ;;  %vm387_vm15 = vcmask 359656  }
  0xb8   :  { %286 = vst.msk [vmem:[#allocation0 + $0x20] sm:$0x1] %vm284_vm0, %v283_v47   ;;  %vm394_vm0 = vcmask 351456  }
  0xba   :  { %v290_v48 = vpop.permute.xlu0 %289   ;;  %v297_v49 = vpop.permute.xlu1 %296  }
  0xbb   :  { %293 = vst.msk [vmem:[#allocation0 + $0x30] sm:$0x1] %vm291_vm1, %v290_v48   ;;  %vm401_vm1 = vcmask 343256  }
  0xbc   :  { %300 = vst.msk [vmem:[#allocation0 + $0x8] sm:$0x1] %vm298_vm2, %v297_v49   ;;  %vm408_vm2 = vcmask 302256  }
  0xbe   :  { %v304_v50 = vpop.permute.xlu0 %303   ;;  %v311_v51 = vpop.permute.xlu1 %310  }
  0xbf   :  { %307 = vst.msk [vmem:[#allocation0 + $0x18] sm:$0x1] %vm305_vm3, %v304_v50   ;;  %vm415_vm3 = vcmask 294056  }
  0xc0   :  { %314 = vst.msk [vmem:[#allocation0 + $0x28] sm:$0x1] %vm312_vm4, %v311_v51   ;;  %vm422_vm4 = vcmask 285856  }
  0xc2   :  { %v318_v52 = vpop.permute.xlu0 %317   ;;  %v325_v53 = vpop.permute.xlu1 %324  }
  0xc3   :  { %321 = vst.msk [vmem:[#allocation0 + $0x38] sm:$0x1] %vm319_vm5, %v318_v52   ;;  %vm429_vm5 = vcmask 277656  }
  0xc4   :  { %327 = vst.msk [vmem:[#allocation0] sm:$0x1] %vm326_vm6, %v325_v53   ;;  %vm436_vm6 = vcmask 244856  }
  0xc6   :  { %v331_v54 = vpop.permute.xlu0 %330   ;;  %v338_v55 = vpop.permute.xlu1 %337  }
  0xc7   :  { %334 = vst.msk [vmem:[#allocation0 + $0x10] sm:$0x1] %vm332_vm7, %v331_v54   ;;  %vm442_vm7 = vcmask 236656  }
  0xc8   :  { %341 = vst.msk [vmem:[#allocation0 + $0x20] sm:$0x1] %vm339_vm8, %v338_v55   ;;  %vm449_vm8 = vcmask 228456  }
  0xca   :  { %v345_v56 = vpop.permute.xlu0 %344   ;;  %v352_v57 = vpop.permute.xlu1 %351  }
  0xcb   :  { %348 = vst.msk [vmem:[#allocation0 + $0x30] sm:$0x1] %vm346_vm9, %v345_v56   ;;  %vm456_vm9 = vcmask 220256  }
  0xcc   :  { %355 = vst.msk [vmem:[#allocation0 + $0x8] sm:$0x1] %vm353_vm10, %v352_v57   ;;  %vm463_vm10 = vcmask 179256  }
  0xce   :  { %v359_v58 = vpop.permute.xlu0 %358   ;;  %v366_v59 = vpop.permute.xlu1 %365  }
  0xcf   :  { %362 = vst.msk [vmem:[#allocation0 + $0x18] sm:$0x1] %vm360_vm11, %v359_v58   ;;  %vm470_vm11 = vcmask 171056  }
  0xd0   :  { %369 = vst.msk [vmem:[#allocation0 + $0x28] sm:$0x1] %vm367_vm12, %v366_v59   ;;  %vm477_vm12 = vcmask 162856  }
  0xd2   :  { %v373_v60 = vpop.permute.xlu0 %372   ;;  %v380_v61 = vpop.permute.xlu1 %379  }
  0xd3   :  { %376 = vst.msk [vmem:[#allocation0 + $0x38] sm:$0x1] %vm374_vm13, %v373_v60   ;;  %vm484_vm13 = vcmask 154656  }
  0xd4   :  { %382 = vst.msk [vmem:[#allocation0] sm:$0x1] %vm381_vm14, %v380_v61  }
  0xd6   :  { %v386_v62 = vpop.permute.xlu0 %385   ;;  %v393_v63 = vpop.permute.xlu1 %392  }
  0xd7   :  { %389 = vst.msk [vmem:[#allocation0 + $0x10] sm:$0x1] %vm387_vm15, %v386_v62  }
  0xd8   :  { %396 = vst.msk [vmem:[#allocation0 + $0x20] sm:$0x1] %vm394_vm0, %v393_v63  }
  0xda   :  { %v400_v0 = vpop.permute.xlu0 %399   ;;  %v407_v1 = vpop.permute.xlu1 %406  }
  0xdb   :  { %403 = vst.msk [vmem:[#allocation0 + $0x30] sm:$0x1] %vm401_vm1, %v400_v0  }
  0xdc   :  { %410 = vst.msk [vmem:[#allocation0 + $0x8] sm:$0x1] %vm408_vm2, %v407_v1  }
  0xde   :  { %v414_v2 = vpop.permute.xlu0 %413   ;;  %v421_v3 = vpop.permute.xlu1 %420  }
  0xdf   :  { %417 = vst.msk [vmem:[#allocation0 + $0x18] sm:$0x1] %vm415_vm3, %v414_v2  }
  0xe0   :  { %424 = vst.msk [vmem:[#allocation0 + $0x28] sm:$0x1] %vm422_vm4, %v421_v3  }
  0xe2   :  { %v428_v4 = vpop.permute.xlu0 %427   ;;  %v435_v5 = vpop.permute.xlu1 %434  }
  0xe3   :  { %431 = vst.msk [vmem:[#allocation0 + $0x38] sm:$0x1] %vm429_vm5, %v428_v4  }
  0xe4   :  { %437 = vst.msk [vmem:[#allocation0] sm:$0x1] %vm436_vm6, %v435_v5  }
  0xe6   :  { %v441_v6 = vpop.permute.xlu0 %440   ;;  %v448_v7 = vpop.permute.xlu1 %447  }
  0xe7   :  { %444 = vst.msk [vmem:[#allocation0 + $0x10] sm:$0x1] %vm442_vm7, %v441_v6  }
  0xe8   :  { %451 = vst.msk [vmem:[#allocation0 + $0x20] sm:$0x1] %vm449_vm8, %v448_v7  }
  0xea   :  { %v455_v8 = vpop.permute.xlu0 %454   ;;  %v462_v10 = vpop.permute.xlu1 %461  }
  0xeb   :  { %v491_v9 = vld [vmem:[#allocation0] sm:$0x1]  ;;  %458 = vst.msk [vmem:[#allocation0 + $0x30] sm:$0x1] %vm456_vm9, %v455_v8  }
  0xec   :  { %494 = vst [vmem:[%s1000_s1] sm:$0x1] %v491_v9  ;;  %465 = vst.msk [vmem:[#allocation0 + $0x8] sm:$0x1] %vm463_vm10, %v462_v10  }
  0xee   :  { %v502_v11 = vld [vmem:[#allocation0 + $0x10] sm:$0x1]  ;;  %v469_v12 = vpop.permute.xlu0 %468   ;;  %v476_v14 = vpop.permute.xlu1 %475  }
  0xef   :  { %620 = vst [vmem:[%s1000_s1 + $0x2] sm:$0x1] %v502_v11  ;;  %v516_v13 = vld [vmem:[#allocation0 + $0x20] sm:$0x1]  ;;  %472 = vst.msk [vmem:[#allocation0 + $0x18] sm:$0x1] %vm470_vm11, %v469_v12  }
  0xf0   :  { %622 = vst [vmem:[%s1000_s1 + $0x4] sm:$0x1] %v516_v13  ;;  %479 = vst.msk [vmem:[#allocation0 + $0x28] sm:$0x1] %vm477_vm12, %v476_v14  }
  0xf2   :  { %v530_v15 = vld [vmem:[#allocation0 + $0x30] sm:$0x1]  ;;  %v483_v16 = vpop.permute.xlu0 %482  }
  0xf3   :  { %624 = vst [vmem:[%s1000_s1 + $0x6] sm:$0x1] %v530_v15  ;;  %v496_v17 = vld [vmem:[#allocation0 + $0x8] sm:$0x1]  ;;  %486 = vst.msk [vmem:[#allocation0 + $0x38] sm:$0x1] %vm484_vm13, %v483_v16  }
  0xf4   :  { %619 = vst [vmem:[%s1000_s1 + $0x1] sm:$0x1] %v496_v17 }
  0xf6   :  { %v509_v18 = vld [vmem:[#allocation0 + $0x18] sm:$0x1] }
  0xf7   :  { %621 = vst [vmem:[%s1000_s1 + $0x3] sm:$0x1] %v509_v18  ;;  %v523_v19 = vld [vmem:[#allocation0 + $0x28] sm:$0x1] }
  0xf8   :  { %623 = vst [vmem:[%s1000_s1 + $0x5] sm:$0x1] %v523_v19 }
  0xfa   :  { %v537_v20 = vld [vmem:[#allocation0 + $0x38] sm:$0x1] }
  0xfb   :  { %625 = vst [vmem:[%s1000_s1 + $0x7] sm:$0x1] %v537_v20 }

// kernel: tile.23
= control target key start
LH: loop header
LB: loop body
LE: loop exit
PB: predicated region body
PF: predicated region fallthrough
CT: control target
= control target key end

     0   :  { %s64_s0 = inlined_call_operand.vmem [shape: f32[10], index: 0, kind: input, shape index: {}]   ;;  %s65_s1 = inlined_call_operand.vmem [shape: f32[64,10], index: 1, kind: output, shape index: {}]  }
   0x1   :  { %v4_v0 = vld [vmem:[%s64_s0] ss:$0 sm:$0xff] }
   0x2   :  { %5 = vst [vmem:[%s65_s1] sm:$0xff] %v4_v0  ;;  %20 = vst [vmem:[%s65_s1 + $0x8] sm:$0xff] %v4_v0 }
   0x3   :  { %21 = vst [vmem:[%s65_s1 + $0x10] sm:$0xff] %v4_v0  ;;  %22 = vst [vmem:[%s65_s1 + $0x18] sm:$0xff] %v4_v0 }
   0x4   :  { %23 = vst [vmem:[%s65_s1 + $0x20] sm:$0xff] %v4_v0  ;;  %24 = vst [vmem:[%s65_s1 + $0x28] sm:$0xff] %v4_v0 }
   0x5   :  { %25 = vst [vmem:[%s65_s1 + $0x30] sm:$0xff] %v4_v0  ;;  %26 = vst [vmem:[%s65_s1 + $0x38] sm:$0xff] %v4_v0 }

// kernel: tile.24
= control target key start
LH: loop header
LB: loop body
LE: loop exit
PB: predicated region body
PF: predicated region fallthrough
CT: control target
= control target key end

     0   :  { %vm9_vm0 = vcmask 15360   ;;  %vm27_vm1 = vcmask 48128   ;;  %s634_s14 = smov 126   ;;  %vm23_vm2 = vcmask 31744   ;;  %s635_s19 = smov 122   ;;  %vm13_vm3 = vcmask 64512   ;;  %s934_s0 = inlined_call_operand.vmem [shape: f32[64,10], index: 0, kind: input, shape index: {}]   ;;  %s935_s1 = inlined_call_operand.vmem [shape: f32[1,640], index: 1, kind: output, shape index: {}]  }
   0x1   :  { %v500_v0 = vld [vmem:[%s934_s0 + $0x33] sm:$0x1]   ;;  %v504_v3 = vld [vmem:[%s934_s0 + $0x19] sm:$0x1]   ;;  %v502_v6 = vld [vmem:[%s934_s0 + $0x26] sm:$0x1]  }
   0x2   :  { %v501_v1 = vld [vmem:[%s934_s0 + $0x33] sm:$0x1]   ;;  %v505_v4 = vld [vmem:[%s934_s0 + $0x19] sm:$0x1]   ;;  %v503_v7 = vld [vmem:[%s934_s0 + $0x26] sm:$0x1]  }
   0x3   :  { %v10_v2 = vsel %vm9_vm0, %v501_v1, %v500_v0  ;;  %v38_v5 = vsel %vm27_vm1, %v505_v4, %v504_v3  ;;  %v24_v8 = vsel %vm23_vm2, %v503_v7, %v502_v6  ;;  %v506_v9 = vld [vmem:[%s934_s0 + $0xc] sm:$0x1]   ;;  %s636_s24 = smov 124   ;;  %s637_s25 = smov 120   ;;  %v508_v12 = vld [vmem:[%s934_s0 + $0x3f] sm:$0x1]  }
   0x4   :  { %11 = vrot.lane.b32.xlu0 %v10_v2, %s634_s14  ;;  %39 = vrot.lane.b32.xlu1 %v38_v5, %s635_s19  ;;  %v507_v10 = vld [vmem:[%s934_s0 + $0xc] sm:$0x1]   ;;  %v509_v13 = vld [vmem:[%s934_s0 + $0x32] sm:$0x1]   ;;  %s638_s30 = smov 118   ;;  %s639_s2 = smov 116  }
   0x5   :  { %v52_v11 = vsel %vm13_vm3, %v507_v10, %v506_v9  ;;  %v510_v14 = vld [vmem:[%s934_s0 + $0x25] sm:$0x1]   ;;  %v511_v15 = vld [vmem:[%s934_s0 + $0x18] sm:$0x1]   ;;  %s640_s7 = smov 114   ;;  %s641_s8 = smov 112  }
   0x6   :  { %v512_v16 = vld [vmem:[%s934_s0 + $0xb] sm:$0x1]   ;;  %v513_v17 = vld [vmem:[%s934_s0 + $0x3e] sm:$0x1]   ;;  %s642_s13 = smov 110   ;;  %s643_s14 = smov 108  }
   0x7   :  { %v514_v18 = vld [vmem:[%s934_s0 + $0x31] sm:$0x1]   ;;  %v515_v19 = vld [vmem:[%s934_s0 + $0x24] sm:$0x1]   ;;  %s644_s19 = smov 106   ;;  %s645_s20 = smov 104  }
   0x8   :  { %25 = vrot.lane.b32.xlu0 %v24_v8, %s636_s24  ;;  %53 = vrot.lane.b32.xlu1 %v52_v11, %s637_s25  ;;  %v516_v20 = vld [vmem:[%s934_s0 + $0x17] sm:$0x1]   ;;  %v517_v21 = vld [vmem:[%s934_s0 + $0xa] sm:$0x1]   ;;  %s646_s25 = smov 102   ;;  %s647_s26 = smov 100  }
   0x9   :  { %v518_v22 = vld [vmem:[%s934_s0 + $0x3d] sm:$0x1]   ;;  %v519_v23 = vld [vmem:[%s934_s0 + $0x30] sm:$0x1]   ;;  %s649_s3 = smov 96   ;;  %vm3_vm4 = vcmask 80896  }
   0xa   :  { %v520_v24 = vld [vmem:[%s934_s0 + $0x23] sm:$0x1]   ;;  %v521_v25 = vld [vmem:[%s934_s0 + $0x16] sm:$0x1]   ;;  %v2_v26 = vld [vmem:[%s934_s0] sm:$0x1]  }
   0xb   :  { %s650_s10 = smov 94   ;;  %4 = vst.msk [vmem:[#allocation0] sm:$0x1] %vm3_vm4, %v2_v26   ;;  %s651_s11 = smov 92   ;;  %v522_v27 = vld [vmem:[%s934_s0 + $0x9] sm:$0x1]  }
   0xc   :  { %62 = vrot.lane.b32.xlu0 %v508_v12, %s638_s30  ;;  %69 = vrot.lane.b32.xlu1 %v509_v13, %s639_s2  ;;  %s648_s2 = smov 98   ;;  %v523_v28 = vld [vmem:[%s934_s0 + $0x3c] sm:$0x1]   ;;  %s652_s16 = smov 90   ;;  %v524_v29 = vld [vmem:[%s934_s0 + $0x2f] sm:$0x1]  }
   0xd   :  { %s653_s17 = smov 88   ;;  %v525_v30 = vld [vmem:[%s934_s0 + $0x22] sm:$0x1]   ;;  %s654_s22 = smov 86   ;;  %v526_v31 = vld [vmem:[%s934_s0 + $0x15] sm:$0x1]  }
   0xe   :  { %s655_s23 = smov 84   ;;  %v527_v32 = vld [vmem:[%s934_s0 + $0x8] sm:$0x1]   ;;  %s656_s28 = smov 82   ;;  %v528_v33 = vld [vmem:[%s934_s0 + $0x3b] sm:$0x1]  }
   0xf   :  { %s657_s29 = smov 80   ;;  %v529_v34 = vld [vmem:[%s934_s0 + $0x2e] sm:$0x1]   ;;  %s658_s5 = smov 78   ;;  %v530_v35 = vld [vmem:[%s934_s0 + $0x21] sm:$0x1]  }
  0x10   :  { %76 = vrot.lane.b32.xlu0 %v510_v14, %s640_s7  ;;  %83 = vrot.lane.b32.xlu1 %v511_v15, %s641_s8  ;;  %s659_s6 = smov 76   ;;  %v531_v36 = vld [vmem:[%s934_s0 + $0x14] sm:$0x1]   ;;  %s661_s12 = smov 72   ;;  %v532_v37 = vld [vmem:[%s934_s0 + $0x7] sm:$0x1]  }
  0x11   :  { %v533_v38 = vld [vmem:[%s934_s0 + $0x3a] sm:$0x1]   ;;  %s663_s18 = smov 68   ;;  %v534_v39 = vld [vmem:[%s934_s0 + $0x2d] sm:$0x1]   ;;  %s665_s24 = smov 64  }
  0x12   :  { %v535_v40 = vld [vmem:[%s934_s0 + $0x20] sm:$0x1]   ;;  %v536_v41 = vld [vmem:[%s934_s0 + $0x13] sm:$0x1]   ;;  %v537_v42 = vld [vmem:[%s934_s0 + $0x6] sm:$0x1]  }
  0x13   :  { %s667_s30 = smov 60   ;;  %v538_v43 = vld [vmem:[%s934_s0 + $0x39] sm:$0x1]   ;;  %v539_v44 = vld [vmem:[%s934_s0 + $0x2c] sm:$0x1]   ;;  %s669_s7 = smov 56  }
  0x14   :  { %90 = vrot.lane.b32.xlu0 %v512_v16, %s642_s13  ;;  %96 = vrot.lane.b32.xlu1 %v513_v17, %s643_s14  ;;  %v540_v45 = vld [vmem:[%s934_s0 + $0x1f] sm:$0x1]   ;;  %v541_v46 = vld [vmem:[%s934_s0 + $0x12] sm:$0x1]   ;;  %s671_s13 = smov 52   ;;  %s679_s8 = smov 36  }
  0x15   :  { %v542_v47 = vld [vmem:[%s934_s0 + $0x5] sm:$0x1]   ;;  %v543_v48 = vld [vmem:[%s934_s0 + $0x38] sm:$0x1]   ;;  %v544_v49 = vld [vmem:[%s934_s0 + $0x2b] sm:$0x1]  }
  0x16   :  { %v545_v50 = vld [vmem:[%s934_s0 + $0x1e] sm:$0x1]   ;;  %v546_v51 = vld [vmem:[%s934_s0 + $0x11] sm:$0x1]   ;;  %v547_v52 = vld [vmem:[%s934_s0 + $0x4] sm:$0x1]  }
  0x17   :  { %v548_v53 = vld [vmem:[%s934_s0 + $0x37] sm:$0x1]   ;;  %v549_v54 = vld [vmem:[%s934_s0 + $0x2a] sm:$0x1]   ;;  %v550_v55 = vld [vmem:[%s934_s0 + $0x1d] sm:$0x1]  }
  0x18   :  { %103 = vrot.lane.b32.xlu0 %v514_v18, %s644_s19  ;;  %110 = vrot.lane.b32.xlu1 %v515_v19, %s645_s20  ;;  %s673_s19 = smov 48   ;;  %v551_v56 = vld [vmem:[%s934_s0 + $0x10] sm:$0x1]   ;;  %s681_s14 = smov 32   ;;  %v552_v57 = vld [vmem:[%s934_s0 + $0x3] sm:$0x1]  }
  0x19   :  { %v553_v58 = vld [vmem:[%s934_s0 + $0x36] sm:$0x1]   ;;  %s683_s20 = smov 28   ;;  %v554_v59 = vld [vmem:[%s934_s0 + $0x29] sm:$0x1]   ;;  %s689_s9 = smov 16  }
  0x1a   :  { %v555_v60 = vld [vmem:[%s934_s0 + $0x1c] sm:$0x1]   ;;  %v556_v61 = vld [vmem:[%s934_s0 + $0xf] sm:$0x1]   ;;  %v557_v62 = vld [vmem:[%s934_s0 + $0x2] sm:$0x1]  }
  0x1b   :  { %v558_v63 = vld [vmem:[%s934_s0 + $0x35] sm:$0x1]   ;;  %v559_v0 = vld [vmem:[%s934_s0 + $0x28] sm:$0x1]   ;;  %v560_v1 = vld [vmem:[%s934_s0 + $0x1b] sm:$0x1]  }
  0x1c   :  { %117 = vrot.lane.b32.xlu0 %v516_v20, %s646_s25  ;;  %124 = vrot.lane.b32.xlu1 %v517_v21, %s647_s26  ;;  %s675_s25 = smov 44   ;;  %s685_s26 = smov 24   ;;  %v561_v2 = vld [vmem:[%s934_s0 + $0xe] sm:$0x1]   ;;  %vm16_vm5 = vcmask 1048560   ;;  %vm44_vm6 = vcmask 1048528  }
  0x1d   :  { %s691_s15 = smov 12   ;;  %v562_v3 = vld [vmem:[%s934_s0 + $0x1] sm:$0x1]   ;;  %v563_v5 = vld [vmem:[%s934_s0 + $0x34] sm:$0x1]   ;;  %vm30_vm7 = vcmask 1048544  }
  0x1e   :  { %s693_s21 = smov 8   ;;  %v564_v7 = vld [vmem:[%s934_s0 + $0x27] sm:$0x1]   ;;  %vm58_vm8 = vcmask 1048512   ;;  %v565_v9 = vld [vmem:[%s934_s0 + $0x1a] sm:$0x1]  }
  0x1f   :  { %vm64_vm9 = vcmask 1048496   ;;  %s695_s27 = smov 4   ;;  %v566_v11 = vld [vmem:[%s934_s0 + $0xd] sm:$0x1]   ;;  %vm71_vm10 = vcmask 1032096   ;;  %s696_s0 = smov 2  }
  0x20   :  { %130 = vrot.lane.b32.xlu0 %v518_v22, %s648_s2  ;;  %137 = vrot.lane.b32.xlu1 %v519_v23, %s649_s3  ;;  %s677_s2 = smov 40   ;;  %s687_s3 = smov 20   ;;  %vm78_vm11 = vcmask 1015696   ;;  %vm85_vm12 = vcmask 999296   ;;  %vm92_vm13 = vcmask 982896   ;;  %vm98_vm14 = vcmask 966496  }
  0x21   :  { %vm105_vm15 = vcmask 950096   ;;  %vm139_vm4 = vcmask 868096  }
  0x24   :  { %144 = vrot.lane.b32.xlu0 %v520_v24, %s650_s10  ;;  %151 = vrot.lane.b32.xlu1 %v521_v25, %s651_s11  ;;  %s660_s11 = smov 74  }
  0x28   :  { %158 = vrot.lane.b32.xlu0 %v522_v27, %s652_s16  ;;  %164 = vrot.lane.b32.xlu1 %v523_v28, %s653_s17  ;;  %s662_s17 = smov 70  }
  0x2c   :  { %171 = vrot.lane.b32.xlu0 %v524_v29, %s654_s22  ;;  %178 = vrot.lane.b32.xlu1 %v525_v30, %s655_s23  ;;  %s664_s23 = smov 66  }
  0x30   :  { %185 = vrot.lane.b32.xlu0 %v526_v31, %s656_s28  ;;  %192 = vrot.lane.b32.xlu1 %v527_v32, %s657_s29  ;;  %s666_s29 = smov 62  }
  0x34   :  { %198 = vrot.lane.b32.xlu0 %v528_v33, %s658_s5  ;;  %205 = vrot.lane.b32.xlu1 %v529_v34, %s659_s6  ;;  %s668_s6 = smov 58  }
  0x38   :  { %212 = vrot.lane.b32.xlu0 %v530_v35, %s660_s11  ;;  %219 = vrot.lane.b32.xlu1 %v531_v36, %s661_s12  ;;  %s670_s12 = smov 54  }
  0x3c   :  { %226 = vrot.lane.b32.xlu0 %v532_v37, %s662_s17  ;;  %232 = vrot.lane.b32.xlu1 %v533_v38, %s663_s18  ;;  %s672_s18 = smov 50  }
  0x40   :  { %239 = vrot.lane.b32.xlu0 %v534_v39, %s664_s23  ;;  %246 = vrot.lane.b32.xlu1 %v535_v40, %s665_s24  ;;  %s674_s24 = smov 46  }
  0x44   :  { %253 = vrot.lane.b32.xlu0 %v536_v41, %s666_s29  ;;  %260 = vrot.lane.b32.xlu1 %v537_v42, %s667_s30  ;;  %s676_s30 = smov 42  }
  0x48   :  { %266 = vrot.lane.b32.xlu0 %v538_v43, %s668_s6  ;;  %273 = vrot.lane.b32.xlu1 %v539_v44, %s669_s7  ;;  %s678_s7 = smov 38  }
  0x4c   :  { %280 = vrot.lane.b32.xlu0 %v540_v45, %s670_s12  ;;  %287 = vrot.lane.b32.xlu1 %v541_v46, %s671_s13  ;;  %s680_s13 = smov 34  }
  0x50   :  { %294 = vrot.lane.b32.xlu0 %v542_v47, %s672_s18  ;;  %300 = vrot.lane.b32.xlu1 %v543_v48, %s673_s19  ;;  %s682_s19 = smov 30  }
  0x54   :  { %307 = vrot.lane.b32.xlu0 %v544_v49, %s674_s24  ;;  %314 = vrot.lane.b32.xlu1 %v545_v50, %s675_s25  ;;  %s684_s25 = smov 26  }
  0x58   :  { %321 = vrot.lane.b32.xlu0 %v546_v51, %s676_s30  ;;  %328 = vrot.lane.b32.xlu1 %v547_v52, %s677_s2  ;;  %s686_s2 = smov 22  }
  0x5c   :  { %334 = vrot.lane.b32.xlu0 %v548_v53, %s678_s7  ;;  %341 = vrot.lane.b32.xlu1 %v549_v54, %s679_s8  ;;  %s688_s8 = smov 18  }
  0x60   :  { %348 = vrot.lane.b32.xlu0 %v550_v55, %s680_s13  ;;  %355 = vrot.lane.b32.xlu1 %v551_v56, %s681_s14  ;;  %s690_s14 = smov 14  }
  0x64   :  { %362 = vrot.lane.b32.xlu0 %v552_v57, %s682_s19  ;;  %368 = vrot.lane.b32.xlu1 %v553_v58, %s683_s20  ;;  %s692_s20 = smov 10  }
  0x68   :  { %375 = vrot.lane.b32.xlu0 %v554_v59, %s684_s25  ;;  %382 = vrot.lane.b32.xlu1 %v555_v60, %s685_s26  ;;  %s694_s26 = smov 6  }
  0x6c   :  { %389 = vrot.lane.b32.xlu0 %v556_v61, %s686_s2  ;;  %396 = vrot.lane.b32.xlu1 %v557_v62, %s687_s3 }
  0x70   :  { %402 = vrot.lane.b32.xlu0 %v558_v63, %s688_s8  ;;  %409 = vrot.lane.b32.xlu1 %v559_v0, %s689_s9 }
  0x74   :  { %416 = vrot.lane.b32.xlu0 %v560_v1, %s690_s14  ;;  %423 = vrot.lane.b32.xlu1 %v561_v2, %s691_s15 }
  0x76   :  { %v12_v4 = vpop.permute.xlu0 %11   ;;  %v40_v6 = vpop.permute.xlu1 %39  }
  0x77   :  { %15 = vst.msk [vmem:[#allocation0 + $0x20] sm:$0x1] %vm13_vm3, %v12_v4   ;;  %vm132_vm3 = vcmask 884496  }
  0x78   :  { %18 = vst.msk [vmem:[#allocation0 + $0x18] sm:$0x1] %vm16_vm5, %v12_v4   ;;  %430 = vrot.lane.b32.xlu0 %v562_v3, %s692_s20  ;;  %436 = vrot.lane.b32.xlu1 %v563_v5, %s693_s21  ;;  %vm146_vm5 = vcmask 851696  }
  0x79   :  { %46 = vst.msk [vmem:[#allocation0 + $0x8] sm:$0x1] %vm44_vm6, %v40_v6   ;;  %vm153_vm6 = vcmask 835296  }
  0x7a   :  { %v26_v8 = vpop.permute.xlu0 %25   ;;  %v54_v10 = vpop.permute.xlu1 %53  }
  0x7b   :  { %29 = vst.msk [vmem:[#allocation0 + $0x18] sm:$0x1] %vm27_vm1, %v26_v8   ;;  %vm119_vm1 = vcmask 917296  }
  0x7c   :  { %32 = vst.msk [vmem:[#allocation0 + $0x10] sm:$0x1] %vm30_vm7, %v26_v8   ;;  %443 = vrot.lane.b32.xlu0 %v564_v7, %s694_s26  ;;  %450 = vrot.lane.b32.xlu1 %v565_v9, %s695_s27  ;;  %vm160_vm7 = vcmask 818896  }
  0x7d   :  { %43 = vst.msk [vmem:[#allocation0 + $0x10] sm:$0x1] %vm23_vm2, %v40_v6   ;;  %vm126_vm2 = vcmask 900896  }
  0x7e   :  { %57 = vst.msk [vmem:[#allocation0 + $0x8] sm:$0x1] %vm9_vm0, %v54_v10   ;;  %v63_v12 = vpop.permute.xlu0 %62   ;;  %v70_v13 = vpop.permute.xlu1 %69   ;;  %vm112_vm0 = vcmask 933696  }
  0x7f   :  { %59 = vst.msk [vmem:[#allocation0] sm:$0x1] %vm58_vm8, %v54_v10   ;;  %vm166_vm8 = vcmask 802496  }
  0x80   :  { %66 = vst.msk [vmem:[#allocation0 + $0x20] sm:$0x1] %vm64_vm9, %v63_v12   ;;  %457 = vrot.lane.b32.xlu0 %v566_v11, %s696_s0  ;;  %vm173_vm9 = vcmask 786096  }
  0x81   :  { %73 = vst.msk [vmem:[#allocation0 + $0x18] sm:$0x1] %vm71_vm10, %v70_v13   ;;  %vm180_vm10 = vcmask 769696  }
  0x82   :  { %v77_v14 = vpop.permute.xlu0 %76   ;;  %v84_v15 = vpop.permute.xlu1 %83  }
  0x83   :  { %80 = vst.msk [vmem:[#allocation0 + $0x10] sm:$0x1] %vm78_vm11, %v77_v14   ;;  %vm187_vm11 = vcmask 753296  }
  0x84   :  { %87 = vst.msk [vmem:[#allocation0 + $0x8] sm:$0x1] %vm85_vm12, %v84_v15   ;;  %vm194_vm12 = vcmask 736896  }
  0x86   :  { %v91_v16 = vpop.permute.xlu0 %90   ;;  %v97_v17 = vpop.permute.xlu1 %96  }
  0x87   :  { %93 = vst.msk [vmem:[#allocation0] sm:$0x1] %vm92_vm13, %v91_v16   ;;  %vm200_vm13 = vcmask 720496  }
  0x88   :  { %100 = vst.msk [vmem:[#allocation0 + $0x20] sm:$0x1] %vm98_vm14, %v97_v17   ;;  %vm207_vm14 = vcmask 704096  }
  0x8a   :  { %v104_v18 = vpop.permute.xlu0 %103   ;;  %v111_v19 = vpop.permute.xlu1 %110  }
  0x8b   :  { %107 = vst.msk [vmem:[#allocation0 + $0x18] sm:$0x1] %vm105_vm15, %v104_v18   ;;  %vm214_vm15 = vcmask 687696  }
  0x8c   :  { %114 = vst.msk [vmem:[#allocation0 + $0x10] sm:$0x1] %vm112_vm0, %v111_v19   ;;  %vm221_vm0 = vcmask 671296  }
  0x8e   :  { %v118_v20 = vpop.permute.xlu0 %117   ;;  %v125_v21 = vpop.permute.xlu1 %124  }
  0x8f   :  { %121 = vst.msk [vmem:[#allocation0 + $0x8] sm:$0x1] %vm119_vm1, %v118_v20   ;;  %vm228_vm1 = vcmask 654896  }
  0x90   :  { %127 = vst.msk [vmem:[#allocation0] sm:$0x1] %vm126_vm2, %v125_v21   ;;  %vm234_vm2 = vcmask 638496  }
  0x92   :  { %v131_v22 = vpop.permute.xlu0 %130   ;;  %v138_v23 = vpop.permute.xlu1 %137  }
  0x93   :  { %134 = vst.msk [vmem:[#allocation0 + $0x20] sm:$0x1] %vm132_vm3, %v131_v22   ;;  %vm241_vm3 = vcmask 622096  }
  0x94   :  { %141 = vst.msk [vmem:[#allocation0 + $0x18] sm:$0x1] %vm139_vm4, %v138_v23   ;;  %vm248_vm4 = vcmask 605696  }
  0x96   :  { %v145_v24 = vpop.permute.xlu0 %144   ;;  %v152_v25 = vpop.permute.xlu1 %151  }
  0x97   :  { %148 = vst.msk [vmem:[#allocation0 + $0x10] sm:$0x1] %vm146_vm5, %v145_v24   ;;  %vm255_vm5 = vcmask 589296  }
  0x98   :  { %155 = vst.msk [vmem:[#allocation0 + $0x8] sm:$0x1] %vm153_vm6, %v152_v25   ;;  %vm262_vm6 = vcmask 572896  }
  0x9a   :  { %v159_v26 = vpop.permute.xlu0 %158   ;;  %v165_v27 = vpop.permute.xlu1 %164  }
  0x9b   :  { %161 = vst.msk [vmem:[#allocation0] sm:$0x1] %vm160_vm7, %v159_v26   ;;  %vm268_vm7 = vcmask 556496  }
  0x9c   :  { %168 = vst.msk [vmem:[#allocation0 + $0x20] sm:$0x1] %vm166_vm8, %v165_v27   ;;  %vm275_vm8 = vcmask 540096  }
  0x9e   :  { %v172_v28 = vpop.permute.xlu0 %171   ;;  %v179_v29 = vpop.permute.xlu1 %178  }
  0x9f   :  { %175 = vst.msk [vmem:[#allocation0 + $0x18] sm:$0x1] %vm173_vm9, %v172_v28   ;;  %vm282_vm9 = vcmask 523696  }
  0xa0   :  { %182 = vst.msk [vmem:[#allocation0 + $0x10] sm:$0x1] %vm180_vm10, %v179_v29   ;;  %vm289_vm10 = vcmask 507296  }
  0xa2   :  { %v186_v30 = vpop.permute.xlu0 %185   ;;  %v193_v31 = vpop.permute.xlu1 %192  }
  0xa3   :  { %189 = vst.msk [vmem:[#allocation0 + $0x8] sm:$0x1] %vm187_vm11, %v186_v30   ;;  %vm296_vm11 = vcmask 490896  }
  0xa4   :  { %195 = vst.msk [vmem:[#allocation0] sm:$0x1] %vm194_vm12, %v193_v31   ;;  %vm302_vm12 = vcmask 474496  }
  0xa6   :  { %v199_v32 = vpop.permute.xlu0 %198   ;;  %v206_v33 = vpop.permute.xlu1 %205  }
  0xa7   :  { %202 = vst.msk [vmem:[#allocation0 + $0x20] sm:$0x1] %vm200_vm13, %v199_v32   ;;  %vm309_vm13 = vcmask 458096  }
  0xa8   :  { %209 = vst.msk [vmem:[#allocation0 + $0x18] sm:$0x1] %vm207_vm14, %v206_v33   ;;  %vm316_vm14 = vcmask 441696  }
  0xaa   :  { %v213_v34 = vpop.permute.xlu0 %212   ;;  %v220_v35 = vpop.permute.xlu1 %219  }
  0xab   :  { %216 = vst.msk [vmem:[#allocation0 + $0x10] sm:$0x1] %vm214_vm15, %v213_v34   ;;  %vm323_vm15 = vcmask 425296  }
  0xac   :  { %223 = vst.msk [vmem:[#allocation0 + $0x8] sm:$0x1] %vm221_vm0, %v220_v35   ;;  %vm330_vm0 = vcmask 408896  }
  0xae   :  { %v227_v36 = vpop.permute.xlu0 %226   ;;  %v233_v37 = vpop.permute.xlu1 %232  }
  0xaf   :  { %229 = vst.msk [vmem:[#allocation0] sm:$0x1] %vm228_vm1, %v227_v36   ;;  %vm336_vm1 = vcmask 392496  }
  0xb0   :  { %236 = vst.msk [vmem:[#allocation0 + $0x20] sm:$0x1] %vm234_vm2, %v233_v37   ;;  %vm343_vm2 = vcmask 376096  }
  0xb2   :  { %v240_v38 = vpop.permute.xlu0 %239   ;;  %v247_v39 = vpop.permute.xlu1 %246  }
  0xb3   :  { %243 = vst.msk [vmem:[#allocation0 + $0x18] sm:$0x1] %vm241_vm3, %v240_v38   ;;  %vm350_vm3 = vcmask 359696  }
  0xb4   :  { %250 = vst.msk [vmem:[#allocation0 + $0x10] sm:$0x1] %vm248_vm4, %v247_v39   ;;  %vm357_vm4 = vcmask 343296  }
  0xb6   :  { %v254_v40 = vpop.permute.xlu0 %253   ;;  %v261_v41 = vpop.permute.xlu1 %260  }
  0xb7   :  { %257 = vst.msk [vmem:[#allocation0 + $0x8] sm:$0x1] %vm255_vm5, %v254_v40   ;;  %vm364_vm5 = vcmask 326896  }
  0xb8   :  { %263 = vst.msk [vmem:[#allocation0] sm:$0x1] %vm262_vm6, %v261_v41   ;;  %vm370_vm6 = vcmask 310496  }
  0xba   :  { %v267_v42 = vpop.permute.xlu0 %266   ;;  %v274_v43 = vpop.permute.xlu1 %273  }
  0xbb   :  { %270 = vst.msk [vmem:[#allocation0 + $0x20] sm:$0x1] %vm268_vm7, %v267_v42   ;;  %vm377_vm7 = vcmask 294096  }
  0xbc   :  { %277 = vst.msk [vmem:[#allocation0 + $0x18] sm:$0x1] %vm275_vm8, %v274_v43   ;;  %vm384_vm8 = vcmask 277696  }
  0xbe   :  { %v281_v44 = vpop.permute.xlu0 %280   ;;  %v288_v45 = vpop.permute.xlu1 %287  }
  0xbf   :  { %284 = vst.msk [vmem:[#allocation0 + $0x10] sm:$0x1] %vm282_vm9, %v281_v44   ;;  %vm391_vm9 = vcmask 261296  }
  0xc0   :  { %291 = vst.msk [vmem:[#allocation0 + $0x8] sm:$0x1] %vm289_vm10, %v288_v45   ;;  %vm398_vm10 = vcmask 244896  }
  0xc2   :  { %v295_v46 = vpop.permute.xlu0 %294   ;;  %v301_v47 = vpop.permute.xlu1 %300  }
  0xc3   :  { %297 = vst.msk [vmem:[#allocation0] sm:$0x1] %vm296_vm11, %v295_v46   ;;  %vm404_vm11 = vcmask 228496  }
  0xc4   :  { %304 = vst.msk [vmem:[#allocation0 + $0x20] sm:$0x1] %vm302_vm12, %v301_v47   ;;  %vm411_vm12 = vcmask 212096  }
  0xc6   :  { %v308_v48 = vpop.permute.xlu0 %307   ;;  %v315_v49 = vpop.permute.xlu1 %314  }
  0xc7   :  { %311 = vst.msk [vmem:[#allocation0 + $0x18] sm:$0x1] %vm309_vm13, %v308_v48   ;;  %vm418_vm13 = vcmask 195696  }
  0xc8   :  { %318 = vst.msk [vmem:[#allocation0 + $0x10] sm:$0x1] %vm316_vm14, %v315_v49   ;;  %vm425_vm14 = vcmask 179296  }
  0xca   :  { %v322_v50 = vpop.permute.xlu0 %321   ;;  %v329_v51 = vpop.permute.xlu1 %328  }
  0xcb   :  { %325 = vst.msk [vmem:[#allocation0 + $0x8] sm:$0x1] %vm323_vm15, %v322_v50   ;;  %vm432_vm15 = vcmask 162896  }
  0xcc   :  { %331 = vst.msk [vmem:[#allocation0] sm:$0x1] %vm330_vm0, %v329_v51   ;;  %vm438_vm0 = vcmask 146496  }
  0xce   :  { %v335_v52 = vpop.permute.xlu0 %334   ;;  %v342_v53 = vpop.permute.xlu1 %341  }
  0xcf   :  { %338 = vst.msk [vmem:[#allocation0 + $0x20] sm:$0x1] %vm336_vm1, %v335_v52   ;;  %vm445_vm1 = vcmask 130096  }
  0xd0   :  { %345 = vst.msk [vmem:[#allocation0 + $0x18] sm:$0x1] %vm343_vm2, %v342_v53   ;;  %vm452_vm2 = vcmask 113696  }
  0xd2   :  { %v349_v54 = vpop.permute.xlu0 %348   ;;  %v356_v55 = vpop.permute.xlu1 %355  }
  0xd3   :  { %352 = vst.msk [vmem:[#allocation0 + $0x10] sm:$0x1] %vm350_vm3, %v349_v54   ;;  %vm459_vm3 = vcmask 97296  }
  0xd4   :  { %359 = vst.msk [vmem:[#allocation0 + $0x8] sm:$0x1] %vm357_vm4, %v356_v55  }
  0xd6   :  { %v363_v56 = vpop.permute.xlu0 %362   ;;  %v369_v57 = vpop.permute.xlu1 %368  }
  0xd7   :  { %365 = vst.msk [vmem:[#allocation0] sm:$0x1] %vm364_vm5, %v363_v56  }
  0xd8   :  { %372 = vst.msk [vmem:[#allocation0 + $0x20] sm:$0x1] %vm370_vm6, %v369_v57  }
  0xda   :  { %v376_v58 = vpop.permute.xlu0 %375   ;;  %v383_v59 = vpop.permute.xlu1 %382  }
  0xdb   :  { %379 = vst.msk [vmem:[#allocation0 + $0x18] sm:$0x1] %vm377_vm7, %v376_v58  }
  0xdc   :  { %386 = vst.msk [vmem:[#allocation0 + $0x10] sm:$0x1] %vm384_vm8, %v383_v59  }
  0xde   :  { %v390_v60 = vpop.permute.xlu0 %389   ;;  %v397_v61 = vpop.permute.xlu1 %396  }
  0xdf   :  { %393 = vst.msk [vmem:[#allocation0 + $0x8] sm:$0x1] %vm391_vm9, %v390_v60  }
  0xe0   :  { %399 = vst.msk [vmem:[#allocation0] sm:$0x1] %vm398_vm10, %v397_v61  }
  0xe2   :  { %v403_v62 = vpop.permute.xlu0 %402   ;;  %v410_v63 = vpop.permute.xlu1 %409  }
  0xe3   :  { %406 = vst.msk [vmem:[#allocation0 + $0x20] sm:$0x1] %vm404_vm11, %v403_v62  }
  0xe4   :  { %413 = vst.msk [vmem:[#allocation0 + $0x18] sm:$0x1] %vm411_vm12, %v410_v63  }
  0xe6   :  { %v417_v0 = vpop.permute.xlu0 %416   ;;  %v424_v1 = vpop.permute.xlu1 %423  }
  0xe7   :  { %420 = vst.msk [vmem:[#allocation0 + $0x10] sm:$0x1] %vm418_vm13, %v417_v0  }
  0xe8   :  { %427 = vst.msk [vmem:[#allocation0 + $0x8] sm:$0x1] %vm425_vm14, %v424_v1  }
  0xea   :  { %v431_v2 = vpop.permute.xlu0 %430   ;;  %v437_v3 = vpop.permute.xlu1 %436  }
  0xeb   :  { %433 = vst.msk [vmem:[#allocation0] sm:$0x1] %vm432_vm15, %v431_v2  }
  0xec   :  { %440 = vst.msk [vmem:[#allocation0 + $0x20] sm:$0x1] %vm438_vm0, %v437_v3  }
  0xee   :  { %v444_v4 = vpop.permute.xlu0 %443   ;;  %v451_v5 = vpop.permute.xlu1 %450  }
  0xef   :  { %447 = vst.msk [vmem:[#allocation0 + $0x18] sm:$0x1] %vm445_vm1, %v444_v4  }
  0xf0   :  { %454 = vst.msk [vmem:[#allocation0 + $0x10] sm:$0x1] %vm452_vm2, %v451_v5  }
  0xf2   :  { %v466_v6 = vld [vmem:[#allocation0] sm:$0x1]  ;;  %v458_v7 = vpop.permute.xlu0 %457  }
  0xf3   :  { %469 = vst [vmem:[%s935_s1] sm:$0x1] %v466_v6  ;;  %v491_v8 = vld [vmem:[#allocation0 + $0x20] sm:$0x1]  ;;  %461 = vst.msk [vmem:[#allocation0 + $0x8] sm:$0x1] %vm459_vm3, %v458_v7  }
  0xf4   :  { %570 = vst [vmem:[%s935_s1 + $0x4] sm:$0x1] %v491_v8 }
  0xf6   :  { %v484_v9 = vld [vmem:[#allocation0 + $0x18] sm:$0x1] }
  0xf7   :  { %569 = vst [vmem:[%s935_s1 + $0x3] sm:$0x1] %v484_v9  ;;  %v477_v10 = vld [vmem:[#allocation0 + $0x10] sm:$0x1] }
  0xf8   :  { %568 = vst [vmem:[%s935_s1 + $0x2] sm:$0x1] %v477_v10 }
  0xfa   :  { %v471_v11 = vld [vmem:[#allocation0 + $0x8] sm:$0x1] }
  0xfb   :  { %567 = vst [vmem:[%s935_s1 + $0x1] sm:$0x1] %v471_v11 }

// kernel: base_network_forward.1
= control target key start
LH: loop header
LB: loop body
LE: loop exit
PB: predicated region body
PF: predicated region fallthrough
CT: control target
= control target key end

     0   :  { %v420_v32 = vlaneseq  ;;  %v3181_v33 = vmov 1966171168   ;;  %vm1741_vm0 = vcmask 523264   ;;  %vm3183_vm1 = vmmov 0   ;;  %s6641_s0 = inlined_call_operand.vmem [shape: f32[1,384], index: 0, kind: input, shape index: {}]   ;;  %s6642_s1 = inlined_call_operand.vmem [shape: f32[384,960], index: 1, kind: input, shape index: {}]   ;;  %s6643_s2 = inlined_call_operand.vmem [shape: f32[960,640], index: 2, kind: input, shape index: {}]   ;;  %s6644_s3 = inlined_call_operand.vmem [shape: f32[640,64], index: 3, kind: input, shape index: {}]   ;;  %s6645_s4 = inlined_call_operand.vmem [shape: f32[1,960], index: 4, kind: input, shape index: {}]   ;;  %s6646_s5 = inlined_call_operand.vmem [shape: f32[1,640], index: 5, kind: input, shape index: {}]   ;;  %s6647_s6 = inlined_call_operand.vmem [shape: f32[1,64], index: 6, kind: input, shape index: {}]   ;;  %s6648_s7 = inlined_call_operand.vmem [shape: f32[1,64], index: 7, kind: output, shape index: {}]  }
   0x1   :  { %v155_v0 = vld [vmem:[%s6642_s1 + $0x3c8] sm:$0xff]  ;;  %v154_v2 = vld [vmem:[%s6642_s1 + $0x3c0] sm:$0xff]  ;;  %v473_v34 = vunpack.c.l.s4 %v3181_v33 }
   0x2   :  { %v411_v1 = vld [vmem:[%s6642_s1 + $0xbc8] sm:$0xff]  ;;  %538 = vmatprep.subr.mxu0 %v155_v0  ;;  %v410_v3 = vld [vmem:[%s6642_s1 + $0xbc0] sm:$0xff]  ;;  %v3347_v44 = vshrl.u32 %v420_v32, 7  ;;  %v32_v0 = vld [vmem:[%s6641_s0 + $0x12] sm:$0x7] }
   0x3   :  { %609 = vmatprep.subr.mxu1 %v411_v1  ;;  %v147_v4 = vld [vmem:[%s6642_s1 + $0x388] sm:$0xff]  ;;  %539 = vmatpush1.msra.mxu0 %v154_v2  ;;  %v146_v6 = vld [vmem:[%s6642_s1 + $0x380] sm:$0xff]  ;;  %v474_v45 = vunpack.c.0.s8 %v473_v34  ;;  %v156_v32 = vld [vmem:[%s6642_s1 + $0x3d0] sm:$0xff] }
   0x4   :  { %v403_v5 = vld [vmem:[%s6642_s1 + $0xb88] sm:$0xff]  ;;  %610 = vmatpush1.msra.mxu1 %v410_v3  ;;  %v402_v7 = vld [vmem:[%s6642_s1 + $0xb80] sm:$0xff]  ;;  %540 = vmatprep.subr.mxu0 %v147_v4  ;;  %v149_v34 = vld [vmem:[%s6642_s1 + $0x398] sm:$0xff] }
   0x5   :  { %v139_v8 = vld [vmem:[%s6642_s1 + $0x348] sm:$0xff]  ;;  %611 = vmatprep.subr.mxu1 %v403_v5  ;;  %v138_v10 = vld [vmem:[%s6642_s1 + $0x340] sm:$0xff]  ;;  %541 = vmatpush1.msra.mxu0 %v146_v6  ;;  %v3386_v58 = vsub.s32 %v474_v45, %v3347_v44  ;;  %v33_v5 = vld [vmem:[%s6641_s0 + $0x15] sm:$0x7] }
   0x6   :  { %v395_v9 = vld [vmem:[%s6642_s1 + $0xb48] sm:$0xff]  ;;  %v394_v11 = vld [vmem:[%s6642_s1 + $0xb40] sm:$0xff]  ;;  %612 = vmatpush1.msra.mxu1 %v402_v7  ;;  %542 = vmatprep.subr.mxu0 %v139_v8  ;;  %v132_v45 = vld [vmem:[%s6642_s1 + $0x310] sm:$0xff] }
   0x7   :  { %v131_v12 = vld [vmem:[%s6642_s1 + $0x308] sm:$0xff]  ;;  %613 = vmatprep.subr.mxu1 %v395_v9  ;;  %v130_v14 = vld [vmem:[%s6642_s1 + $0x300] sm:$0xff]  ;;  %543 = vmatpush1.msra.mxu0 %v138_v10  ;;  %v471_v9 = vcombine.low %v32_v0, %v33_v5  ;;  %v93_v0 = vld [vmem:[%s6642_s1 + $0x1d8] sm:$0xff] }
   0x8   :  { %v387_v13 = vld [vmem:[%s6642_s1 + $0xb08] sm:$0xff]  ;;  %v386_v15 = vld [vmem:[%s6642_s1 + $0xb00] sm:$0xff]  ;;  %614 = vmatpush1.msra.mxu1 %v394_v11  ;;  %544 = vmatprep.subr.mxu0 %v131_v12 }
   0x9   :  { %v123_v16 = vld [vmem:[%s6642_s1 + $0x2c8] sm:$0xff]  ;;  %615 = vmatprep.subr.mxu1 %v387_v13  ;;  %v122_v18 = vld [vmem:[%s6642_s1 + $0x2c0] sm:$0xff]  ;;  %545 = vmatpush1.msra.mxu0 %v130_v14 }
   0xa   :  { %v379_v17 = vld [vmem:[%s6642_s1 + $0xac8] sm:$0xff]  ;;  %v378_v19 = vld [vmem:[%s6642_s1 + $0xac0] sm:$0xff]  ;;  %616 = vmatpush1.msra.mxu1 %v386_v15  ;;  %546 = vmatprep.subr.mxu0 %v123_v16 }
   0xb   :  { %v115_v20 = vld [vmem:[%s6642_s1 + $0x288] sm:$0xff]  ;;  %617 = vmatprep.subr.mxu1 %v379_v17  ;;  %v114_v22 = vld [vmem:[%s6642_s1 + $0x280] sm:$0xff]  ;;  %547 = vmatpush1.msra.mxu0 %v122_v18  ;;  %v3443_v17 = vrot.slane %v471_v9, %v3386_v58 }
   0xc   :  { %v371_v21 = vld [vmem:[%s6642_s1 + $0xa88] sm:$0xff]  ;;  %v370_v23 = vld [vmem:[%s6642_s1 + $0xa80] sm:$0xff]  ;;  %618 = vmatpush1.msra.mxu1 %v378_v19  ;;  %548 = vmatprep.subr.mxu0 %v115_v20 }
   0xd   :  { %v107_v24 = vld [vmem:[%s6642_s1 + $0x248] sm:$0xff]  ;;  %619 = vmatprep.subr.mxu1 %v371_v21  ;;  %v106_v26 = vld [vmem:[%s6642_s1 + $0x240] sm:$0xff]  ;;  %549 = vmatpush1.msra.mxu0 %v114_v22 }
   0xe   :  { %v363_v25 = vld [vmem:[%s6642_s1 + $0xa48] sm:$0xff]  ;;  %v362_v27 = vld [vmem:[%s6642_s1 + $0xa40] sm:$0xff]  ;;  %620 = vmatpush1.msra.mxu1 %v370_v23  ;;  %550 = vmatprep.subr.mxu0 %v107_v24 }
   0xf   :  { %v99_v28 = vld [vmem:[%s6642_s1 + $0x208] sm:$0xff]  ;;  %621 = vmatprep.subr.mxu1 %v363_v25  ;;  %v98_v30 = vld [vmem:[%s6642_s1 + $0x200] sm:$0xff]  ;;  %551 = vmatpush1.msra.mxu0 %v106_v26 }
  0x10   :  { %v355_v29 = vld [vmem:[%s6642_s1 + $0xa08] sm:$0xff]  ;;  %v354_v31 = vld [vmem:[%s6642_s1 + $0xa00] sm:$0xff]  ;;  %622 = vmatpush1.msra.mxu1 %v362_v27  ;;  %552 = vmatprep.subr.mxu0 %v99_v28  ;;  %v157_v27 = vld [vmem:[%s6642_s1 + $0x3d8] sm:$0xff] }
  0x11   :  { %v91_v35 = vld [vmem:[%s6642_s1 + $0x1c8] sm:$0xff]  ;;  %623 = vmatprep.subr.mxu1 %v355_v29  ;;  %v90_v37 = vld [vmem:[%s6642_s1 + $0x1c0] sm:$0xff]  ;;  %553 = vmatpush1.msra.mxu0 %v98_v30  ;;  %v3182_v30 = vmov 0.0  }
  0x12   :  { %v347_v36 = vld [vmem:[%s6642_s1 + $0x9c8] sm:$0xff]  ;;  %v346_v38 = vld [vmem:[%s6642_s1 + $0x9c0] sm:$0xff]  ;;  %624 = vmatpush1.msra.mxu1 %v354_v31  ;;  %554 = vmatprep.subr.mxu0 %v91_v35 }
  0x13   :  { %v83_v39 = vld [vmem:[%s6642_s1 + $0x188] sm:$0xff]  ;;  %625 = vmatprep.subr.mxu1 %v347_v36  ;;  %v82_v41 = vld [vmem:[%s6642_s1 + $0x180] sm:$0xff]  ;;  %555 = vmatpush1.msra.mxu0 %v90_v37  ;;  %v148_v36 = vld [vmem:[%s6642_s1 + $0x390] sm:$0xff] }
  0x14   :  { %v339_v40 = vld [vmem:[%s6642_s1 + $0x988] sm:$0xff]  ;;  %v338_v42 = vld [vmem:[%s6642_s1 + $0x980] sm:$0xff]  ;;  %626 = vmatpush1.msra.mxu1 %v346_v38  ;;  %556 = vmatprep.subr.mxu0 %v83_v39  ;;  %v141_v38 = vld [vmem:[%s6642_s1 + $0x358] sm:$0xff] }
  0x15   :  { %v75_v43 = vld [vmem:[%s6642_s1 + $0x148] sm:$0xff]  ;;  %v74_v47 = vld [vmem:[%s6642_s1 + $0x140] sm:$0xff]  ;;  %627 = vmatprep.subr.mxu1 %v339_v40  ;;  %557 = vmatpush1.msra.mxu0 %v82_v41  ;;  %v140_v40 = vld [vmem:[%s6642_s1 + $0x350] sm:$0xff] }
  0x16   :  { %v331_v46 = vld [vmem:[%s6642_s1 + $0x948] sm:$0xff]  ;;  %v330_v48 = vld [vmem:[%s6642_s1 + $0x940] sm:$0xff]  ;;  %628 = vmatpush1.msra.mxu1 %v338_v42  ;;  %558 = vmatprep.subr.mxu0 %v75_v43  ;;  %v133_v42 = vld [vmem:[%s6642_s1 + $0x318] sm:$0xff] }
  0x17   :  { %v67_v49 = vld [vmem:[%s6642_s1 + $0x108] sm:$0xff]  ;;  %v66_v51 = vld [vmem:[%s6642_s1 + $0x100] sm:$0xff]  ;;  %629 = vmatprep.subr.mxu1 %v331_v46  ;;  %559 = vmatpush1.msra.mxu0 %v74_v47  ;;  %v125_v47 = vld [vmem:[%s6642_s1 + $0x2d8] sm:$0xff] }
  0x18   :  { %v323_v50 = vld [vmem:[%s6642_s1 + $0x908] sm:$0xff]  ;;  %v322_v52 = vld [vmem:[%s6642_s1 + $0x900] sm:$0xff]  ;;  %630 = vmatpush1.msra.mxu1 %v330_v48  ;;  %560 = vmatprep.subr.mxu0 %v67_v49  ;;  %v124_v49 = vld [vmem:[%s6642_s1 + $0x2d0] sm:$0xff] }
  0x19   :  { %v59_v53 = vld [vmem:[%s6642_s1 + $0xc8] sm:$0xff]  ;;  %v58_v55 = vld [vmem:[%s6642_s1 + $0xc0] sm:$0xff]  ;;  %631 = vmatprep.subr.mxu1 %v323_v50  ;;  %561 = vmatpush1.msra.mxu0 %v66_v51  ;;  %v117_v51 = vld [vmem:[%s6642_s1 + $0x298] sm:$0xff] }
  0x1a   :  { %v315_v54 = vld [vmem:[%s6642_s1 + $0x8c8] sm:$0xff]  ;;  %v314_v56 = vld [vmem:[%s6642_s1 + $0x8c0] sm:$0xff]  ;;  %632 = vmatpush1.msra.mxu1 %v322_v52  ;;  %562 = vmatprep.subr.mxu0 %v59_v53  ;;  %v116_v53 = vld [vmem:[%s6642_s1 + $0x290] sm:$0xff] }
  0x1b   :  { %v26_v57 = vld [vmem:[%s6641_s0] sm:$0x7]  ;;  %v27_v59 = vld [vmem:[%s6641_s0 + $0x3] sm:$0x7]  ;;  %v28_v60 = vld [vmem:[%s6641_s0 + $0x6] sm:$0x7]  ;;  %633 = vmatprep.subr.mxu1 %v315_v54  ;;  %563 = vmatpush1.msra.mxu0 %v58_v55 }
  0x1c   :  { %v29_v61 = vld [vmem:[%s6641_s0 + $0x9] sm:$0x7]  ;;  %v30_v62 = vld [vmem:[%s6641_s0 + $0xc] sm:$0x7]  ;;  %v31_v63 = vld [vmem:[%s6641_s0 + $0xf] sm:$0x7]  ;;  %v468_v1 = vcombine.low %v26_v57, %v27_v59  ;;  %634 = vmatpush1.msra.mxu1 %v314_v56  ;;  %673 = vmatprep.mubr.f32.mxu1 %v3182_v30 }
  0x1d   :  { %v469_v2 = vcombine.low %v28_v60, %v29_v61  ;;  %v51_v3 = vld [vmem:[%s6642_s1 + $0x88] sm:$0xff]  ;;  %v470_v6 = vcombine.low %v30_v62, %v31_v63  ;;  %v50_v7 = vld [vmem:[%s6642_s1 + $0x80] sm:$0xff]  ;;  %v109_v55 = vld [vmem:[%s6642_s1 + $0x258] sm:$0xff] }
  0x1e   :  { %v307_v4 = vld [vmem:[%s6642_s1 + $0x888] sm:$0xff]  ;;  %v306_v8 = vld [vmem:[%s6642_s1 + $0x880] sm:$0xff]  ;;  %v3422_v10 = vrot.slane %v468_v1, %v3386_v58  ;;  %564 = vmatprep.subr.mxu0 %v51_v3  ;;  %v108_v57 = vld [vmem:[%s6642_s1 + $0x250] sm:$0xff] }
  0x1f   :  { %v3425_v11 = vrot.slane %v469_v2, %v3386_v58  ;;  %v43_v12 = vld [vmem:[%s6642_s1 + $0x48] sm:$0xff]  ;;  %v3434_v14 = vrot.slane %v470_v6, %v3386_v58  ;;  %635 = vmatprep.subr.mxu1 %v307_v4  ;;  %v42_v15 = vld [vmem:[%s6642_s1 + $0x40] sm:$0xff]  ;;  %565 = vmatpush1.msra.mxu0 %v50_v7  ;;  %v101_v60 = vld [vmem:[%s6642_s1 + $0x218] sm:$0xff] }
  0x20   :  { %v299_v13 = vld [vmem:[%s6642_s1 + $0x848] sm:$0xff]  ;;  %v298_v16 = vld [vmem:[%s6642_s1 + $0x840] sm:$0xff]  ;;  %636 = vmatpush1.msra.mxu1 %v306_v8  ;;  %566 = vmatprep.subr.mxu0 %v43_v12  ;;  %v100_v62 = vld [vmem:[%s6642_s1 + $0x210] sm:$0xff] }
  0x21   :  { %v500_v18 = vcombine.low %v3422_v10, %v3425_v11  ;;  %v35_v19 = vld [vmem:[%s6642_s1 + $0x8] sm:$0xff]  ;;  %637 = vmatprep.subr.mxu1 %v299_v13  ;;  %v34_v21 = vld [vmem:[%s6642_s1] sm:$0xff]  ;;  %v502_v23 = vcombine.low %v3434_v14, %v3443_v17  ;;  %567 = vmatpush1.msra.mxu0 %v42_v15  ;;  %v92_v2 = vld [vmem:[%s6642_s1 + $0x1d0] sm:$0xff]  ;;  %v501_v15 = vcombine.high %v3422_v10, %v3425_v11 }
  0x22   :  { %v291_v20 = vld [vmem:[%s6642_s1 + $0x808] sm:$0xff]  ;;  %v290_v22 = vld [vmem:[%s6642_s1 + $0x800] sm:$0xff]  ;;  %638 = vmatpush1.msra.mxu1 %v298_v16  ;;  %568 = vmatprep.subr.mxu0 %v35_v19  ;;  %v85_v4 = vld [vmem:[%s6642_s1 + $0x198] sm:$0xff]  ;;  %v503_v16 = vcombine.high %v3434_v14, %v3443_v17 }
  0x23   :  { %v3462_v24 = vrot.slane %v500_v18, %v3386_v58  ;;  %v283_v25 = vld [vmem:[%s6642_s1 + $0x7c8] sm:$0xff]  ;;  %639 = vmatprep.subr.mxu1 %v291_v20  ;;  %v3468_v26 = vrot.slane %v502_v23, %v3386_v58  ;;  %v282_v28 = vld [vmem:[%s6642_s1 + $0x7c0] sm:$0xff]  ;;  %569 = vmatpush1.msra.mxu0 %v34_v21  ;;  %v84_v6 = vld [vmem:[%s6642_s1 + $0x190] sm:$0xff] }
  0x24   :  { %640 = vmatpush1.msra.mxu1 %v290_v22  ;;  %v275_v29 = vld [vmem:[%s6642_s1 + $0x788] sm:$0xff]  ;;  %570 = vmatprep.subr.mxu0 %v283_v25  ;;  %v274_v33 = vld [vmem:[%s6642_s1 + $0x780] sm:$0xff]  ;;  %v77_v8 = vld [vmem:[%s6642_s1 + $0x158] sm:$0xff]  ;;  %v517_v22 = vrot.slane %v501_v15, %v3386_v58  ;;  %v531_v23 = vrot.slane %v503_v16, %v3386_v58 }
  0x25   :  { %v3482_v31 = vcombine.high %v3462_v24, %v3468_v26  ;;  %680 = vmatprep.subr.mxu1 %v157_v27  ;;  %571 = vmatpush2.msra.mxu0 %v282_v28  ;;  %v267_v35 = vld [vmem:[%s6642_s1 + $0x748] sm:$0xff]  ;;  %v266_v37 = vld [vmem:[%s6642_s1 + $0x740] sm:$0xff]  ;;  %v76_v12 = vld [vmem:[%s6642_s1 + $0x150] sm:$0xff] }
  0x26   :  { %572 = vmatprep.subr.mxu0 %v275_v29  ;;  %v259_v39 = vld [vmem:[%s6642_s1 + $0x708] sm:$0xff]  ;;  %v258_v41 = vld [vmem:[%s6642_s1 + $0x700] sm:$0xff]  ;;  %v69_v18 = vld [vmem:[%s6642_s1 + $0x118] sm:$0xff] }
  0x27   :  { %674 = vmatmul.mubr.f32.vlgmr.msra.gmra.mxu1 %v3482_v31  ;;  %573 = vmatpush2.msra.mxu0 %v274_v33  ;;  %v251_v43 = vld [vmem:[%s6642_s1 + $0x6c8] sm:$0xff]  ;;  %v250_v46 = vld [vmem:[%s6642_s1 + $0x6c0] sm:$0xff]  ;;  %v68_v20 = vld [vmem:[%s6642_s1 + $0x110] sm:$0xff] }
  0x28   :  { %681 = vmatpush1.msra.mxu1 %v156_v32  ;;  %574 = vmatprep.subr.mxu0 %v267_v35  ;;  %v243_v48 = vld [vmem:[%s6642_s1 + $0x688] sm:$0xff]  ;;  %v242_v50 = vld [vmem:[%s6642_s1 + $0x680] sm:$0xff]  ;;  %v61_v11 = vld [vmem:[%s6642_s1 + $0xd8] sm:$0xff]  ;;  %v3665_v35 = vcombine.low %v517_v22, %v531_v23 }
  0x29   :  { %682 = vmatprep.subr.mxu1 %v149_v34  ;;  %575 = vmatpush2.msra.mxu0 %v266_v37  ;;  %v235_v52 = vld [vmem:[%s6642_s1 + $0x648] sm:$0xff]  ;;  %v234_v54 = vld [vmem:[%s6642_s1 + $0x640] sm:$0xff]  ;;  %v60_v17 = vld [vmem:[%s6642_s1 + $0xd0] sm:$0xff]  ;;  %v3672_v37 = vcombine.low %v3462_v24, %v3468_v26 }
  0x2a   :  { %683 = vmatpush1.msra.mxu1 %v148_v36  ;;  %576 = vmatprep.subr.mxu0 %v259_v39  ;;  %v227_v56 = vld [vmem:[%s6642_s1 + $0x608] sm:$0xff]  ;;  %v226_v59 = vld [vmem:[%s6642_s1 + $0x600] sm:$0xff]  ;;  %v53_v25 = vld [vmem:[%s6642_s1 + $0x98] sm:$0xff] }
  0x2b   :  { %684 = vmatprep.subr.mxu1 %v141_v38  ;;  %577 = vmatpush2.msra.mxu0 %v258_v41  ;;  %v219_v61 = vld [vmem:[%s6642_s1 + $0x5c8] sm:$0xff]  ;;  %v218_v63 = vld [vmem:[%s6642_s1 + $0x5c0] sm:$0xff]  ;;  %v52_v28 = vld [vmem:[%s6642_s1 + $0x90] sm:$0xff] }
  0x2c   :  { %685 = vmatpush1.msra.mxu1 %v140_v40  ;;  %578 = vmatprep.subr.mxu0 %v251_v43  ;;  %v211_v1 = vld [vmem:[%s6642_s1 + $0x588] sm:$0xff]  ;;  %v210_v3 = vld [vmem:[%s6642_s1 + $0x580] sm:$0xff]  ;;  %v45_v29 = vld [vmem:[%s6642_s1 + $0x58] sm:$0xff] }
  0x2d   :  { %686 = vmatprep.subr.mxu1 %v133_v42  ;;  %579 = vmatpush2.msra.mxu0 %v250_v46  ;;  %v203_v5 = vld [vmem:[%s6642_s1 + $0x548] sm:$0xff]  ;;  %v202_v7 = vld [vmem:[%s6642_s1 + $0x540] sm:$0xff]  ;;  %v44_v33 = vld [vmem:[%s6642_s1 + $0x50] sm:$0xff] }
  0x2e   :  { %687 = vmatpush1.msra.mxu1 %v132_v45  ;;  %580 = vmatprep.subr.mxu0 %v243_v48  ;;  %v195_v9 = vld [vmem:[%s6642_s1 + $0x508] sm:$0xff]  ;;  %v194_v13 = vld [vmem:[%s6642_s1 + $0x500] sm:$0xff]  ;;  %v37_v36 = vld [vmem:[%s6642_s1 + $0x18] sm:$0xff] }
  0x2f   :  { %688 = vmatprep.subr.mxu1 %v125_v47  ;;  %581 = vmatpush2.msra.mxu0 %v242_v50  ;;  %v187_v19 = vld [vmem:[%s6642_s1 + $0x4c8] sm:$0xff]  ;;  %v186_v10 = vld [vmem:[%s6642_s1 + $0x4c0] sm:$0xff]  ;;  %v36_v38 = vld [vmem:[%s6642_s1 + $0x10] sm:$0xff] }
  0x30   :  { %689 = vmatpush1.msra.mxu1 %v124_v49  ;;  %582 = vmatprep.subr.mxu0 %v235_v52  ;;  %v179_v14 = vld [vmem:[%s6642_s1 + $0x488] sm:$0xff]  ;;  %v178_v21 = vld [vmem:[%s6642_s1 + $0x480] sm:$0xff]  ;;  %v285_v39 = vld [vmem:[%s6642_s1 + $0x7d8] sm:$0xff] }
  0x31   :  { %690 = vmatprep.subr.mxu1 %v117_v51  ;;  %583 = vmatpush2.msra.mxu0 %v234_v54  ;;  %v171_v27 = vld [vmem:[%s6642_s1 + $0x448] sm:$0xff]  ;;  %v170_v58 = vld [vmem:[%s6642_s1 + $0x440] sm:$0xff]  ;;  %v413_v40 = vld [vmem:[%s6642_s1 + $0xbd8] sm:$0xff] }
  0x32   :  { %691 = vmatpush1.msra.mxu1 %v116_v53  ;;  %584 = vmatprep.subr.mxu0 %v227_v56  ;;  %v163_v32 = vld [vmem:[%s6642_s1 + $0x408] sm:$0xff]  ;;  %v162_v34 = vld [vmem:[%s6642_s1 + $0x400] sm:$0xff]  ;;  %v284_v24 = vld [vmem:[%s6642_s1 + $0x7d0] sm:$0xff] }
  0x33   :  { %692 = vmatprep.subr.mxu1 %v109_v55  ;;  %585 = vmatpush2.msra.mxu0 %v226_v59  ;;  %v412_v26 = vld [vmem:[%s6642_s1 + $0xbd0] sm:$0xff]  ;;  %v277_v41 = vld [vmem:[%s6642_s1 + $0x798] sm:$0xff] }
  0x34   :  { %693 = vmatpush1.msra.mxu1 %v108_v57  ;;  %586 = vmatprep.subr.mxu0 %v219_v61  ;;  %v405_v42 = vld [vmem:[%s6642_s1 + $0xb98] sm:$0xff]  ;;  %v276_v43 = vld [vmem:[%s6642_s1 + $0x790] sm:$0xff] }
  0x35   :  { %694 = vmatprep.subr.mxu1 %v101_v60  ;;  %587 = vmatpush2.msra.mxu0 %v218_v63  ;;  %v404_v45 = vld [vmem:[%s6642_s1 + $0xb90] sm:$0xff]  ;;  %v269_v46 = vld [vmem:[%s6642_s1 + $0x758] sm:$0xff] }
  0x36   :  { %695 = vmatpush1.msra.mxu1 %v100_v62  ;;  %588 = vmatprep.subr.mxu0 %v211_v1  ;;  %v397_v47 = vld [vmem:[%s6642_s1 + $0xb58] sm:$0xff]  ;;  %v268_v48 = vld [vmem:[%s6642_s1 + $0x750] sm:$0xff] }
  0x37   :  { %696 = vmatprep.subr.mxu1 %v93_v0  ;;  %589 = vmatpush2.msra.mxu0 %v210_v3  ;;  %v396_v49 = vld [vmem:[%s6642_s1 + $0xb50] sm:$0xff]  ;;  %v261_v50 = vld [vmem:[%s6642_s1 + $0x718] sm:$0xff] }
  0x38   :  { %697 = vmatpush1.msra.mxu1 %v92_v2  ;;  %590 = vmatprep.subr.mxu0 %v203_v5  ;;  %v389_v51 = vld [vmem:[%s6642_s1 + $0xb18] sm:$0xff]  ;;  %v260_v52 = vld [vmem:[%s6642_s1 + $0x710] sm:$0xff] }
  0x39   :  { %698 = vmatprep.subr.mxu1 %v85_v4  ;;  %591 = vmatpush2.msra.mxu0 %v202_v7  ;;  %v388_v53 = vld [vmem:[%s6642_s1 + $0xb10] sm:$0xff]  ;;  %v253_v54 = vld [vmem:[%s6642_s1 + $0x6d8] sm:$0xff] }
  0x3a   :  { %699 = vmatpush1.msra.mxu1 %v84_v6  ;;  %592 = vmatprep.subr.mxu0 %v195_v9  ;;  %v381_v55 = vld [vmem:[%s6642_s1 + $0xad8] sm:$0xff]  ;;  %v252_v56 = vld [vmem:[%s6642_s1 + $0x6d0] sm:$0xff] }
  0x3b   :  { %700 = vmatprep.subr.mxu1 %v77_v8  ;;  %593 = vmatpush2.msra.mxu0 %v194_v13  ;;  %v380_v57 = vld [vmem:[%s6642_s1 + $0xad0] sm:$0xff]  ;;  %v245_v59 = vld [vmem:[%s6642_s1 + $0x698] sm:$0xff] }
  0x3c   :  { %701 = vmatpush1.msra.mxu1 %v76_v12  ;;  %594 = vmatprep.subr.mxu0 %v187_v19  ;;  %v373_v60 = vld [vmem:[%s6642_s1 + $0xa98] sm:$0xff]  ;;  %v244_v61 = vld [vmem:[%s6642_s1 + $0x690] sm:$0xff] }
  0x3d   :  { %702 = vmatprep.subr.mxu1 %v69_v18  ;;  %595 = vmatpush2.msra.mxu0 %v186_v10  ;;  %v372_v62 = vld [vmem:[%s6642_s1 + $0xa90] sm:$0xff]  ;;  %v237_v63 = vld [vmem:[%s6642_s1 + $0x658] sm:$0xff] }
  0x3e   :  { %703 = vmatpush1.msra.mxu1 %v68_v20  ;;  %596 = vmatprep.subr.mxu0 %v179_v14  ;;  %v365_v0 = vld [vmem:[%s6642_s1 + $0xa58] sm:$0xff]  ;;  %v236_v1 = vld [vmem:[%s6642_s1 + $0x650] sm:$0xff] }
  0x3f   :  { %704 = vmatprep.subr.mxu1 %v61_v11  ;;  %597 = vmatpush2.msra.mxu0 %v178_v21  ;;  %v364_v2 = vld [vmem:[%s6642_s1 + $0xa50] sm:$0xff]  ;;  %v229_v3 = vld [vmem:[%s6642_s1 + $0x618] sm:$0xff] }
  0x40   :  { %705 = vmatpush1.msra.mxu1 %v60_v17  ;;  %598 = vmatprep.subr.mxu0 %v171_v27  ;;  %v357_v4 = vld [vmem:[%s6642_s1 + $0xa18] sm:$0xff]  ;;  %v228_v5 = vld [vmem:[%s6642_s1 + $0x610] sm:$0xff] }
  0x41   :  { %706 = vmatprep.subr.mxu1 %v53_v25  ;;  %599 = vmatpush2.msra.mxu0 %v170_v58  ;;  %v356_v6 = vld [vmem:[%s6642_s1 + $0xa10] sm:$0xff]  ;;  %v221_v7 = vld [vmem:[%s6642_s1 + $0x5d8] sm:$0xff] }
  0x42   :  { %707 = vmatpush1.msra.mxu1 %v52_v28  ;;  %600 = vmatprep.subr.mxu0 %v163_v32  ;;  %v349_v8 = vld [vmem:[%s6642_s1 + $0x9d8] sm:$0xff]  ;;  %v220_v9 = vld [vmem:[%s6642_s1 + $0x5d0] sm:$0xff] }
  0x43   :  { %708 = vmatprep.subr.mxu1 %v45_v29  ;;  %601 = vmatpush2.msra.mxu0 %v162_v34  ;;  %v348_v12 = vld [vmem:[%s6642_s1 + $0x9d0] sm:$0xff]  ;;  %v213_v13 = vld [vmem:[%s6642_s1 + $0x598] sm:$0xff] }
  0x44   :  { %709 = vmatpush1.msra.mxu1 %v44_v33  ;;  %602 = vmatprep.mubr.f32.mxu0 %v3665_v35  ;;  %v341_v15 = vld [vmem:[%s6642_s1 + $0x998] sm:$0xff]  ;;  %v212_v16 = vld [vmem:[%s6642_s1 + $0x590] sm:$0xff] }
  0x45   :  { %710 = vmatprep.subr.mxu1 %v37_v36  ;;  %603 = vmatmul.mubr.f32.vlgmr.msra.gmra.mxu0 %v3672_v37  ;;  %v340_v18 = vld [vmem:[%s6642_s1 + $0x990] sm:$0xff]  ;;  %v205_v19 = vld [vmem:[%s6642_s1 + $0x558] sm:$0xff] }
  0x46   :  { %711 = vmatpush1.msra.mxu1 %v36_v38  ;;  %751 = vmatprep.subr.mxu0 %v413_v40  ;;  %v333_v20 = vld [vmem:[%s6642_s1 + $0x958] sm:$0xff]  ;;  %v204_v10 = vld [vmem:[%s6642_s1 + $0x550] sm:$0xff] }
  0x47   :  { %712 = vmatprep.subr.mxu1 %v285_v39  ;;  %752 = vmatpush1.msra.mxu0 %v412_v26  ;;  %v332_v11 = vld [vmem:[%s6642_s1 + $0x950] sm:$0xff]  ;;  %v197_v14 = vld [vmem:[%s6642_s1 + $0x518] sm:$0xff] }
  0x48   :  { %713 = vmatpush2.msra.mxu1 %v284_v24  ;;  %753 = vmatprep.subr.mxu0 %v405_v42  ;;  %v325_v17 = vld [vmem:[%s6642_s1 + $0x918] sm:$0xff]  ;;  %v196_v21 = vld [vmem:[%s6642_s1 + $0x510] sm:$0xff]  ;;  %v159_v42 = vld [vmem:[%s6642_s1 + $0x3e8] sm:$0xff] }
  0x49   :  { %714 = vmatprep.subr.mxu1 %v277_v41  ;;  %754 = vmatpush1.msra.mxu0 %v404_v45  ;;  %v324_v22 = vld [vmem:[%s6642_s1 + $0x910] sm:$0xff]  ;;  %v189_v23 = vld [vmem:[%s6642_s1 + $0x4d8] sm:$0xff]  ;;  %v158_v45 = vld [vmem:[%s6642_s1 + $0x3e0] sm:$0xff] }
  0x4a   :  { %715 = vmatpush2.msra.mxu1 %v276_v43  ;;  %755 = vmatprep.subr.mxu0 %v397_v47  ;;  %v317_v25 = vld [vmem:[%s6642_s1 + $0x8d8] sm:$0xff]  ;;  %v188_v27 = vld [vmem:[%s6642_s1 + $0x4d0] sm:$0xff]  ;;  %v415_v43 = vld [vmem:[%s6642_s1 + $0xbe8] sm:$0xff] }
  0x4b   :  { %716 = vmatprep.subr.mxu1 %v269_v46  ;;  %756 = vmatpush1.msra.mxu0 %v396_v49  ;;  %v316_v28 = vld [vmem:[%s6642_s1 + $0x8d0] sm:$0xff]  ;;  %v181_v58 = vld [vmem:[%s6642_s1 + $0x498] sm:$0xff]  ;;  %v414_v46 = vld [vmem:[%s6642_s1 + $0xbe0] sm:$0xff] }
  0x4c   :  { %717 = vmatpush2.msra.mxu1 %v268_v48  ;;  %757 = vmatprep.subr.mxu0 %v389_v51  ;;  %v309_v29 = vld [vmem:[%s6642_s1 + $0x898] sm:$0xff]  ;;  %v180_v32 = vld [vmem:[%s6642_s1 + $0x490] sm:$0xff]  ;;  %v151_v47 = vld [vmem:[%s6642_s1 + $0x3a8] sm:$0xff] }
  0x4d   :  { %718 = vmatprep.subr.mxu1 %v261_v50  ;;  %758 = vmatpush1.msra.mxu0 %v388_v53  ;;  %v308_v33 = vld [vmem:[%s6642_s1 + $0x890] sm:$0xff]  ;;  %v173_v34 = vld [vmem:[%s6642_s1 + $0x458] sm:$0xff]  ;;  %v407_v48 = vld [vmem:[%s6642_s1 + $0xba8] sm:$0xff] }
  0x4e   :  { %719 = vmatpush2.msra.mxu1 %v260_v52  ;;  %759 = vmatprep.subr.mxu0 %v381_v55  ;;  %v301_v36 = vld [vmem:[%s6642_s1 + $0x858] sm:$0xff]  ;;  %v172_v38 = vld [vmem:[%s6642_s1 + $0x450] sm:$0xff]  ;;  %v150_v49 = vld [vmem:[%s6642_s1 + $0x3a0] sm:$0xff] }
  0x4f   :  { %720 = vmatprep.subr.mxu1 %v253_v54  ;;  %760 = vmatpush1.msra.mxu0 %v380_v57  ;;  %v300_v39 = vld [vmem:[%s6642_s1 + $0x850] sm:$0xff]  ;;  %v165_v40 = vld [vmem:[%s6642_s1 + $0x418] sm:$0xff]  ;;  %v406_v50 = vld [vmem:[%s6642_s1 + $0xba0] sm:$0xff] }
  0x50   :  { %721 = vmatpush2.msra.mxu1 %v252_v56  ;;  %761 = vmatprep.subr.mxu0 %v373_v60  ;;  %v293_v24 = vld [vmem:[%s6642_s1 + $0x818] sm:$0xff]  ;;  %v164_v26 = vld [vmem:[%s6642_s1 + $0x410] sm:$0xff]  ;;  %v143_v51 = vld [vmem:[%s6642_s1 + $0x368] sm:$0xff] }
  0x51   :  { %722 = vmatprep.subr.mxu1 %v245_v59  ;;  %762 = vmatpush1.msra.mxu0 %v372_v62  ;;  %v292_v41 = vld [vmem:[%s6642_s1 + $0x810] sm:$0xff]  ;;  %v399_v52 = vld [vmem:[%s6642_s1 + $0xb68] sm:$0xff]  ;;  %v142_v53 = vld [vmem:[%s6642_s1 + $0x360] sm:$0xff] }
  0x52   :  { %723 = vmatpush2.msra.mxu1 %v244_v61  ;;  %763 = vmatprep.subr.mxu0 %v365_v0  ;;  %v398_v54 = vld [vmem:[%s6642_s1 + $0xb60] sm:$0xff]  ;;  %v135_v55 = vld [vmem:[%s6642_s1 + $0x328] sm:$0xff] }
  0x53   :  { %724 = vmatprep.subr.mxu1 %v237_v63  ;;  %764 = vmatpush1.msra.mxu0 %v364_v2  ;;  %v391_v56 = vld [vmem:[%s6642_s1 + $0xb28] sm:$0xff]  ;;  %v134_v57 = vld [vmem:[%s6642_s1 + $0x320] sm:$0xff] }
  0x54   :  { %725 = vmatpush2.msra.mxu1 %v236_v1  ;;  %765 = vmatprep.subr.mxu0 %v357_v4  ;;  %v390_v59 = vld [vmem:[%s6642_s1 + $0xb20] sm:$0xff]  ;;  %v127_v60 = vld [vmem:[%s6642_s1 + $0x2e8] sm:$0xff] }
  0x55   :  { %726 = vmatprep.subr.mxu1 %v229_v3  ;;  %766 = vmatpush1.msra.mxu0 %v356_v6  ;;  %v383_v61 = vld [vmem:[%s6642_s1 + $0xae8] sm:$0xff]  ;;  %v126_v62 = vld [vmem:[%s6642_s1 + $0x2e0] sm:$0xff] }
  0x56   :  { %727 = vmatpush2.msra.mxu1 %v228_v5  ;;  %767 = vmatprep.subr.mxu0 %v349_v8  ;;  %v382_v63 = vld [vmem:[%s6642_s1 + $0xae0] sm:$0xff]  ;;  %v119_v0 = vld [vmem:[%s6642_s1 + $0x2a8] sm:$0xff] }
  0x57   :  { %728 = vmatprep.subr.mxu1 %v221_v7  ;;  %768 = vmatpush1.msra.mxu0 %v348_v12  ;;  %v375_v1 = vld [vmem:[%s6642_s1 + $0xaa8] sm:$0xff]  ;;  %v118_v2 = vld [vmem:[%s6642_s1 + $0x2a0] sm:$0xff] }
  0x58   :  { %729 = vmatpush2.msra.mxu1 %v220_v9  ;;  %769 = vmatprep.subr.mxu0 %v341_v15  ;;  %v374_v3 = vld [vmem:[%s6642_s1 + $0xaa0] sm:$0xff]  ;;  %v111_v4 = vld [vmem:[%s6642_s1 + $0x268] sm:$0xff] }
  0x59   :  { %730 = vmatprep.subr.mxu1 %v213_v13  ;;  %770 = vmatpush1.msra.mxu0 %v340_v18  ;;  %v367_v5 = vld [vmem:[%s6642_s1 + $0xa68] sm:$0xff]  ;;  %v110_v6 = vld [vmem:[%s6642_s1 + $0x260] sm:$0xff] }
  0x5a   :  { %731 = vmatpush2.msra.mxu1 %v212_v16  ;;  %771 = vmatprep.subr.mxu0 %v333_v20  ;;  %v366_v7 = vld [vmem:[%s6642_s1 + $0xa60] sm:$0xff]  ;;  %v103_v8 = vld [vmem:[%s6642_s1 + $0x228] sm:$0xff] }
  0x5b   :  { %732 = vmatprep.subr.mxu1 %v205_v19  ;;  %772 = vmatpush1.msra.mxu0 %v332_v11  ;;  %v359_v9 = vld [vmem:[%s6642_s1 + $0xa28] sm:$0xff]  ;;  %v102_v12 = vld [vmem:[%s6642_s1 + $0x220] sm:$0xff] }
  0x5c   :  { %733 = vmatpush2.msra.mxu1 %v204_v10  ;;  %773 = vmatprep.subr.mxu0 %v325_v17  ;;  %v358_v13 = vld [vmem:[%s6642_s1 + $0xa20] sm:$0xff]  ;;  %v95_v15 = vld [vmem:[%s6642_s1 + $0x1e8] sm:$0xff] }
  0x5d   :  { %734 = vmatprep.subr.mxu1 %v197_v14  ;;  %774 = vmatpush1.msra.mxu0 %v324_v22  ;;  %v351_v16 = vld [vmem:[%s6642_s1 + $0x9e8] sm:$0xff]  ;;  %v94_v18 = vld [vmem:[%s6642_s1 + $0x1e0] sm:$0xff] }
  0x5e   :  { %735 = vmatpush2.msra.mxu1 %v196_v21  ;;  %775 = vmatprep.subr.mxu0 %v317_v25  ;;  %v350_v19 = vld [vmem:[%s6642_s1 + $0x9e0] sm:$0xff]  ;;  %v87_v20 = vld [vmem:[%s6642_s1 + $0x1a8] sm:$0xff] }
  0x5f   :  { %736 = vmatprep.subr.mxu1 %v189_v23  ;;  %776 = vmatpush1.msra.mxu0 %v316_v28  ;;  %v343_v10 = vld [vmem:[%s6642_s1 + $0x9a8] sm:$0xff]  ;;  %v86_v11 = vld [vmem:[%s6642_s1 + $0x1a0] sm:$0xff] }
  0x60   :  { %737 = vmatpush2.msra.mxu1 %v188_v27  ;;  %777 = vmatprep.subr.mxu0 %v309_v29  ;;  %v342_v14 = vld [vmem:[%s6642_s1 + $0x9a0] sm:$0xff]  ;;  %v79_v17 = vld [vmem:[%s6642_s1 + $0x168] sm:$0xff] }
  0x61   :  { %738 = vmatprep.subr.mxu1 %v181_v58  ;;  %778 = vmatpush1.msra.mxu0 %v308_v33  ;;  %v335_v21 = vld [vmem:[%s6642_s1 + $0x968] sm:$0xff]  ;;  %v78_v22 = vld [vmem:[%s6642_s1 + $0x160] sm:$0xff] }
  0x62   :  { %739 = vmatpush2.msra.mxu1 %v180_v32  ;;  %779 = vmatprep.subr.mxu0 %v301_v36  ;;  %v334_v23 = vld [vmem:[%s6642_s1 + $0x960] sm:$0xff]  ;;  %v71_v25 = vld [vmem:[%s6642_s1 + $0x128] sm:$0xff] }
  0x63   :  { %740 = vmatprep.subr.mxu1 %v173_v34  ;;  %780 = vmatpush1.msra.mxu0 %v300_v39  ;;  %v327_v27 = vld [vmem:[%s6642_s1 + $0x928] sm:$0xff]  ;;  %v70_v28 = vld [vmem:[%s6642_s1 + $0x120] sm:$0xff] }
  0x64   :  { %741 = vmatpush2.msra.mxu1 %v172_v38  ;;  %781 = vmatprep.subr.mxu0 %v293_v24  ;;  %v326_v58 = vld [vmem:[%s6642_s1 + $0x920] sm:$0xff]  ;;  %v63_v29 = vld [vmem:[%s6642_s1 + $0xe8] sm:$0xff] }
  0x65   :  { %742 = vmatprep.subr.mxu1 %v165_v40  ;;  %744 = vmatprep.mubr.f32.mxu1 %v3665_v35  ;;  %v319_v32 = vld [vmem:[%s6642_s1 + $0x8e8] sm:$0xff]  ;;  %v62_v33 = vld [vmem:[%s6642_s1 + $0xe0] sm:$0xff] }
  0x66   :  { %743 = vmatpush2.msra.mxu1 %v164_v26  ;;  %782 = vmatpush1.msra.mxu0 %v292_v41  ;;  %v318_v34 = vld [vmem:[%s6642_s1 + $0x8e0] sm:$0xff]  ;;  %v55_v36 = vld [vmem:[%s6642_s1 + $0xa8] sm:$0xff] }
  0x67   :  { %745 = vmatmul.mubr.f32.vlgmr.msra.gmra.mxu1 %v3672_v37  ;;  %815 = vmatprep.mubr.f32.mxu0 %v3182_v30  ;;  %v311_v38 = vld [vmem:[%s6642_s1 + $0x8a8] sm:$0xff]  ;;  %v54_v39 = vld [vmem:[%s6642_s1 + $0xa0] sm:$0xff] }
  0x68   :  { %822 = vmatprep.subr.mxu0 %v159_v42  ;;  %893 = vmatprep.subr.mxu1 %v415_v43  ;;  %v310_v40 = vld [vmem:[%s6642_s1 + $0x8a0] sm:$0xff]  ;;  %v47_v24 = vld [vmem:[%s6642_s1 + $0x68] sm:$0xff] }
  0x69   :  { %816 = vmatmul.mubr.f32.vlgmr.msra.gmra.mxu0 %v3482_v31  ;;  %894 = vmatpush1.msra.mxu1 %v414_v46  ;;  %v303_v26 = vld [vmem:[%s6642_s1 + $0x868] sm:$0xff]  ;;  %v46_v41 = vld [vmem:[%s6642_s1 + $0x60] sm:$0xff] }
  0x6a   :  { %823 = vmatpush1.msra.mxu0 %v158_v45  ;;  %895 = vmatprep.subr.mxu1 %v407_v48  ;;  %v302_v42 = vld [vmem:[%s6642_s1 + $0x860] sm:$0xff]  ;;  %v39_v43 = vld [vmem:[%s6642_s1 + $0x28] sm:$0xff] }
  0x6b   :  { %824 = vmatprep.subr.mxu0 %v151_v47  ;;  %896 = vmatpush1.msra.mxu1 %v406_v50  ;;  %v295_v45 = vld [vmem:[%s6642_s1 + $0x828] sm:$0xff]  ;;  %v38_v46 = vld [vmem:[%s6642_s1 + $0x20] sm:$0xff] }
  0x6c   :  { %825 = vmatpush1.msra.mxu0 %v150_v49  ;;  %897 = vmatprep.subr.mxu1 %v399_v52  ;;  %v294_v47 = vld [vmem:[%s6642_s1 + $0x820] sm:$0xff]  ;;  %v287_v48 = vld [vmem:[%s6642_s1 + $0x7e8] sm:$0xff]  ;;  %v161_v49 = vld [vmem:[%s6642_s1 + $0x3f8] sm:$0xff] }
  0x6d   :  { %826 = vmatprep.subr.mxu0 %v143_v51  ;;  %898 = vmatpush1.msra.mxu1 %v398_v54  ;;  %v286_v50 = vld [vmem:[%s6642_s1 + $0x7e0] sm:$0xff]  ;;  %v160_v51 = vld [vmem:[%s6642_s1 + $0x3f0] sm:$0xff]  ;;  %v279_v52 = vld [vmem:[%s6642_s1 + $0x7a8] sm:$0xff] }
  0x6e   :  { %827 = vmatpush1.msra.mxu0 %v142_v53  ;;  %899 = vmatprep.subr.mxu1 %v391_v56  ;;  %v153_v53 = vld [vmem:[%s6642_s1 + $0x3b8] sm:$0xff]  ;;  %v278_v54 = vld [vmem:[%s6642_s1 + $0x7a0] sm:$0xff]  ;;  %v271_v56 = vld [vmem:[%s6642_s1 + $0x768] sm:$0xff] }
  0x6f   :  { %828 = vmatprep.subr.mxu0 %v135_v55  ;;  %900 = vmatpush1.msra.mxu1 %v390_v59  ;;  %v152_v55 = vld [vmem:[%s6642_s1 + $0x3b0] sm:$0xff]  ;;  %v270_v59 = vld [vmem:[%s6642_s1 + $0x760] sm:$0xff] }
  0x70   :  { %829 = vmatpush1.msra.mxu0 %v134_v57  ;;  %901 = vmatprep.subr.mxu1 %v383_v61  ;;  %v145_v57 = vld [vmem:[%s6642_s1 + $0x378] sm:$0xff]  ;;  %v263_v61 = vld [vmem:[%s6642_s1 + $0x728] sm:$0xff] }
  0x71   :  { %830 = vmatprep.subr.mxu0 %v127_v60  ;;  %902 = vmatpush1.msra.mxu1 %v382_v63  ;;  %v144_v60 = vld [vmem:[%s6642_s1 + $0x370] sm:$0xff]  ;;  %v262_v63 = vld [vmem:[%s6642_s1 + $0x720] sm:$0xff] }
  0x72   :  { %831 = vmatpush1.msra.mxu0 %v126_v62  ;;  %903 = vmatprep.subr.mxu1 %v375_v1  ;;  %v137_v62 = vld [vmem:[%s6642_s1 + $0x338] sm:$0xff]  ;;  %v255_v1 = vld [vmem:[%s6642_s1 + $0x6e8] sm:$0xff] }
  0x73   :  { %832 = vmatprep.subr.mxu0 %v119_v0  ;;  %904 = vmatpush1.msra.mxu1 %v374_v3  ;;  %v136_v0 = vld [vmem:[%s6642_s1 + $0x330] sm:$0xff]  ;;  %v254_v3 = vld [vmem:[%s6642_s1 + $0x6e0] sm:$0xff] }
  0x74   :  { %833 = vmatpush1.msra.mxu0 %v118_v2  ;;  %905 = vmatprep.subr.mxu1 %v367_v5  ;;  %v129_v2 = vld [vmem:[%s6642_s1 + $0x2f8] sm:$0xff]  ;;  %v247_v5 = vld [vmem:[%s6642_s1 + $0x6a8] sm:$0xff] }
  0x75   :  { %834 = vmatprep.subr.mxu0 %v111_v4  ;;  %906 = vmatpush1.msra.mxu1 %v366_v7  ;;  %v128_v4 = vld [vmem:[%s6642_s1 + $0x2f0] sm:$0xff]  ;;  %v246_v7 = vld [vmem:[%s6642_s1 + $0x6a0] sm:$0xff] }
  0x76   :  { %835 = vmatpush1.msra.mxu0 %v110_v6  ;;  %907 = vmatprep.subr.mxu1 %v359_v9  ;;  %v121_v6 = vld [vmem:[%s6642_s1 + $0x2b8] sm:$0xff]  ;;  %v239_v9 = vld [vmem:[%s6642_s1 + $0x668] sm:$0xff] }
  0x77   :  { %836 = vmatprep.subr.mxu0 %v103_v8  ;;  %908 = vmatpush1.msra.mxu1 %v358_v13  ;;  %v120_v8 = vld [vmem:[%s6642_s1 + $0x2b0] sm:$0xff]  ;;  %v238_v13 = vld [vmem:[%s6642_s1 + $0x660] sm:$0xff] }
  0x78   :  { %837 = vmatpush1.msra.mxu0 %v102_v12  ;;  %909 = vmatprep.subr.mxu1 %v351_v16  ;;  %v113_v12 = vld [vmem:[%s6642_s1 + $0x278] sm:$0xff]  ;;  %v231_v16 = vld [vmem:[%s6642_s1 + $0x628] sm:$0xff] }
  0x79   :  { %838 = vmatprep.subr.mxu0 %v95_v15  ;;  %910 = vmatpush1.msra.mxu1 %v350_v19  ;;  %v112_v15 = vld [vmem:[%s6642_s1 + $0x270] sm:$0xff]  ;;  %v230_v19 = vld [vmem:[%s6642_s1 + $0x620] sm:$0xff] }
  0x7a   :  { %839 = vmatpush1.msra.mxu0 %v94_v18  ;;  %911 = vmatprep.subr.mxu1 %v343_v10  ;;  %v105_v18 = vld [vmem:[%s6642_s1 + $0x238] sm:$0xff]  ;;  %v223_v10 = vld [vmem:[%s6642_s1 + $0x5e8] sm:$0xff] }
  0x7b   :  { %840 = vmatprep.subr.mxu0 %v87_v20  ;;  %912 = vmatpush1.msra.mxu1 %v342_v14  ;;  %v104_v20 = vld [vmem:[%s6642_s1 + $0x230] sm:$0xff]  ;;  %v222_v14 = vld [vmem:[%s6642_s1 + $0x5e0] sm:$0xff] }
  0x7c   :  { %841 = vmatpush1.msra.mxu0 %v86_v11  ;;  %913 = vmatprep.subr.mxu1 %v335_v21  ;;  %v97_v11 = vld [vmem:[%s6642_s1 + $0x1f8] sm:$0xff]  ;;  %v215_v21 = vld [vmem:[%s6642_s1 + $0x5a8] sm:$0xff] }
  0x7d   :  { %842 = vmatprep.subr.mxu0 %v79_v17  ;;  %914 = vmatpush1.msra.mxu1 %v334_v23  ;;  %v96_v17 = vld [vmem:[%s6642_s1 + $0x1f0] sm:$0xff]  ;;  %v214_v23 = vld [vmem:[%s6642_s1 + $0x5a0] sm:$0xff] }
  0x7e   :  { %843 = vmatpush1.msra.mxu0 %v78_v22  ;;  %915 = vmatprep.subr.mxu1 %v327_v27  ;;  %v89_v22 = vld [vmem:[%s6642_s1 + $0x1b8] sm:$0xff]  ;;  %v207_v27 = vld [vmem:[%s6642_s1 + $0x568] sm:$0xff] }
  0x7f   :  { %844 = vmatprep.subr.mxu0 %v71_v25  ;;  %916 = vmatpush1.msra.mxu1 %v326_v58  ;;  %v88_v25 = vld [vmem:[%s6642_s1 + $0x1b0] sm:$0xff]  ;;  %v206_v58 = vld [vmem:[%s6642_s1 + $0x560] sm:$0xff] }
  0x80   :  { %845 = vmatpush1.msra.mxu0 %v70_v28  ;;  %917 = vmatprep.subr.mxu1 %v319_v32  ;;  %v81_v28 = vld [vmem:[%s6642_s1 + $0x178] sm:$0xff]  ;;  %v199_v32 = vld [vmem:[%s6642_s1 + $0x528] sm:$0xff] }
  0x81   :  { %846 = vmatprep.subr.mxu0 %v63_v29  ;;  %918 = vmatpush1.msra.mxu1 %v318_v34  ;;  %v80_v29 = vld [vmem:[%s6642_s1 + $0x170] sm:$0xff]  ;;  %v198_v34 = vld [vmem:[%s6642_s1 + $0x520] sm:$0xff] }
  0x82   :  { %847 = vmatpush1.msra.mxu0 %v62_v33  ;;  %919 = vmatprep.subr.mxu1 %v311_v38  ;;  %v73_v33 = vld [vmem:[%s6642_s1 + $0x138] sm:$0xff]  ;;  %v191_v38 = vld [vmem:[%s6642_s1 + $0x4e8] sm:$0xff] }
  0x83   :  { %848 = vmatprep.subr.mxu0 %v55_v36  ;;  %920 = vmatpush1.msra.mxu1 %v310_v40  ;;  %v72_v36 = vld [vmem:[%s6642_s1 + $0x130] sm:$0xff]  ;;  %v190_v40 = vld [vmem:[%s6642_s1 + $0x4e0] sm:$0xff] }
  0x84   :  { %849 = vmatpush1.msra.mxu0 %v54_v39  ;;  %921 = vmatprep.subr.mxu1 %v303_v26  ;;  %v65_v39 = vld [vmem:[%s6642_s1 + $0xf8] sm:$0xff]  ;;  %v183_v26 = vld [vmem:[%s6642_s1 + $0x4a8] sm:$0xff] }
  0x85   :  { %850 = vmatprep.subr.mxu0 %v47_v24  ;;  %922 = vmatpush1.msra.mxu1 %v302_v42  ;;  %v64_v24 = vld [vmem:[%s6642_s1 + $0xf0] sm:$0xff]  ;;  %v182_v42 = vld [vmem:[%s6642_s1 + $0x4a0] sm:$0xff] }
  0x86   :  { %851 = vmatpush1.msra.mxu0 %v46_v41  ;;  %923 = vmatprep.subr.mxu1 %v295_v45  ;;  %v57_v41 = vld [vmem:[%s6642_s1 + $0xb8] sm:$0xff]  ;;  %v175_v45 = vld [vmem:[%s6642_s1 + $0x468] sm:$0xff] }
  0x87   :  { %852 = vmatprep.subr.mxu0 %v39_v43  ;;  %924 = vmatpush1.msra.mxu1 %v294_v47  ;;  %v56_v43 = vld [vmem:[%s6642_s1 + $0xb0] sm:$0xff]  ;;  %v174_v47 = vld [vmem:[%s6642_s1 + $0x460] sm:$0xff] }
  0x88   :  { %853 = vmatpush1.msra.mxu0 %v38_v46  ;;  %957 = vmatprep.mubr.f32.mxu1 %v3182_v30  ;;  %v49_v46 = vld [vmem:[%s6642_s1 + $0x78] sm:$0xff] }
  0x89   :  { %854 = vmatprep.subr.mxu0 %v287_v48  ;;  %958 = vmatmul.mubr.f32.vlgmr.msra.gmra.mxu1 %v3482_v31  ;;  %v48_v48 = vld [vmem:[%s6642_s1 + $0x70] sm:$0xff] }
  0x8a   :  { %964 = vmatprep.subr.mxu1 %v161_v49  ;;  %855 = vmatpush2.msra.mxu0 %v286_v50  ;;  %v167_v49 = vld [vmem:[%s6642_s1 + $0x428] sm:$0xff]  ;;  %v41_v50 = vld [vmem:[%s6642_s1 + $0x38] sm:$0xff] }
  0x8b   :  { %965 = vmatpush1.msra.mxu1 %v160_v51  ;;  %856 = vmatprep.subr.mxu0 %v279_v52  ;;  %v166_v51 = vld [vmem:[%s6642_s1 + $0x420] sm:$0xff]  ;;  %v40_v52 = vld [vmem:[%s6642_s1 + $0x30] sm:$0xff] }
  0x8c   :  { %966 = vmatprep.subr.mxu1 %v153_v53  ;;  %857 = vmatpush2.msra.mxu0 %v278_v54  ;;  %v289_v53 = vld [vmem:[%s6642_s1 + $0x7f8] sm:$0xff] }
  0x8d   :  { %967 = vmatpush1.msra.mxu1 %v152_v55  ;;  %858 = vmatprep.subr.mxu0 %v271_v56  ;;  %v417_v54 = vld [vmem:[%s6642_s1 + $0xbf8] sm:$0xff]  ;;  %v288_v55 = vld [vmem:[%s6642_s1 + $0x7f0] sm:$0xff] }
  0x8e   :  { %968 = vmatprep.subr.mxu1 %v145_v57  ;;  %859 = vmatpush2.msra.mxu0 %v270_v59  ;;  %v416_v56 = vld [vmem:[%s6642_s1 + $0xbf0] sm:$0xff]  ;;  %v281_v57 = vld [vmem:[%s6642_s1 + $0x7b8] sm:$0xff] }
  0x8f   :  { %969 = vmatpush1.msra.mxu1 %v144_v60  ;;  %860 = vmatprep.subr.mxu0 %v263_v61  ;;  %v409_v59 = vld [vmem:[%s6642_s1 + $0xbb8] sm:$0xff]  ;;  %v280_v60 = vld [vmem:[%s6642_s1 + $0x7b0] sm:$0xff] }
  0x90   :  { %970 = vmatprep.subr.mxu1 %v137_v62  ;;  %861 = vmatpush2.msra.mxu0 %v262_v63  ;;  %v408_v61 = vld [vmem:[%s6642_s1 + $0xbb0] sm:$0xff]  ;;  %v273_v62 = vld [vmem:[%s6642_s1 + $0x778] sm:$0xff] }
  0x91   :  { %971 = vmatpush1.msra.mxu1 %v136_v0  ;;  %862 = vmatprep.subr.mxu0 %v255_v1  ;;  %v401_v63 = vld [vmem:[%s6642_s1 + $0xb78] sm:$0xff]  ;;  %v272_v0 = vld [vmem:[%s6642_s1 + $0x770] sm:$0xff] }
  0x92   :  { %972 = vmatprep.subr.mxu1 %v129_v2  ;;  %863 = vmatpush2.msra.mxu0 %v254_v3  ;;  %v400_v1 = vld [vmem:[%s6642_s1 + $0xb70] sm:$0xff]  ;;  %v265_v2 = vld [vmem:[%s6642_s1 + $0x738] sm:$0xff] }
  0x93   :  { %973 = vmatpush1.msra.mxu1 %v128_v4  ;;  %864 = vmatprep.subr.mxu0 %v247_v5  ;;  %v393_v3 = vld [vmem:[%s6642_s1 + $0xb38] sm:$0xff]  ;;  %v264_v4 = vld [vmem:[%s6642_s1 + $0x730] sm:$0xff] }
  0x94   :  { %974 = vmatprep.subr.mxu1 %v121_v6  ;;  %865 = vmatpush2.msra.mxu0 %v246_v7  ;;  %v392_v5 = vld [vmem:[%s6642_s1 + $0xb30] sm:$0xff]  ;;  %v257_v6 = vld [vmem:[%s6642_s1 + $0x6f8] sm:$0xff] }
  0x95   :  { %975 = vmatpush1.msra.mxu1 %v120_v8  ;;  %866 = vmatprep.subr.mxu0 %v239_v9  ;;  %v385_v7 = vld [vmem:[%s6642_s1 + $0xaf8] sm:$0xff]  ;;  %v256_v8 = vld [vmem:[%s6642_s1 + $0x6f0] sm:$0xff] }
  0x96   :  { %976 = vmatprep.subr.mxu1 %v113_v12  ;;  %867 = vmatpush2.msra.mxu0 %v238_v13  ;;  %v384_v9 = vld [vmem:[%s6642_s1 + $0xaf0] sm:$0xff]  ;;  %v249_v12 = vld [vmem:[%s6642_s1 + $0x6b8] sm:$0xff] }
  0x97   :  { %977 = vmatpush1.msra.mxu1 %v112_v15  ;;  %868 = vmatprep.subr.mxu0 %v231_v16  ;;  %v377_v13 = vld [vmem:[%s6642_s1 + $0xab8] sm:$0xff]  ;;  %v248_v15 = vld [vmem:[%s6642_s1 + $0x6b0] sm:$0xff] }
  0x98   :  { %978 = vmatprep.subr.mxu1 %v105_v18  ;;  %869 = vmatpush2.msra.mxu0 %v230_v19  ;;  %v376_v16 = vld [vmem:[%s6642_s1 + $0xab0] sm:$0xff]  ;;  %v241_v18 = vld [vmem:[%s6642_s1 + $0x678] sm:$0xff] }
  0x99   :  { %979 = vmatpush1.msra.mxu1 %v104_v20  ;;  %870 = vmatprep.subr.mxu0 %v223_v10  ;;  %v369_v19 = vld [vmem:[%s6642_s1 + $0xa78] sm:$0xff]  ;;  %v240_v20 = vld [vmem:[%s6642_s1 + $0x670] sm:$0xff] }
  0x9a   :  { %980 = vmatprep.subr.mxu1 %v97_v11  ;;  %871 = vmatpush2.msra.mxu0 %v222_v14  ;;  %v368_v10 = vld [vmem:[%s6642_s1 + $0xa70] sm:$0xff]  ;;  %v233_v11 = vld [vmem:[%s6642_s1 + $0x638] sm:$0xff] }
  0x9b   :  { %981 = vmatpush1.msra.mxu1 %v96_v17  ;;  %872 = vmatprep.subr.mxu0 %v215_v21  ;;  %v361_v14 = vld [vmem:[%s6642_s1 + $0xa38] sm:$0xff]  ;;  %v232_v17 = vld [vmem:[%s6642_s1 + $0x630] sm:$0xff] }
  0x9c   :  { %982 = vmatprep.subr.mxu1 %v89_v22  ;;  %873 = vmatpush2.msra.mxu0 %v214_v23  ;;  %v360_v21 = vld [vmem:[%s6642_s1 + $0xa30] sm:$0xff]  ;;  %v225_v22 = vld [vmem:[%s6642_s1 + $0x5f8] sm:$0xff] }
  0x9d   :  { %983 = vmatpush1.msra.mxu1 %v88_v25  ;;  %874 = vmatprep.subr.mxu0 %v207_v27  ;;  %v353_v23 = vld [vmem:[%s6642_s1 + $0x9f8] sm:$0xff]  ;;  %v224_v25 = vld [vmem:[%s6642_s1 + $0x5f0] sm:$0xff] }
  0x9e   :  { %984 = vmatprep.subr.mxu1 %v81_v28  ;;  %875 = vmatpush2.msra.mxu0 %v206_v58  ;;  %v352_v27 = vld [vmem:[%s6642_s1 + $0x9f0] sm:$0xff]  ;;  %v217_v28 = vld [vmem:[%s6642_s1 + $0x5b8] sm:$0xff] }
  0x9f   :  { %985 = vmatpush1.msra.mxu1 %v80_v29  ;;  %876 = vmatprep.subr.mxu0 %v199_v32  ;;  %v345_v58 = vld [vmem:[%s6642_s1 + $0x9b8] sm:$0xff]  ;;  %v216_v29 = vld [vmem:[%s6642_s1 + $0x5b0] sm:$0xff] }
  0xa0   :  { %986 = vmatprep.subr.mxu1 %v73_v33  ;;  %877 = vmatpush2.msra.mxu0 %v198_v34  ;;  %v344_v32 = vld [vmem:[%s6642_s1 + $0x9b0] sm:$0xff]  ;;  %v209_v33 = vld [vmem:[%s6642_s1 + $0x578] sm:$0xff] }
  0xa1   :  { %987 = vmatpush1.msra.mxu1 %v72_v36  ;;  %878 = vmatprep.subr.mxu0 %v191_v38  ;;  %v337_v34 = vld [vmem:[%s6642_s1 + $0x978] sm:$0xff]  ;;  %v208_v36 = vld [vmem:[%s6642_s1 + $0x570] sm:$0xff] }
  0xa2   :  { %988 = vmatprep.subr.mxu1 %v65_v39  ;;  %879 = vmatpush2.msra.mxu0 %v190_v40  ;;  %v336_v38 = vld [vmem:[%s6642_s1 + $0x970] sm:$0xff]  ;;  %v201_v39 = vld [vmem:[%s6642_s1 + $0x538] sm:$0xff] }
  0xa3   :  { %989 = vmatpush1.msra.mxu1 %v64_v24  ;;  %880 = vmatprep.subr.mxu0 %v183_v26  ;;  %v329_v40 = vld [vmem:[%s6642_s1 + $0x938] sm:$0xff]  ;;  %v200_v24 = vld [vmem:[%s6642_s1 + $0x530] sm:$0xff] }
  0xa4   :  { %990 = vmatprep.subr.mxu1 %v57_v41  ;;  %881 = vmatpush2.msra.mxu0 %v182_v42  ;;  %v328_v26 = vld [vmem:[%s6642_s1 + $0x930] sm:$0xff]  ;;  %v193_v41 = vld [vmem:[%s6642_s1 + $0x4f8] sm:$0xff] }
  0xa5   :  { %991 = vmatpush1.msra.mxu1 %v56_v43  ;;  %882 = vmatprep.subr.mxu0 %v175_v45  ;;  %v321_v42 = vld [vmem:[%s6642_s1 + $0x8f8] sm:$0xff]  ;;  %v192_v43 = vld [vmem:[%s6642_s1 + $0x4f0] sm:$0xff] }
  0xa6   :  { %992 = vmatprep.subr.mxu1 %v49_v46  ;;  %883 = vmatpush2.msra.mxu0 %v174_v47  ;;  %v320_v45 = vld [vmem:[%s6642_s1 + $0x8f0] sm:$0xff]  ;;  %v185_v46 = vld [vmem:[%s6642_s1 + $0x4b8] sm:$0xff] }
  0xa7   :  { %993 = vmatpush1.msra.mxu1 %v48_v48  ;;  %884 = vmatprep.subr.mxu0 %v167_v49  ;;  %v313_v47 = vld [vmem:[%s6642_s1 + $0x8b8] sm:$0xff]  ;;  %v184_v48 = vld [vmem:[%s6642_s1 + $0x4b0] sm:$0xff] }
  0xa8   :  { %994 = vmatprep.subr.mxu1 %v41_v50  ;;  %885 = vmatpush2.msra.mxu0 %v166_v51  ;;  %v312_v49 = vld [vmem:[%s6642_s1 + $0x8b0] sm:$0xff]  ;;  %v177_v50 = vld [vmem:[%s6642_s1 + $0x478] sm:$0xff] }
  0xa9   :  { %886 = vmatprep.mubr.f32.mxu0 %v3665_v35  ;;  %995 = vmatpush1.msra.mxu1 %v40_v52  ;;  %v305_v51 = vld [vmem:[%s6642_s1 + $0x878] sm:$0xff]  ;;  %v176_v52 = vld [vmem:[%s6642_s1 + $0x470] sm:$0xff] }
  0xaa   :  { %887 = vmatmul.mubr.f32.vlgmr.msra.gmra.mxu0 %v3672_v37  ;;  %996 = vmatprep.subr.mxu1 %v289_v53  ;;  %v304_v53 = vld [vmem:[%s6642_s1 + $0x870] sm:$0xff] }
  0xab   :  { %1035 = vmatprep.subr.mxu0 %v417_v54  ;;  %997 = vmatpush2.msra.mxu1 %v288_v55  ;;  %v169_v54 = vld [vmem:[%s6642_s1 + $0x438] sm:$0xff] }
  0xac   :  { %1036 = vmatpush1.msra.mxu0 %v416_v56  ;;  %998 = vmatprep.subr.mxu1 %v281_v57  ;;  %v297_v55 = vld [vmem:[%s6642_s1 + $0x838] sm:$0xff]  ;;  %v168_v56 = vld [vmem:[%s6642_s1 + $0x430] sm:$0xff] }
  0xad   :  { %1037 = vmatprep.subr.mxu0 %v409_v59  ;;  %999 = vmatpush2.msra.mxu1 %v280_v60  ;;  %v296_v57 = vld [vmem:[%s6642_s1 + $0x830] sm:$0xff]  ;;  %v1190_v59 = vld [vmem:[%s6643_s2 + $0x260] sm:$0xff] }
  0xae   :  { %1038 = vmatpush1.msra.mxu0 %v408_v61  ;;  %1000 = vmatprep.subr.mxu1 %v273_v62  ;;  %v1350_v60 = vld [vmem:[%s6643_s2 + $0x760] sm:$0xff]  ;;  %v1189_v61 = vld [vmem:[%s6643_s2 + $0x258] sm:$0xff] }
  0xaf   :  { %1039 = vmatprep.subr.mxu0 %v401_v63  ;;  %1001 = vmatpush2.msra.mxu1 %v272_v0  ;;  %v1349_v62 = vld [vmem:[%s6643_s2 + $0x758] sm:$0xff]  ;;  %v1184_v0 = vld [vmem:[%s6643_s2 + $0x230] sm:$0xff] }
  0xb0   :  { %1040 = vmatpush1.msra.mxu0 %v400_v1  ;;  %1002 = vmatprep.subr.mxu1 %v265_v2  ;;  %v1345_v63 = vld [vmem:[%s6643_s2 + $0x738] sm:$0xff]  ;;  %v1340_v1 = vld [vmem:[%s6643_s2 + $0x710] sm:$0xff]  ;;  %v1179_v2 = vld [vmem:[%s6643_s2 + $0x208] sm:$0xff] }
  0xb1   :  { %1041 = vmatprep.subr.mxu0 %v393_v3  ;;  %1003 = vmatpush2.msra.mxu1 %v264_v4  ;;  %v1339_v3 = vld [vmem:[%s6643_s2 + $0x708] sm:$0xff] }
  0xb2   :  { %1042 = vmatpush1.msra.mxu0 %v392_v5  ;;  %1004 = vmatprep.subr.mxu1 %v257_v6  ;;  %v1175_v4 = vld [vmem:[%s6643_s2 + $0x1e8] sm:$0xff]  ;;  %v1174_v6 = vld [vmem:[%s6643_s2 + $0x1e0] sm:$0xff] }
  0xb3   :  { %1043 = vmatprep.subr.mxu0 %v385_v7  ;;  %1005 = vmatpush2.msra.mxu1 %v256_v8  ;;  %v1335_v5 = vld [vmem:[%s6643_s2 + $0x6e8] sm:$0xff]  ;;  %v1334_v7 = vld [vmem:[%s6643_s2 + $0x6e0] sm:$0xff] }
  0xb4   :  { %1044 = vmatpush1.msra.mxu0 %v384_v9  ;;  %1006 = vmatprep.subr.mxu1 %v249_v12  ;;  %v1170_v8 = vld [vmem:[%s6643_s2 + $0x1c0] sm:$0xff]  ;;  %v1169_v12 = vld [vmem:[%s6643_s2 + $0x1b8] sm:$0xff] }
  0xb5   :  { %1045 = vmatprep.subr.mxu0 %v377_v13  ;;  %1007 = vmatpush2.msra.mxu1 %v248_v15  ;;  %v1330_v9 = vld [vmem:[%s6643_s2 + $0x6c0] sm:$0xff]  ;;  %v1329_v13 = vld [vmem:[%s6643_s2 + $0x6b8] sm:$0xff] }
  0xb6   :  { %1046 = vmatpush1.msra.mxu0 %v376_v16  ;;  %1008 = vmatprep.subr.mxu1 %v241_v18  ;;  %v1165_v15 = vld [vmem:[%s6643_s2 + $0x198] sm:$0xff]  ;;  %v1164_v18 = vld [vmem:[%s6643_s2 + $0x190] sm:$0xff] }
  0xb7   :  { %1047 = vmatprep.subr.mxu0 %v369_v19  ;;  %1009 = vmatpush2.msra.mxu1 %v240_v20  ;;  %v1325_v16 = vld [vmem:[%s6643_s2 + $0x698] sm:$0xff]  ;;  %v1324_v19 = vld [vmem:[%s6643_s2 + $0x690] sm:$0xff] }
  0xb8   :  { %1048 = vmatpush1.msra.mxu0 %v368_v10  ;;  %1010 = vmatprep.subr.mxu1 %v233_v11  ;;  %v1160_v20 = vld [vmem:[%s6643_s2 + $0x170] sm:$0xff]  ;;  %v1159_v11 = vld [vmem:[%s6643_s2 + $0x168] sm:$0xff] }
  0xb9   :  { %1049 = vmatprep.subr.mxu0 %v361_v14  ;;  %1011 = vmatpush2.msra.mxu1 %v232_v17  ;;  %v1320_v10 = vld [vmem:[%s6643_s2 + $0x670] sm:$0xff]  ;;  %v1319_v14 = vld [vmem:[%s6643_s2 + $0x668] sm:$0xff] }
  0xba   :  { %1050 = vmatpush1.msra.mxu0 %v360_v21  ;;  %1012 = vmatprep.subr.mxu1 %v225_v22  ;;  %v1155_v17 = vld [vmem:[%s6643_s2 + $0x148] sm:$0xff]  ;;  %v1154_v22 = vld [vmem:[%s6643_s2 + $0x140] sm:$0xff] }
  0xbb   :  { %1051 = vmatprep.subr.mxu0 %v353_v23  ;;  %1013 = vmatpush2.msra.mxu1 %v224_v25  ;;  %v1315_v21 = vld [vmem:[%s6643_s2 + $0x648] sm:$0xff]  ;;  %v1314_v23 = vld [vmem:[%s6643_s2 + $0x640] sm:$0xff] }
  0xbc   :  { %1052 = vmatpush1.msra.mxu0 %v352_v27  ;;  %1014 = vmatprep.subr.mxu1 %v217_v28  ;;  %v1150_v25 = vld [vmem:[%s6643_s2 + $0x120] sm:$0xff]  ;;  %v1149_v28 = vld [vmem:[%s6643_s2 + $0x118] sm:$0xff] }
  0xbd   :  { %1053 = vmatprep.subr.mxu0 %v345_v58  ;;  %1015 = vmatpush2.msra.mxu1 %v216_v29  ;;  %v1310_v27 = vld [vmem:[%s6643_s2 + $0x620] sm:$0xff]  ;;  %v1309_v58 = vld [vmem:[%s6643_s2 + $0x618] sm:$0xff] }
  0xbe   :  { %1054 = vmatpush1.msra.mxu0 %v344_v32  ;;  %1016 = vmatprep.subr.mxu1 %v209_v33  ;;  %v1145_v29 = vld [vmem:[%s6643_s2 + $0xf8] sm:$0xff]  ;;  %v1144_v33 = vld [vmem:[%s6643_s2 + $0xf0] sm:$0xff] }
  0xbf   :  { %1055 = vmatprep.subr.mxu0 %v337_v34  ;;  %1017 = vmatpush2.msra.mxu1 %v208_v36  ;;  %v1305_v32 = vld [vmem:[%s6643_s2 + $0x5f8] sm:$0xff]  ;;  %v1304_v34 = vld [vmem:[%s6643_s2 + $0x5f0] sm:$0xff] }
  0xc0   :  { %1056 = vmatpush1.msra.mxu0 %v336_v38  ;;  %1018 = vmatprep.subr.mxu1 %v201_v39  ;;  %v1140_v36 = vld [vmem:[%s6643_s2 + $0xd0] sm:$0xff]  ;;  %v1139_v39 = vld [vmem:[%s6643_s2 + $0xc8] sm:$0xff] }
  0xc1   :  { %1057 = vmatprep.subr.mxu0 %v329_v40  ;;  %1019 = vmatpush2.msra.mxu1 %v200_v24  ;;  %v1300_v38 = vld [vmem:[%s6643_s2 + $0x5d0] sm:$0xff]  ;;  %v1299_v40 = vld [vmem:[%s6643_s2 + $0x5c8] sm:$0xff] }
  0xc2   :  { %1058 = vmatpush1.msra.mxu0 %v328_v26  ;;  %1020 = vmatprep.subr.mxu1 %v193_v41  ;;  %v1135_v24 = vld [vmem:[%s6643_s2 + $0xa8] sm:$0xff]  ;;  %v1134_v41 = vld [vmem:[%s6643_s2 + $0xa0] sm:$0xff] }
  0xc3   :  { %1059 = vmatprep.subr.mxu0 %v321_v42  ;;  %1021 = vmatpush2.msra.mxu1 %v192_v43  ;;  %v1295_v26 = vld [vmem:[%s6643_s2 + $0x5a8] sm:$0xff]  ;;  %v1294_v42 = vld [vmem:[%s6643_s2 + $0x5a0] sm:$0xff] }
  0xc4   :  { %1060 = vmatpush1.msra.mxu0 %v320_v45  ;;  %1022 = vmatprep.subr.mxu1 %v185_v46  ;;  %v1130_v43 = vld [vmem:[%s6643_s2 + $0x80] sm:$0xff]  ;;  %v1129_v46 = vld [vmem:[%s6643_s2 + $0x78] sm:$0xff] }
  0xc5   :  { %1061 = vmatprep.subr.mxu0 %v313_v47  ;;  %1023 = vmatpush2.msra.mxu1 %v184_v48  ;;  %v1290_v45 = vld [vmem:[%s6643_s2 + $0x580] sm:$0xff]  ;;  %v1289_v47 = vld [vmem:[%s6643_s2 + $0x578] sm:$0xff] }
  0xc6   :  { %1062 = vmatpush1.msra.mxu0 %v312_v49  ;;  %1024 = vmatprep.subr.mxu1 %v177_v50  ;;  %v1125_v48 = vld [vmem:[%s6643_s2 + $0x58] sm:$0xff]  ;;  %v1124_v50 = vld [vmem:[%s6643_s2 + $0x50] sm:$0xff] }
  0xc7   :  { %1063 = vmatprep.subr.mxu0 %v305_v51  ;;  %1025 = vmatpush2.msra.mxu1 %v176_v52  ;;  %v1285_v49 = vld [vmem:[%s6643_s2 + $0x558] sm:$0xff]  ;;  %v1284_v51 = vld [vmem:[%s6643_s2 + $0x550] sm:$0xff] }
  0xc8   :  { %1064 = vmatpush1.msra.mxu0 %v304_v53  ;;  %1026 = vmatprep.subr.mxu1 %v169_v54  ;;  %v1120_v52 = vld [vmem:[%s6643_s2 + $0x30] sm:$0xff]  ;;  %v1119_v54 = vld [vmem:[%s6643_s2 + $0x28] sm:$0xff] }
  0xc9   :  { %1065 = vmatprep.subr.mxu0 %v297_v55  ;;  %1027 = vmatpush2.msra.mxu1 %v168_v56  ;;  %v1280_v53 = vld [vmem:[%s6643_s2 + $0x530] sm:$0xff]  ;;  %v1279_v55 = vld [vmem:[%s6643_s2 + $0x528] sm:$0xff] }
  0xca   :  { %1028 = vmatprep.mubr.f32.mxu1 %v3665_v35  ;;  %1066 = vmatpush1.msra.mxu0 %v296_v57  ;;  %v1185_v35 = vld [vmem:[%s6643_s2 + $0x238] sm:$0xff]  ;;  %v1115_v56 = vld [vmem:[%s6643_s2 + $0x8] sm:$0xff] }
  0xcb   :  { %1099 = vmatprep.mubr.f32.mxu0 %v3182_v30  ;;  %1029 = vmatmul.mubr.f32.vlgmr.msra.gmra.mxu1 %v3672_v37  ;;  %v1344_v37 = vld [vmem:[%s6643_s2 + $0x730] sm:$0xff]  ;;  %v1275_v57 = vld [vmem:[%s6643_s2 + $0x508] sm:$0xff] }
  0xcc   :  { %1100 = vmatmul.mubr.f32.vlgmr.msra.gmra.mxu0 %v3482_v31  ;;  %1745 = vmatprep.subr.mxu0 %v1190_v59  ;;  %v1180_v31 = vld [vmem:[%s6643_s2 + $0x210] sm:$0xff]  ;;  %v1114_v59 = vld [vmem:[%s6643_s2] sm:$0xff] }
  0xcd   :  { %1816 = vmatprep.subr.mxu1 %v1350_v60  ;;  %1746 = vmatpush1.msra.mxu0 %v1189_v61  ;;  %v1274_v60 = vld [vmem:[%s6643_s2 + $0x500] sm:$0xff] }
  0xce   :  { %1817 = vmatpush1.msra.mxu1 %v1349_v62  ;;  %1747 = vmatprep.subr.mxu0 %v1185_v35  ;;  %v1270_v61 = vld [vmem:[%s6643_s2 + $0x4e0] sm:$0xff]  ;;  %v1269_v35 = vld [vmem:[%s6643_s2 + $0x4d8] sm:$0xff] }
  0xcf   :  { %1818 = vmatprep.subr.mxu1 %v1345_v63  ;;  %1748 = vmatpush1.msra.mxu0 %v1184_v0  ;;  %v1430_v62 = vld [vmem:[%s6643_s2 + $0x9e0] sm:$0xff]  ;;  %v1429_v63 = vld [vmem:[%s6643_s2 + $0x9d8] sm:$0xff] }
  0xd0   :  { %1819 = vmatpush1.msra.mxu1 %v1344_v37  ;;  %1749 = vmatprep.subr.mxu0 %v1180_v31  ;;  %v1265_v0 = vld [vmem:[%s6643_s2 + $0x4b8] sm:$0xff]  ;;  %v1264_v31 = vld [vmem:[%s6643_s2 + $0x4b0] sm:$0xff] }
  0xd1   :  { %1820 = vmatprep.subr.mxu1 %v1340_v1  ;;  %1750 = vmatpush1.msra.mxu0 %v1179_v2  ;;  %v1425_v37 = vld [vmem:[%s6643_s2 + $0x9b8] sm:$0xff]  ;;  %v1424_v1 = vld [vmem:[%s6643_s2 + $0x9b0] sm:$0xff] }
  0xd2   :  { %1821 = vmatpush1.msra.mxu1 %v1339_v3  ;;  %1751 = vmatprep.subr.mxu0 %v1175_v4  ;;  %v1260_v2 = vld [vmem:[%s6643_s2 + $0x490] sm:$0xff]  ;;  %v1259_v4 = vld [vmem:[%s6643_s2 + $0x488] sm:$0xff] }
  0xd3   :  { %1822 = vmatprep.subr.mxu1 %v1335_v5  ;;  %1752 = vmatpush1.msra.mxu0 %v1174_v6  ;;  %v1420_v3 = vld [vmem:[%s6643_s2 + $0x990] sm:$0xff]  ;;  %v1419_v5 = vld [vmem:[%s6643_s2 + $0x988] sm:$0xff] }
  0xd4   :  { %1823 = vmatpush1.msra.mxu1 %v1334_v7  ;;  %1753 = vmatprep.subr.mxu0 %v1170_v8  ;;  %v1255_v6 = vld [vmem:[%s6643_s2 + $0x468] sm:$0xff]  ;;  %v1254_v8 = vld [vmem:[%s6643_s2 + $0x460] sm:$0xff] }
  0xd5   :  { %1824 = vmatprep.subr.mxu1 %v1330_v9  ;;  %1754 = vmatpush1.msra.mxu0 %v1169_v12  ;;  %v1415_v7 = vld [vmem:[%s6643_s2 + $0x968] sm:$0xff]  ;;  %v1414_v9 = vld [vmem:[%s6643_s2 + $0x960] sm:$0xff] }
  0xd6   :  { %1825 = vmatpush1.msra.mxu1 %v1329_v13  ;;  %1755 = vmatprep.subr.mxu0 %v1165_v15  ;;  %v1250_v12 = vld [vmem:[%s6643_s2 + $0x440] sm:$0xff]  ;;  %v1249_v15 = vld [vmem:[%s6643_s2 + $0x438] sm:$0xff] }
  0xd7   :  { %1826 = vmatprep.subr.mxu1 %v1325_v16  ;;  %1756 = vmatpush1.msra.mxu0 %v1164_v18  ;;  %v1410_v13 = vld [vmem:[%s6643_s2 + $0x940] sm:$0xff]  ;;  %v1409_v16 = vld [vmem:[%s6643_s2 + $0x938] sm:$0xff] }
  0xd8   :  { %1827 = vmatpush1.msra.mxu1 %v1324_v19  ;;  %1757 = vmatprep.subr.mxu0 %v1160_v20  ;;  %v1245_v18 = vld [vmem:[%s6643_s2 + $0x418] sm:$0xff]  ;;  %v1244_v20 = vld [vmem:[%s6643_s2 + $0x410] sm:$0xff] }
  0xd9   :  { %1828 = vmatprep.subr.mxu1 %v1320_v10  ;;  %1758 = vmatpush1.msra.mxu0 %v1159_v11  ;;  %v1405_v19 = vld [vmem:[%s6643_s2 + $0x918] sm:$0xff]  ;;  %v1404_v10 = vld [vmem:[%s6643_s2 + $0x910] sm:$0xff] }
  0xda   :  { %1829 = vmatpush1.msra.mxu1 %v1319_v14  ;;  %1759 = vmatprep.subr.mxu0 %v1155_v17  ;;  %v1240_v11 = vld [vmem:[%s6643_s2 + $0x3f0] sm:$0xff]  ;;  %v1239_v17 = vld [vmem:[%s6643_s2 + $0x3e8] sm:$0xff] }
  0xdb   :  { %1830 = vmatprep.subr.mxu1 %v1315_v21  ;;  %1760 = vmatpush1.msra.mxu0 %v1154_v22  ;;  %v1400_v14 = vld [vmem:[%s6643_s2 + $0x8f0] sm:$0xff]  ;;  %v1399_v21 = vld [vmem:[%s6643_s2 + $0x8e8] sm:$0xff] }
  0xdc   :  { %1831 = vmatpush1.msra.mxu1 %v1314_v23  ;;  %1761 = vmatprep.subr.mxu0 %v1150_v25  ;;  %v1235_v22 = vld [vmem:[%s6643_s2 + $0x3c8] sm:$0xff]  ;;  %v1234_v25 = vld [vmem:[%s6643_s2 + $0x3c0] sm:$0xff] }
  0xdd   :  { %1832 = vmatprep.subr.mxu1 %v1310_v27  ;;  %1762 = vmatpush1.msra.mxu0 %v1149_v28  ;;  %v1395_v23 = vld [vmem:[%s6643_s2 + $0x8c8] sm:$0xff]  ;;  %v1394_v27 = vld [vmem:[%s6643_s2 + $0x8c0] sm:$0xff] }
  0xde   :  { %1833 = vmatpush1.msra.mxu1 %v1309_v58  ;;  %1763 = vmatprep.subr.mxu0 %v1145_v29  ;;  %v1230_v28 = vld [vmem:[%s6643_s2 + $0x3a0] sm:$0xff]  ;;  %v1229_v29 = vld [vmem:[%s6643_s2 + $0x398] sm:$0xff] }
  0xdf   :  { %1834 = vmatprep.subr.mxu1 %v1305_v32  ;;  %1764 = vmatpush1.msra.mxu0 %v1144_v33  ;;  %v1390_v58 = vld [vmem:[%s6643_s2 + $0x8a0] sm:$0xff]  ;;  %v1389_v32 = vld [vmem:[%s6643_s2 + $0x898] sm:$0xff] }
  0xe0   :  { %1835 = vmatpush1.msra.mxu1 %v1304_v34  ;;  %1765 = vmatprep.subr.mxu0 %v1140_v36  ;;  %v1225_v33 = vld [vmem:[%s6643_s2 + $0x378] sm:$0xff]  ;;  %v1224_v36 = vld [vmem:[%s6643_s2 + $0x370] sm:$0xff] }
  0xe1   :  { %1836 = vmatprep.subr.mxu1 %v1300_v38  ;;  %1766 = vmatpush1.msra.mxu0 %v1139_v39  ;;  %v1385_v34 = vld [vmem:[%s6643_s2 + $0x878] sm:$0xff]  ;;  %v1384_v38 = vld [vmem:[%s6643_s2 + $0x870] sm:$0xff] }
  0xe2   :  { %1837 = vmatpush1.msra.mxu1 %v1299_v40  ;;  %1767 = vmatprep.subr.mxu0 %v1135_v24  ;;  %v1220_v39 = vld [vmem:[%s6643_s2 + $0x350] sm:$0xff]  ;;  %v1219_v24 = vld [vmem:[%s6643_s2 + $0x348] sm:$0xff] }
  0xe3   :  { %1838 = vmatprep.subr.mxu1 %v1295_v26  ;;  %1768 = vmatpush1.msra.mxu0 %v1134_v41  ;;  %v1380_v40 = vld [vmem:[%s6643_s2 + $0x850] sm:$0xff]  ;;  %v422_v26 = vsub.s32 0, %v3347_v44  ;;  %v1379_v41 = vld [vmem:[%s6643_s2 + $0x848] sm:$0xff] }
  0xe4   :  { %1839 = vmatpush1.msra.mxu1 %v1294_v42  ;;  %1769 = vmatprep.subr.mxu0 %v1130_v43  ;;  %v4787_v42 = vld [vmem:[%s6645_s4] sm:$0xff]  ;;  %v1215_v43 = vld [vmem:[%s6643_s2 + $0x328] sm:$0xff] }
  0xe5   :  { %1840 = vmatprep.subr.mxu1 %v1290_v45  ;;  %1770 = vmatpush1.msra.mxu0 %v1129_v46  ;;  %v1375_v45 = vld [vmem:[%s6643_s2 + $0x828] sm:$0xff]  ;;  %v1214_v46 = vld [vmem:[%s6643_s2 + $0x320] sm:$0xff] }
  0xe6   :  { %1841 = vmatpush1.msra.mxu1 %v1289_v47  ;;  %1771 = vmatprep.subr.mxu0 %v1125_v48  ;;  %v426_v47 = vsub.s32 1, %v3347_v44  ;;  %v1374_v48 = vld [vmem:[%s6643_s2 + $0x820] sm:$0xff] }
  0xe7   :  { %1842 = vmatprep.subr.mxu1 %v1285_v49  ;;  %1772 = vmatpush1.msra.mxu0 %v1124_v50  ;;  %v1210_v49 = vld [vmem:[%s6643_s2 + $0x300] sm:$0xff] }
  0xe8   :  { %1843 = vmatpush1.msra.mxu1 %v1284_v51  ;;  %1773 = vmatprep.subr.mxu0 %v1120_v52  ;;  %v1370_v50 = vld [vmem:[%s6643_s2 + $0x800] sm:$0xff]  ;;  %v423_v51 = vrot.slane %v4787_v42, %v422_v26  ;;  %v1209_v52 = vld [vmem:[%s6643_s2 + $0x2f8] sm:$0xff] }
  0xe9   :  { %1844 = vmatprep.subr.mxu1 %v1280_v53  ;;  %1774 = vmatpush1.msra.mxu0 %v1119_v54  ;;  %v1369_v53 = vld [vmem:[%s6643_s2 + $0x7f8] sm:$0xff] }
  0xea   :  { %1845 = vmatpush1.msra.mxu1 %v1279_v55  ;;  %1775 = vmatprep.subr.mxu0 %v1115_v56  ;;  %v1205_v54 = vld [vmem:[%s6643_s2 + $0x2d8] sm:$0xff]  ;;  %v427_v56 = vrot.slane %v4787_v42, %v426_v47 }
  0xeb   :  { %1846 = vmatprep.subr.mxu1 %v1275_v57  ;;  %1776 = vmatpush1.msra.mxu0 %v1114_v59  ;;  %v1365_v55 = vld [vmem:[%s6643_s2 + $0x7d8] sm:$0xff]  ;;  %v1204_v57 = vld [vmem:[%s6643_s2 + $0x2d0] sm:$0xff] }
  0xec   :  { %1847 = vmatpush1.msra.mxu1 %v1274_v60  ;;  %1777 = vmatprep.subr.mxu0 %v1270_v61  ;;  %v1364_v59 = vld [vmem:[%s6643_s2 + $0x7d0] sm:$0xff]  ;;  %v675_v60 = vpop.f32.mrf.mxu1 }
  0xed   :  { %1848 = vmatprep.subr.mxu1 %v1430_v62  ;;  %1778 = vmatpush2.msra.mxu0 %v1269_v35  ;;  %v1200_v62 = vld [vmem:[%s6643_s2 + $0x2b0] sm:$0xff] }
  0xee   :  { %1849 = vmatpush2.msra.mxu1 %v1429_v63  ;;  %1779 = vmatprep.subr.mxu0 %v1265_v0  ;;  %v1360_v35 = vld [vmem:[%s6643_s2 + $0x7b0] sm:$0xff]  ;;  %v1199_v0 = vld [vmem:[%s6643_s2 + $0x2a8] sm:$0xff] }
  0xef   :  { %1850 = vmatprep.subr.mxu1 %v1425_v37  ;;  %1780 = vmatpush2.msra.mxu0 %v1264_v31  ;;  %v1359_v37 = vld [vmem:[%s6643_s2 + $0x7a8] sm:$0xff] }
  0xf0   :  { %1851 = vmatpush2.msra.mxu1 %v1424_v1  ;;  %1781 = vmatprep.subr.mxu0 %v1260_v2  ;;  %v1195_v1 = vld [vmem:[%s6643_s2 + $0x288] sm:$0xff] }
  0xf1   :  { %1852 = vmatprep.subr.mxu1 %v1420_v3  ;;  %1782 = vmatpush2.msra.mxu0 %v1259_v4  ;;  %v1355_v2 = vld [vmem:[%s6643_s2 + $0x788] sm:$0xff]  ;;  %v1194_v4 = vld [vmem:[%s6643_s2 + $0x280] sm:$0xff] }
  0xf2   :  { %1853 = vmatpush2.msra.mxu1 %v1419_v5  ;;  %1783 = vmatprep.subr.mxu0 %v1255_v6  ;;  %v1354_v5 = vld [vmem:[%s6643_s2 + $0x780] sm:$0xff]  ;;  %v677_v6 = vpop.f32.mrf.mxu1 }
  0xf3   :  { %1854 = vmatprep.subr.mxu1 %v1415_v7  ;;  %1784 = vmatpush2.msra.mxu0 %v1254_v8  ;;  %v1510_v8 = vld [vmem:[%s6643_s2 + $0xc60] sm:$0xff] }
  0xf4   :  { %1855 = vmatpush2.msra.mxu1 %v1414_v9  ;;  %1785 = vmatprep.subr.mxu0 %v1250_v12  ;;  %v1670_v9 = vld [vmem:[%s6643_s2 + $0x1160] sm:$0xff] }
  0xf5   :  { %1856 = vmatprep.subr.mxu1 %v1410_v13  ;;  %1786 = vmatpush2.msra.mxu0 %v1249_v15 }
  0xf6   :  { %1857 = vmatpush2.msra.mxu1 %v1409_v16  ;;  %1787 = vmatprep.subr.mxu0 %v1245_v18  ;;  %v1509_v16 = vld [vmem:[%s6643_s2 + $0xc58] sm:$0xff] }
  0xf7   :  { %1858 = vmatprep.subr.mxu1 %v1405_v19  ;;  %1788 = vmatpush2.msra.mxu0 %v1244_v20  ;;  %v1505_v18 = vld [vmem:[%s6643_s2 + $0xc38] sm:$0xff]  ;;  %v1504_v19 = vld [vmem:[%s6643_s2 + $0xc30] sm:$0xff] }
  0xf8   :  { %1859 = vmatpush2.msra.mxu1 %v1404_v10  ;;  %1789 = vmatprep.subr.mxu0 %v1240_v11  ;;  %v1500_v20 = vld [vmem:[%s6643_s2 + $0xc10] sm:$0xff]  ;;  %v1499_v10 = vld [vmem:[%s6643_s2 + $0xc08] sm:$0xff] }
  0xf9   :  { %1860 = vmatprep.subr.mxu1 %v1400_v14  ;;  %1790 = vmatpush2.msra.mxu0 %v1239_v17  ;;  %v1495_v11 = vld [vmem:[%s6643_s2 + $0xbe8] sm:$0xff]  ;;  %v1494_v14 = vld [vmem:[%s6643_s2 + $0xbe0] sm:$0xff] }
  0xfa   :  { %1861 = vmatpush2.msra.mxu1 %v1399_v21  ;;  %1791 = vmatprep.subr.mxu0 %v1235_v22  ;;  %v1490_v17 = vld [vmem:[%s6643_s2 + $0xbc0] sm:$0xff]  ;;  %v1489_v21 = vld [vmem:[%s6643_s2 + $0xbb8] sm:$0xff] }
  0xfb   :  { %1862 = vmatprep.subr.mxu1 %v1395_v23  ;;  %1792 = vmatpush2.msra.mxu0 %v1234_v25  ;;  %v1485_v22 = vld [vmem:[%s6643_s2 + $0xb98] sm:$0xff]  ;;  %v1484_v23 = vld [vmem:[%s6643_s2 + $0xb90] sm:$0xff] }
  0xfc   :  { %1863 = vmatpush2.msra.mxu1 %v1394_v27  ;;  %1793 = vmatprep.subr.mxu0 %v1230_v28  ;;  %v1480_v25 = vld [vmem:[%s6643_s2 + $0xb70] sm:$0xff]  ;;  %v1479_v27 = vld [vmem:[%s6643_s2 + $0xb68] sm:$0xff] }
  0xfd   :  { %1864 = vmatprep.subr.mxu1 %v1390_v58  ;;  %1794 = vmatpush2.msra.mxu0 %v1229_v29  ;;  %v1475_v28 = vld [vmem:[%s6643_s2 + $0xb48] sm:$0xff]  ;;  %v1474_v58 = vld [vmem:[%s6643_s2 + $0xb40] sm:$0xff] }
  0xfe   :  { %1865 = vmatpush2.msra.mxu1 %v1389_v32  ;;  %1795 = vmatprep.subr.mxu0 %v1225_v33  ;;  %v1470_v29 = vld [vmem:[%s6643_s2 + $0xb20] sm:$0xff]  ;;  %v1469_v32 = vld [vmem:[%s6643_s2 + $0xb18] sm:$0xff] }
  0xff   :  { %1866 = vmatprep.subr.mxu1 %v1385_v34  ;;  %1796 = vmatpush2.msra.mxu0 %v1224_v36  ;;  %v1465_v33 = vld [vmem:[%s6643_s2 + $0xaf8] sm:$0xff]  ;;  %v430_v34 = vsub.s32 2, %v3347_v44  ;;  %v1464_v36 = vld [vmem:[%s6643_s2 + $0xaf0] sm:$0xff] }
 0x100   :  { %1867 = vmatpush2.msra.mxu1 %v1384_v38  ;;  %1797 = vmatprep.subr.mxu0 %v1220_v39  ;;  %v1460_v38 = vld [vmem:[%s6643_s2 + $0xad0] sm:$0xff]  ;;  %v434_v39 = vsub.s32 3, %v3347_v44 }
 0x101   :  { %1868 = vmatprep.subr.mxu1 %v1380_v40  ;;  %1798 = vmatpush2.msra.mxu0 %v1219_v24  ;;  %v1459_v40 = vld [vmem:[%s6643_s2 + $0xac8] sm:$0xff] }
 0x102   :  { %1869 = vmatpush2.msra.mxu1 %v1379_v41  ;;  %1799 = vmatprep.subr.mxu0 %v1215_v43  ;;  %v1455_v24 = vld [vmem:[%s6643_s2 + $0xaa8] sm:$0xff]  ;;  %v431_v41 = vrot.slane %v4787_v42, %v430_v34  ;;  %v1454_v43 = vld [vmem:[%s6643_s2 + $0xaa0] sm:$0xff] }
 0x103   :  { %1870 = vmatprep.subr.mxu1 %v1375_v45  ;;  %1800 = vmatpush2.msra.mxu0 %v1214_v46  ;;  %v1450_v45 = vld [vmem:[%s6643_s2 + $0xa80] sm:$0xff]  ;;  %v435_v46 = vrot.slane %v4787_v42, %v434_v39 }
 0x104   :  { %1871 = vmatpush2.msra.mxu1 %v1374_v48  ;;  %1801 = vmatprep.subr.mxu0 %v1210_v49  ;;  %v1449_v48 = vld [vmem:[%s6643_s2 + $0xa78] sm:$0xff] }
 0x105   :  { %1872 = vmatprep.subr.mxu1 %v1370_v50  ;;  %v604_v61 = vpop.f32.mrf.mxu0  ;;  %1802 = vmatpush2.msra.mxu0 %v1209_v52  ;;  %v1445_v50 = vld [vmem:[%s6643_s2 + $0xa58] sm:$0xff]  ;;  %v1444_v52 = vld [vmem:[%s6643_s2 + $0xa50] sm:$0xff] }
 0x106   :  { %1873 = vmatpush2.msra.mxu1 %v1369_v53  ;;  %v605_v63 = vadd.f32 %v604_v61, %v423_v51  ;;  %1803 = vmatprep.subr.mxu0 %v1205_v54  ;;  %v1435_v61 = vld [vmem:[%s6643_s2 + $0xa08] sm:$0xff] }
 0x107   :  { %1874 = vmatprep.subr.mxu1 %v1365_v55  ;;  %v606_v31 = vpop.f32.mrf.mxu0  ;;  %1804 = vmatpush2.msra.mxu0 %v1204_v57  ;;  %v1440_v55 = vld [vmem:[%s6643_s2 + $0xa30] sm:$0xff]  ;;  %v1439_v57 = vld [vmem:[%s6643_s2 + $0xa28] sm:$0xff] }
 0x108   :  { %1875 = vmatpush2.msra.mxu1 %v1364_v59  ;;  %v607_v3 = vadd.f32 %v606_v31, %v427_v56  ;;  %1805 = vmatprep.subr.mxu0 %v1200_v62  ;;  %v676_v7 = vadd.f32 %v675_v60, %v605_v63  ;;  %v1590_v63 = vld [vmem:[%s6643_s2 + $0xee0] sm:$0xff] }
 0x109   :  { %1876 = vmatprep.subr.mxu1 %v1360_v35  ;;  %1806 = vmatpush2.msra.mxu0 %v1199_v0  ;;  %v1434_v35 = vld [vmem:[%s6643_s2 + $0xa00] sm:$0xff] }
 0x10a   :  { %1877 = vmatpush2.msra.mxu1 %v1359_v37  ;;  %v678_v12 = vadd.f32 %v677_v6, %v607_v3  ;;  %1807 = vmatprep.subr.mxu0 %v1195_v1  ;;  %v4864_v15 = vmax.f32 %v676_v7, 0.0  ;;  %v1589_v37 = vld [vmem:[%s6643_s2 + $0xed8] sm:$0xff]  ;;  %v1584_v3 = vld [vmem:[%s6643_s2 + $0xeb0] sm:$0xff]  ;;  %v1579_v7 = vld [vmem:[%s6643_s2 + $0xe88] sm:$0xff] }
 0x10b   :  { %1878 = vmatprep.subr.mxu1 %v1355_v2  ;;  %1808 = vmatpush2.msra.mxu0 %v1194_v4  ;;  %v1585_v1 = vld [vmem:[%s6643_s2 + $0xeb8] sm:$0xff]  ;;  %v1664_v6 = vld [vmem:[%s6643_s2 + $0x1130] sm:$0xff] }
 0x10c   :  { %1879 = vmatpush2.msra.mxu1 %v1354_v5  ;;  %v4862_v13 = vmax.f32 %v678_v12, 0.0  ;;  %1887 = vmatprep.subr.mxu0 %v1510_v8  ;;  %v1669_v2 = vld [vmem:[%s6643_s2 + $0x1158] sm:$0xff]  ;;  %v1580_v5 = vld [vmem:[%s6643_s2 + $0xe90] sm:$0xff]  ;;  %v1659_v12 = vld [vmem:[%s6643_s2 + $0x1108] sm:$0xff] }
 0x10d   :  { %1958 = vmatprep.subr.mxu1 %v1670_v9  ;;  %v1665_v4 = vld [vmem:[%s6643_s2 + $0x1138] sm:$0xff]  ;;  %v1660_v8 = vld [vmem:[%s6643_s2 + $0x1110] sm:$0xff]  ;;  %v1575_v9 = vld [vmem:[%s6643_s2 + $0xe68] sm:$0xff] }
 0x10e   :  { %1809 = vmatprep.mubr.f32.mxu0 %v4862_v13 }
 0x10f   :  { %1810 = vmatmul.mubr.f32.vlgmr.msra.gmra.mxu0 %v4864_v15 }
 0x110   :  { %1888 = vmatpush1.msra.mxu0 %v1509_v16  ;;  %v1574_v16 = vld [vmem:[%s6643_s2 + $0xe60] sm:$0xff] }
 0x111   :  { %1889 = vmatprep.subr.mxu0 %v1505_v18  ;;  %v1655_v18 = vld [vmem:[%s6643_s2 + $0x10e8] sm:$0xff] }
 0x112   :  { %1890 = vmatpush1.msra.mxu0 %v1504_v19  ;;  %v1570_v19 = vld [vmem:[%s6643_s2 + $0xe40] sm:$0xff] }
 0x113   :  { %1891 = vmatprep.subr.mxu0 %v1500_v20  ;;  %v1654_v20 = vld [vmem:[%s6643_s2 + $0x10e0] sm:$0xff] }
 0x114   :  { %1892 = vmatpush1.msra.mxu0 %v1499_v10  ;;  %v1569_v10 = vld [vmem:[%s6643_s2 + $0xe38] sm:$0xff] }
 0x115   :  { %1893 = vmatprep.subr.mxu0 %v1495_v11  ;;  %v1650_v11 = vld [vmem:[%s6643_s2 + $0x10c0] sm:$0xff] }
 0x116   :  { %1894 = vmatpush1.msra.mxu0 %v1494_v14  ;;  %v1565_v14 = vld [vmem:[%s6643_s2 + $0xe18] sm:$0xff] }
 0x117   :  { %1895 = vmatprep.subr.mxu0 %v1490_v17  ;;  %v1649_v17 = vld [vmem:[%s6643_s2 + $0x10b8] sm:$0xff] }
 0x118   :  { %1896 = vmatpush1.msra.mxu0 %v1489_v21  ;;  %v1564_v21 = vld [vmem:[%s6643_s2 + $0xe10] sm:$0xff] }
 0x119   :  { %1897 = vmatprep.subr.mxu0 %v1485_v22  ;;  %v1645_v22 = vld [vmem:[%s6643_s2 + $0x1098] sm:$0xff] }
 0x11a   :  { %1898 = vmatpush1.msra.mxu0 %v1484_v23  ;;  %v1560_v23 = vld [vmem:[%s6643_s2 + $0xdf0] sm:$0xff] }
 0x11b   :  { %1899 = vmatprep.subr.mxu0 %v1480_v25  ;;  %v1644_v25 = vld [vmem:[%s6643_s2 + $0x1090] sm:$0xff] }
 0x11c   :  { %1900 = vmatpush1.msra.mxu0 %v1479_v27  ;;  %v1559_v27 = vld [vmem:[%s6643_s2 + $0xde8] sm:$0xff] }
 0x11d   :  { %1901 = vmatprep.subr.mxu0 %v1475_v28  ;;  %v1640_v28 = vld [vmem:[%s6643_s2 + $0x1070] sm:$0xff] }
 0x11e   :  { %1902 = vmatpush1.msra.mxu0 %v1474_v58  ;;  %v1555_v58 = vld [vmem:[%s6643_s2 + $0xdc8] sm:$0xff] }
 0x11f   :  { %1903 = vmatprep.subr.mxu0 %v1470_v29  ;;  %v1639_v29 = vld [vmem:[%s6643_s2 + $0x1068] sm:$0xff] }
 0x120   :  { %1904 = vmatpush1.msra.mxu0 %v1469_v32  ;;  %v1554_v32 = vld [vmem:[%s6643_s2 + $0xdc0] sm:$0xff] }
 0x121   :  { %1905 = vmatprep.subr.mxu0 %v1465_v33  ;;  %v1635_v33 = vld [vmem:[%s6643_s2 + $0x1048] sm:$0xff] }
 0x122   :  { %1906 = vmatpush1.msra.mxu0 %v1464_v36  ;;  %v1550_v36 = vld [vmem:[%s6643_s2 + $0xda0] sm:$0xff] }
 0x123   :  { %1907 = vmatprep.subr.mxu0 %v1460_v38  ;;  %v1634_v38 = vld [vmem:[%s6643_s2 + $0x1040] sm:$0xff] }
 0x124   :  { %1908 = vmatpush1.msra.mxu0 %v1459_v40  ;;  %v1549_v40 = vld [vmem:[%s6643_s2 + $0xd98] sm:$0xff] }
 0x125   :  { %1909 = vmatprep.subr.mxu0 %v1455_v24  ;;  %v1630_v24 = vld [vmem:[%s6643_s2 + $0x1020] sm:$0xff] }
 0x126   :  { %1910 = vmatpush1.msra.mxu0 %v1454_v43  ;;  %v1629_v43 = vld [vmem:[%s6643_s2 + $0x1018] sm:$0xff] }
 0x127   :  { %v746_v49 = vpop.f32.mrf.mxu1  ;;  %1911 = vmatprep.subr.mxu0 %v1450_v45  ;;  %v1544_v45 = vld [vmem:[%s6643_s2 + $0xd70] sm:$0xff] }
 0x128   :  { %v747_v51 = vadd.f32 %v746_v49, %v431_v41  ;;  %1912 = vmatpush1.msra.mxu0 %v1449_v48  ;;  %v1545_v41 = vld [vmem:[%s6643_s2 + $0xd78] sm:$0xff]  ;;  %v1540_v48 = vld [vmem:[%s6643_s2 + $0xd50] sm:$0xff] }
 0x129   :  { %v817_v53 = vpop.f32.mrf.mxu0  ;;  %v748_v54 = vpop.f32.mrf.mxu1  ;;  %1913 = vmatprep.subr.mxu0 %v1445_v50  ;;  %v1624_v49 = vld [vmem:[%s6643_s2 + $0xff0] sm:$0xff]  ;;  %v1539_v50 = vld [vmem:[%s6643_s2 + $0xd48] sm:$0xff] }
 0x12a   :  { %v749_v56 = vadd.f32 %v748_v54, %v435_v46  ;;  %v818_v59 = vadd.f32 %v817_v53, %v747_v51  ;;  %1914 = vmatpush1.msra.mxu0 %v1444_v52  ;;  %v1625_v46 = vld [vmem:[%s6643_s2 + $0xff8] sm:$0xff]  ;;  %v1620_v51 = vld [vmem:[%s6643_s2 + $0xfd0] sm:$0xff]  ;;  %v1535_v52 = vld [vmem:[%s6643_s2 + $0xd28] sm:$0xff] }
 0x12b   :  { %v819_v60 = vpop.f32.mrf.mxu0  ;;  %1915 = vmatprep.subr.mxu0 %v1440_v55  ;;  %v1619_v53 = vld [vmem:[%s6643_s2 + $0xfc8] sm:$0xff]  ;;  %v1534_v54 = vld [vmem:[%s6643_s2 + $0xd20] sm:$0xff] }
 0x12c   :  { %v820_v62 = vadd.f32 %v819_v60, %v749_v56  ;;  %1916 = vmatpush1.msra.mxu0 %v1439_v57  ;;  %v4977_v31 = vmax.f32 %v818_v59, 0.0  ;;  %v1615_v55 = vld [vmem:[%s6643_s2 + $0xfa8] sm:$0xff]  ;;  %v1530_v56 = vld [vmem:[%s6643_s2 + $0xd00] sm:$0xff]  ;;  %v1529_v59 = vld [vmem:[%s6643_s2 + $0xcf8] sm:$0xff] }
 0x12d   :  { %1917 = vmatprep.subr.mxu0 %v1435_v61  ;;  %v1614_v57 = vld [vmem:[%s6643_s2 + $0xfa0] sm:$0xff]  ;;  %v1525_v61 = vld [vmem:[%s6643_s2 + $0xcd8] sm:$0xff] }
 0x12e   :  { %v4972_v0 = vmax.f32 %v820_v62, 0.0  ;;  %1918 = vmatpush1.msra.mxu0 %v1434_v35  ;;  %v1610_v60 = vld [vmem:[%s6643_s2 + $0xf80] sm:$0xff]  ;;  %v1609_v62 = vld [vmem:[%s6643_s2 + $0xf78] sm:$0xff]  ;;  %v1524_v35 = vld [vmem:[%s6643_s2 + $0xcd0] sm:$0xff] }
 0x12f   :  { %1919 = vmatprep.subr.mxu0 %v1590_v63  ;;  %v1605_v63 = vld [vmem:[%s6643_s2 + $0xf58] sm:$0xff] }
 0x130   :  { %1880 = vmatprep.mubr.f32.mxu1 %v4972_v0  ;;  %1920 = vmatpush2.msra.mxu0 %v1589_v37  ;;  %v1520_v37 = vld [vmem:[%s6643_s2 + $0xcb0] sm:$0xff] }
 0x131   :  { %1881 = vmatmul.mubr.f32.vlgmr.msra.gmra.mxu1 %v4977_v31  ;;  %1921 = vmatprep.subr.mxu0 %v1585_v1  ;;  %v1604_v1 = vld [vmem:[%s6643_s2 + $0xf50] sm:$0xff] }
 0x132   :  { %1959 = vmatpush1.msra.mxu1 %v1669_v2  ;;  %1922 = vmatpush2.msra.mxu0 %v1584_v3  ;;  %v1519_v2 = vld [vmem:[%s6643_s2 + $0xca8] sm:$0xff]  ;;  %v1600_v3 = vld [vmem:[%s6643_s2 + $0xf30] sm:$0xff] }
 0x133   :  { %1960 = vmatprep.subr.mxu1 %v1665_v4  ;;  %1923 = vmatprep.subr.mxu0 %v1580_v5  ;;  %v1515_v4 = vld [vmem:[%s6643_s2 + $0xc88] sm:$0xff] }
 0x134   :  { %1961 = vmatpush1.msra.mxu1 %v1664_v6  ;;  %1924 = vmatpush2.msra.mxu0 %v1579_v7  ;;  %v1599_v5 = vld [vmem:[%s6643_s2 + $0xf28] sm:$0xff]  ;;  %v1514_v6 = vld [vmem:[%s6643_s2 + $0xc80] sm:$0xff] }
 0x135   :  { %1962 = vmatprep.subr.mxu1 %v1660_v8  ;;  %1925 = vmatprep.subr.mxu0 %v1575_v9  ;;  %v1595_v7 = vld [vmem:[%s6643_s2 + $0xf08] sm:$0xff]  ;;  %v1352_v8 = vld [vmem:[%s6643_s2 + $0x770] sm:$0xff]  ;;  %v1594_v9 = vld [vmem:[%s6643_s2 + $0xf00] sm:$0xff] }
 0x136   :  { %1963 = vmatpush1.msra.mxu1 %v1659_v12  ;;  %1926 = vmatpush2.msra.mxu0 %v1574_v16  ;;  %v1710_v12 = vld [vmem:[%s6643_s2 + $0x12a0] sm:$0xff]  ;;  %v1709_v16 = vld [vmem:[%s6643_s2 + $0x1298] sm:$0xff] }
 0x137   :  { %1964 = vmatprep.subr.mxu1 %v1655_v18  ;;  %1927 = vmatprep.subr.mxu0 %v1570_v19  ;;  %v1705_v18 = vld [vmem:[%s6643_s2 + $0x1278] sm:$0xff]  ;;  %v1704_v19 = vld [vmem:[%s6643_s2 + $0x1270] sm:$0xff] }
 0x138   :  { %1965 = vmatpush1.msra.mxu1 %v1654_v20  ;;  %1928 = vmatpush2.msra.mxu0 %v1569_v10  ;;  %v1700_v20 = vld [vmem:[%s6643_s2 + $0x1250] sm:$0xff]  ;;  %v1699_v10 = vld [vmem:[%s6643_s2 + $0x1248] sm:$0xff] }
 0x139   :  { %1966 = vmatprep.subr.mxu1 %v1650_v11  ;;  %1929 = vmatprep.subr.mxu0 %v1565_v14  ;;  %v1695_v11 = vld [vmem:[%s6643_s2 + $0x1228] sm:$0xff]  ;;  %v1694_v14 = vld [vmem:[%s6643_s2 + $0x1220] sm:$0xff] }
 0x13a   :  { %1967 = vmatpush1.msra.mxu1 %v1649_v17  ;;  %1930 = vmatpush2.msra.mxu0 %v1564_v21  ;;  %v1690_v17 = vld [vmem:[%s6643_s2 + $0x1200] sm:$0xff]  ;;  %v1689_v21 = vld [vmem:[%s6643_s2 + $0x11f8] sm:$0xff] }
 0x13b   :  { %1968 = vmatprep.subr.mxu1 %v1645_v22  ;;  %1931 = vmatprep.subr.mxu0 %v1560_v23  ;;  %v1685_v22 = vld [vmem:[%s6643_s2 + $0x11d8] sm:$0xff]  ;;  %v1684_v23 = vld [vmem:[%s6643_s2 + $0x11d0] sm:$0xff] }
 0x13c   :  { %1969 = vmatpush1.msra.mxu1 %v1644_v25  ;;  %1932 = vmatpush2.msra.mxu0 %v1559_v27  ;;  %v1680_v25 = vld [vmem:[%s6643_s2 + $0x11b0] sm:$0xff]  ;;  %v1679_v27 = vld [vmem:[%s6643_s2 + $0x11a8] sm:$0xff] }
 0x13d   :  { %1970 = vmatprep.subr.mxu1 %v1640_v28  ;;  %1933 = vmatprep.subr.mxu0 %v1555_v58  ;;  %v1675_v28 = vld [vmem:[%s6643_s2 + $0x1188] sm:$0xff]  ;;  %v1674_v58 = vld [vmem:[%s6643_s2 + $0x1180] sm:$0xff] }
 0x13e   :  { %1971 = vmatpush1.msra.mxu1 %v1639_v29  ;;  %1934 = vmatpush2.msra.mxu0 %v1554_v32  ;;  %v1192_v29 = vld [vmem:[%s6643_s2 + $0x270] sm:$0xff]  ;;  %v438_v32 = vsub.s32 4, %v3347_v44 }
 0x13f   :  { %1972 = vmatprep.subr.mxu1 %v1635_v33  ;;  %1935 = vmatprep.subr.mxu0 %v1550_v36  ;;  %v442_v33 = vsub.s32 5, %v3347_v44 }
 0x140   :  { %1973 = vmatpush1.msra.mxu1 %v1634_v38  ;;  %1936 = vmatpush2.msra.mxu0 %v1549_v40  ;;  %v439_v36 = vrot.slane %v4787_v42, %v438_v32 }
 0x141   :  { %1974 = vmatprep.subr.mxu1 %v1630_v24  ;;  %1937 = vmatprep.subr.mxu0 %v1545_v41  ;;  %v443_v38 = vrot.slane %v4787_v42, %v442_v33 }
 0x142   :  { %1975 = vmatpush1.msra.mxu1 %v1629_v43  ;;  %1938 = vmatpush2.msra.mxu0 %v1544_v45 }
 0x143   :  { %1976 = vmatprep.subr.mxu1 %v1625_v46  ;;  %1939 = vmatprep.subr.mxu0 %v1540_v48 }
 0x144   :  { %1977 = vmatpush1.msra.mxu1 %v1624_v49  ;;  %1940 = vmatpush2.msra.mxu0 %v1539_v50 }
 0x145   :  { %1978 = vmatprep.subr.mxu1 %v1620_v51  ;;  %1941 = vmatprep.subr.mxu0 %v1535_v52  ;;  %v1351_v52 = vld [vmem:[%s6643_s2 + $0x768] sm:$0xff] }
 0x146   :  { %1979 = vmatpush1.msra.mxu1 %v1619_v53  ;;  %1942 = vmatpush2.msra.mxu0 %v1534_v54  ;;  %v1347_v53 = vld [vmem:[%s6643_s2 + $0x748] sm:$0xff]  ;;  %v1346_v54 = vld [vmem:[%s6643_s2 + $0x740] sm:$0xff] }
 0x147   :  { %1980 = vmatprep.subr.mxu1 %v1615_v55  ;;  %1943 = vmatprep.subr.mxu0 %v1530_v56  ;;  %v1342_v55 = vld [vmem:[%s6643_s2 + $0x720] sm:$0xff]  ;;  %v1341_v56 = vld [vmem:[%s6643_s2 + $0x718] sm:$0xff] }
 0x148   :  { %1981 = vmatpush1.msra.mxu1 %v1614_v57  ;;  %1944 = vmatpush2.msra.mxu0 %v1529_v59  ;;  %v1337_v57 = vld [vmem:[%s6643_s2 + $0x6f8] sm:$0xff]  ;;  %v1336_v59 = vld [vmem:[%s6643_s2 + $0x6f0] sm:$0xff] }
 0x149   :  { %1982 = vmatprep.subr.mxu1 %v1610_v60  ;;  %1945 = vmatprep.subr.mxu0 %v1525_v61  ;;  %v959_v40 = vpop.f32.mrf.mxu1  ;;  %v1332_v60 = vld [vmem:[%s6643_s2 + $0x6d0] sm:$0xff]  ;;  %v1331_v61 = vld [vmem:[%s6643_s2 + $0x6c8] sm:$0xff] }
 0x14a   :  { %1983 = vmatpush1.msra.mxu1 %v1609_v62  ;;  %1946 = vmatpush2.msra.mxu0 %v1524_v35  ;;  %v1327_v62 = vld [vmem:[%s6643_s2 + $0x6a8] sm:$0xff]  ;;  %v1326_v35 = vld [vmem:[%s6643_s2 + $0x6a0] sm:$0xff] }
 0x14b   :  { %1984 = vmatprep.subr.mxu1 %v1605_v63  ;;  %1947 = vmatprep.subr.mxu0 %v1520_v37  ;;  %v961_v46 = vpop.f32.mrf.mxu1  ;;  %v1322_v63 = vld [vmem:[%s6643_s2 + $0x680] sm:$0xff]  ;;  %v1321_v37 = vld [vmem:[%s6643_s2 + $0x678] sm:$0xff] }
 0x14c   :  { %1985 = vmatpush1.msra.mxu1 %v1604_v1  ;;  %1948 = vmatpush2.msra.mxu0 %v1519_v2  ;;  %v1317_v1 = vld [vmem:[%s6643_s2 + $0x658] sm:$0xff]  ;;  %v1316_v2 = vld [vmem:[%s6643_s2 + $0x650] sm:$0xff] }
 0x14d   :  { %1986 = vmatprep.subr.mxu1 %v1600_v3  ;;  %1949 = vmatprep.subr.mxu0 %v1515_v4  ;;  %v1312_v3 = vld [vmem:[%s6643_s2 + $0x630] sm:$0xff]  ;;  %v1311_v4 = vld [vmem:[%s6643_s2 + $0x628] sm:$0xff] }
 0x14e   :  { %1987 = vmatpush1.msra.mxu1 %v1599_v5  ;;  %1950 = vmatpush2.msra.mxu0 %v1514_v6  ;;  %v1307_v5 = vld [vmem:[%s6643_s2 + $0x608] sm:$0xff]  ;;  %v1306_v6 = vld [vmem:[%s6643_s2 + $0x600] sm:$0xff] }
 0x14f   :  { %1988 = vmatprep.subr.mxu1 %v1595_v7  ;;  %2100 = vmatprep.subr.mxu0 %v1352_v8  ;;  %v1302_v7 = vld [vmem:[%s6643_s2 + $0x5e0] sm:$0xff]  ;;  %v446_v8 = vsub.s32 6, %v3347_v44 }
 0x150   :  { %1989 = vmatpush1.msra.mxu1 %v1594_v9  ;;  %v1301_v9 = vld [vmem:[%s6643_s2 + $0x5d8] sm:$0xff] }
 0x151   :  { %2006 = vmatprep.subr.mxu1 %v1710_v12  ;;  %v1297_v12 = vld [vmem:[%s6643_s2 + $0x5b8] sm:$0xff] }
 0x152   :  { %2007 = vmatpush2.msra.mxu1 %v1709_v16  ;;  %v450_v16 = vsub.s32 7, %v3347_v44 }
 0x153   :  { %2008 = vmatprep.subr.mxu1 %v1705_v18  ;;  %v1296_v18 = vld [vmem:[%s6643_s2 + $0x5b0] sm:$0xff] }
 0x154   :  { %2009 = vmatpush2.msra.mxu1 %v1704_v19  ;;  %v447_v19 = vrot.slane %v4787_v42, %v446_v8  ;;  %v1161_v8 = vld [vmem:[%s6643_s2 + $0x178] sm:$0xff] }
 0x155   :  { %2010 = vmatprep.subr.mxu1 %v1700_v20  ;;  %v1292_v20 = vld [vmem:[%s6643_s2 + $0x590] sm:$0xff] }
 0x156   :  { %2011 = vmatpush2.msra.mxu1 %v1699_v10  ;;  %v1291_v10 = vld [vmem:[%s6643_s2 + $0x588] sm:$0xff] }
 0x157   :  { %2012 = vmatprep.subr.mxu1 %v1695_v11  ;;  %v451_v11 = vrot.slane %v4787_v42, %v450_v16  ;;  %v1281_v42 = vld [vmem:[%s6643_s2 + $0x538] sm:$0xff]  ;;  %v1396_v16 = vld [vmem:[%s6643_s2 + $0x8d0] sm:$0xff] }
 0x158   :  { %2013 = vmatpush2.msra.mxu1 %v1694_v14  ;;  %v1287_v14 = vld [vmem:[%s6643_s2 + $0x568] sm:$0xff] }
 0x159   :  { %2014 = vmatprep.subr.mxu1 %v1690_v17 }
 0x15a   :  { %2015 = vmatpush2.msra.mxu1 %v1689_v21 }
 0x15b   :  { %2016 = vmatprep.subr.mxu1 %v1685_v22  ;;  %v1286_v22 = vld [vmem:[%s6643_s2 + $0x560] sm:$0xff] }
 0x15c   :  { %2017 = vmatpush2.msra.mxu1 %v1684_v23 }
 0x15d   :  { %2018 = vmatprep.subr.mxu1 %v1680_v25  ;;  %v1282_v25 = vld [vmem:[%s6643_s2 + $0x540] sm:$0xff] }
 0x15e   :  { %2019 = vmatpush2.msra.mxu1 %v1679_v27 }
 0x15f   :  { %2020 = vmatprep.subr.mxu1 %v1675_v28 }
 0x160   :  { %2021 = vmatpush2.msra.mxu1 %v1674_v58  ;;  %v1277_v58 = vld [vmem:[%s6643_s2 + $0x518] sm:$0xff] }
 0x161   :  { %2029 = vmatprep.subr.mxu1 %v1192_v29 }
 0x16a   :  { %v888_v24 = vpop.f32.mrf.mxu0 }
 0x16b   :  { %v889_v41 = vadd.f32 %v888_v24, %v439_v36  ;;  %v1276_v36 = vld [vmem:[%s6643_s2 + $0x510] sm:$0xff]  ;;  %v1431_v24 = vld [vmem:[%s6643_s2 + $0x9e8] sm:$0xff] }
 0x16c   :  { %v890_v43 = vpop.f32.mrf.mxu0 }
 0x16d   :  { %v891_v45 = vadd.f32 %v890_v43, %v443_v38  ;;  %v960_v48 = vadd.f32 %v959_v40, %v889_v41  ;;  %v1432_v40 = vld [vmem:[%s6643_s2 + $0x9f0] sm:$0xff]  ;;  %v1427_v43 = vld [vmem:[%s6643_s2 + $0x9c8] sm:$0xff] }
 0x16f   :  { %v962_v49 = vadd.f32 %v961_v46, %v891_v45  ;;  %v5226_v51 = vmax.f32 %v960_v48, 0.0  ;;  %v1191_v46 = vld [vmem:[%s6643_s2 + $0x268] sm:$0xff] }
 0x170   :  { %v1187_v48 = vld [vmem:[%s6643_s2 + $0x248] sm:$0xff] }
 0x171   :  { %v5224_v50 = vmax.f32 %v962_v49, 0.0  ;;  %v1426_v49 = vld [vmem:[%s6643_s2 + $0x9c0] sm:$0xff] }
 0x173   :  { %1951 = vmatprep.mubr.f32.mxu0 %v5224_v50 }
 0x174   :  { %1952 = vmatmul.mubr.f32.vlgmr.msra.gmra.mxu0 %v5226_v51 }
 0x175   :  { %2101 = vmatpush1.msra.mxu0 %v1351_v52  ;;  %2164 = vmatprep.mubr.f32.mxu0 %v4972_v0  ;;  %v1186_v52 = vld [vmem:[%s6643_s2 + $0x240] sm:$0xff] }
 0x176   :  { %2102 = vmatprep.subr.mxu0 %v1347_v53  ;;  %v1422_v53 = vld [vmem:[%s6643_s2 + $0x9a0] sm:$0xff] }
 0x177   :  { %2103 = vmatpush1.msra.mxu0 %v1346_v54  ;;  %v1182_v54 = vld [vmem:[%s6643_s2 + $0x220] sm:$0xff] }
 0x178   :  { %2104 = vmatprep.subr.mxu0 %v1342_v55  ;;  %v1421_v55 = vld [vmem:[%s6643_s2 + $0x998] sm:$0xff] }
 0x179   :  { %2105 = vmatpush1.msra.mxu0 %v1341_v56  ;;  %v1181_v56 = vld [vmem:[%s6643_s2 + $0x218] sm:$0xff] }
 0x17a   :  { %2106 = vmatprep.subr.mxu0 %v1337_v57  ;;  %v1417_v57 = vld [vmem:[%s6643_s2 + $0x978] sm:$0xff] }
 0x17b   :  { %2107 = vmatpush1.msra.mxu0 %v1336_v59  ;;  %v1177_v59 = vld [vmem:[%s6643_s2 + $0x1f8] sm:$0xff] }
 0x17c   :  { %2108 = vmatprep.subr.mxu0 %v1332_v60  ;;  %v1416_v60 = vld [vmem:[%s6643_s2 + $0x970] sm:$0xff] }
 0x17d   :  { %2109 = vmatpush1.msra.mxu0 %v1331_v61  ;;  %v1176_v61 = vld [vmem:[%s6643_s2 + $0x1f0] sm:$0xff] }
 0x17e   :  { %2110 = vmatprep.subr.mxu0 %v1327_v62  ;;  %v1412_v62 = vld [vmem:[%s6643_s2 + $0x950] sm:$0xff] }
 0x17f   :  { %2111 = vmatpush1.msra.mxu0 %v1326_v35  ;;  %v1172_v35 = vld [vmem:[%s6643_s2 + $0x1d0] sm:$0xff] }
 0x180   :  { %2112 = vmatprep.subr.mxu0 %v1322_v63  ;;  %v1411_v63 = vld [vmem:[%s6643_s2 + $0x948] sm:$0xff] }
 0x181   :  { %2113 = vmatpush1.msra.mxu0 %v1321_v37  ;;  %v1171_v37 = vld [vmem:[%s6643_s2 + $0x1c8] sm:$0xff] }
 0x182   :  { %2114 = vmatprep.subr.mxu0 %v1317_v1  ;;  %v1407_v1 = vld [vmem:[%s6643_s2 + $0x928] sm:$0xff] }
 0x183   :  { %2115 = vmatpush1.msra.mxu0 %v1316_v2  ;;  %v1167_v2 = vld [vmem:[%s6643_s2 + $0x1a8] sm:$0xff] }
 0x184   :  { %2116 = vmatprep.subr.mxu0 %v1312_v3  ;;  %v1406_v3 = vld [vmem:[%s6643_s2 + $0x920] sm:$0xff] }
 0x185   :  { %2117 = vmatpush1.msra.mxu0 %v1311_v4  ;;  %v1166_v4 = vld [vmem:[%s6643_s2 + $0x1a0] sm:$0xff] }
 0x186   :  { %2118 = vmatprep.subr.mxu0 %v1307_v5  ;;  %v1402_v5 = vld [vmem:[%s6643_s2 + $0x900] sm:$0xff] }
 0x187   :  { %2119 = vmatpush1.msra.mxu0 %v1306_v6  ;;  %v1162_v6 = vld [vmem:[%s6643_s2 + $0x180] sm:$0xff] }
 0x188   :  { %2120 = vmatprep.subr.mxu0 %v1302_v7  ;;  %v1401_v7 = vld [vmem:[%s6643_s2 + $0x8f8] sm:$0xff] }
 0x189   :  { %2121 = vmatpush1.msra.mxu0 %v1301_v9  ;;  %v1397_v9 = vld [vmem:[%s6643_s2 + $0x8d8] sm:$0xff] }
 0x18a   :  { %2122 = vmatprep.subr.mxu0 %v1297_v12  ;;  %v1157_v12 = vld [vmem:[%s6643_s2 + $0x158] sm:$0xff] }
 0x18b   :  { %2123 = vmatpush1.msra.mxu0 %v1296_v18  ;;  %v1030_v17 = vpop.f32.mrf.mxu1  ;;  %v1156_v18 = vld [vmem:[%s6643_s2 + $0x150] sm:$0xff] }
 0x18c   :  { %v1101_v21 = vpop.f32.mrf.mxu0  ;;  %2124 = vmatprep.subr.mxu0 %v1292_v20  ;;  %v1031_v23 = vadd.f32 %v1030_v17, %v447_v19  ;;  %v1392_v19 = vld [vmem:[%s6643_s2 + $0x8b0] sm:$0xff]  ;;  %v1147_v17 = vld [vmem:[%s6643_s2 + $0x108] sm:$0xff] }
 0x18d   :  { %2125 = vmatpush1.msra.mxu0 %v1291_v10  ;;  %v1032_v27 = vpop.f32.mrf.mxu1  ;;  %v1152_v20 = vld [vmem:[%s6643_s2 + $0x130] sm:$0xff]  ;;  %v1391_v10 = vld [vmem:[%s6643_s2 + $0x8a8] sm:$0xff] }
 0x18e   :  { %2126 = vmatprep.subr.mxu0 %v1287_v14  ;;  %v1033_v28 = vadd.f32 %v1032_v27, %v451_v11  ;;  %v1102_v29 = vadd.f32 %v1101_v21, %v1031_v23  ;;  %v1103_v33 = vpop.f32.mrf.mxu0  ;;  %v1151_v11 = vld [vmem:[%s6643_s2 + $0x128] sm:$0xff]  ;;  %v1386_v21 = vld [vmem:[%s6643_s2 + $0x880] sm:$0xff]  ;;  %v1381_v27 = vld [vmem:[%s6643_s2 + $0x858] sm:$0xff] }
 0x18f   :  { %2127 = vmatpush1.msra.mxu0 %v1286_v22  ;;  %v1387_v14 = vld [vmem:[%s6643_s2 + $0x888] sm:$0xff]  ;;  %v1146_v22 = vld [vmem:[%s6643_s2 + $0x100] sm:$0xff] }
 0x190   :  { %2128 = vmatprep.subr.mxu0 %v1282_v25  ;;  %v1104_v38 = vadd.f32 %v1103_v33, %v1033_v28  ;;  %v5339_v45 = vmax.f32 %v1102_v29, 0.0  ;;  %v1382_v23 = vld [vmem:[%s6643_s2 + $0x860] sm:$0xff]  ;;  %v1377_v28 = vld [vmem:[%s6643_s2 + $0x838] sm:$0xff]  ;;  %v1376_v29 = vld [vmem:[%s6643_s2 + $0x830] sm:$0xff] }
 0x191   :  { %2129 = vmatpush1.msra.mxu0 %v1281_v42  ;;  %v1142_v25 = vld [vmem:[%s6643_s2 + $0xe0] sm:$0xff]  ;;  %v1141_v42 = vld [vmem:[%s6643_s2 + $0xd8] sm:$0xff]  ;;  %v1136_v33 = vld [vmem:[%s6643_s2 + $0xb0] sm:$0xff] }
 0x192   :  { %2130 = vmatprep.subr.mxu0 %v1277_v58  ;;  %v5334_v41 = vmax.f32 %v1104_v38, 0.0  ;;  %v1137_v58 = vld [vmem:[%s6643_s2 + $0xb8] sm:$0xff]  ;;  %v1132_v38 = vld [vmem:[%s6643_s2 + $0x90] sm:$0xff] }
 0x193   :  { %2131 = vmatpush1.msra.mxu0 %v1276_v36  ;;  %v1372_v36 = vld [vmem:[%s6643_s2 + $0x810] sm:$0xff] }
 0x194   :  { %2132 = vmatprep.subr.mxu0 %v1432_v40  ;;  %2943 = vmatprep.mubr.msk.f32.mxu1 %vm1741_vm0, %v5334_v41  ;;  %v1371_v40 = vld [vmem:[%s6643_s2 + $0x808] sm:$0xff] }
 0x195   :  { %2133 = vmatpush2.msra.mxu0 %v1431_v24  ;;  %2023 = vmatmul.mubr.f32.vlgmr.msra.gmra.mxu1 %v5339_v45  ;;  %v1131_v24 = vld [vmem:[%s6643_s2 + $0x88] sm:$0xff] }
 0x196   :  { %2134 = vmatprep.subr.mxu0 %v1427_v43  ;;  %2030 = vmatpush1.msra.mxu1 %v1191_v46  ;;  %v1367_v43 = vld [vmem:[%s6643_s2 + $0x7e8] sm:$0xff] }
 0x197   :  { %2093 = vmatprep.mubr.f32.mxu1 %v4862_v13  ;;  %2031 = vmatprep.subr.mxu1 %v1187_v48  ;;  %v1127_v46 = vld [vmem:[%s6643_s2 + $0x68] sm:$0xff]  ;;  %v1366_v48 = vld [vmem:[%s6643_s2 + $0x7e0] sm:$0xff] }
 0x198   :  { %2135 = vmatpush2.msra.mxu0 %v1426_v49  ;;  %2032 = vmatpush1.msra.mxu1 %v1186_v52  ;;  %v1126_v49 = vld [vmem:[%s6643_s2 + $0x60] sm:$0xff] }
 0x199   :  { %2136 = vmatprep.subr.mxu0 %v1422_v53  ;;  %2033 = vmatprep.subr.mxu1 %v1182_v54  ;;  %v1362_v52 = vld [vmem:[%s6643_s2 + $0x7c0] sm:$0xff]  ;;  %v1361_v54 = vld [vmem:[%s6643_s2 + $0x7b8] sm:$0xff] }
 0x19a   :  { %2137 = vmatpush2.msra.mxu0 %v1421_v55  ;;  %2034 = vmatpush1.msra.mxu1 %v1181_v56  ;;  %v1122_v53 = vld [vmem:[%s6643_s2 + $0x40] sm:$0xff]  ;;  %v1121_v55 = vld [vmem:[%s6643_s2 + $0x38] sm:$0xff] }
 0x19b   :  { %2138 = vmatprep.subr.mxu0 %v1417_v57  ;;  %2035 = vmatprep.subr.mxu1 %v1177_v59  ;;  %v1357_v56 = vld [vmem:[%s6643_s2 + $0x798] sm:$0xff]  ;;  %v1356_v59 = vld [vmem:[%s6643_s2 + $0x790] sm:$0xff] }
 0x19c   :  { %2139 = vmatpush2.msra.mxu0 %v1416_v60  ;;  %2036 = vmatpush1.msra.mxu1 %v1176_v61  ;;  %v1117_v57 = vld [vmem:[%s6643_s2 + $0x18] sm:$0xff]  ;;  %v1116_v60 = vld [vmem:[%s6643_s2 + $0x10] sm:$0xff] }
 0x19d   :  { %2140 = vmatprep.subr.mxu0 %v1412_v62  ;;  %2037 = vmatprep.subr.mxu1 %v1172_v35  ;;  %v1272_v61 = vld [vmem:[%s6643_s2 + $0x4f0] sm:$0xff]  ;;  %v1271_v35 = vld [vmem:[%s6643_s2 + $0x4e8] sm:$0xff] }
 0x19e   :  { %2141 = vmatpush2.msra.mxu0 %v1411_v63  ;;  %2038 = vmatpush1.msra.mxu1 %v1171_v37  ;;  %v1672_v62 = vld [vmem:[%s6643_s2 + $0x1170] sm:$0xff]  ;;  %v1671_v63 = vld [vmem:[%s6643_s2 + $0x1168] sm:$0xff] }
 0x19f   :  { %2142 = vmatprep.subr.mxu0 %v1407_v1  ;;  %2039 = vmatprep.subr.mxu1 %v1167_v2  ;;  %v1267_v37 = vld [vmem:[%s6643_s2 + $0x4c8] sm:$0xff]  ;;  %v1266_v2 = vld [vmem:[%s6643_s2 + $0x4c0] sm:$0xff] }
 0x1a0   :  { %2143 = vmatpush2.msra.mxu0 %v1406_v3  ;;  %2040 = vmatpush1.msra.mxu1 %v1166_v4  ;;  %v1667_v1 = vld [vmem:[%s6643_s2 + $0x1148] sm:$0xff]  ;;  %v1666_v3 = vld [vmem:[%s6643_s2 + $0x1140] sm:$0xff] }
 0x1a1   :  { %2144 = vmatprep.subr.mxu0 %v1402_v5  ;;  %2041 = vmatprep.subr.mxu1 %v1162_v6  ;;  %v1262_v4 = vld [vmem:[%s6643_s2 + $0x4a0] sm:$0xff]  ;;  %v1261_v6 = vld [vmem:[%s6643_s2 + $0x498] sm:$0xff] }
 0x1a2   :  { %2145 = vmatpush2.msra.mxu0 %v1401_v7  ;;  %2042 = vmatpush1.msra.mxu1 %v1161_v8  ;;  %v1662_v5 = vld [vmem:[%s6643_s2 + $0x1120] sm:$0xff]  ;;  %v1661_v7 = vld [vmem:[%s6643_s2 + $0x1118] sm:$0xff] }
 0x1a3   :  { %2146 = vmatprep.subr.mxu0 %v1397_v9  ;;  %2043 = vmatprep.subr.mxu1 %v1157_v12  ;;  %v1257_v8 = vld [vmem:[%s6643_s2 + $0x478] sm:$0xff]  ;;  %v1256_v12 = vld [vmem:[%s6643_s2 + $0x470] sm:$0xff] }
 0x1a4   :  { %2147 = vmatpush2.msra.mxu0 %v1396_v16  ;;  %2044 = vmatpush1.msra.mxu1 %v1156_v18  ;;  %v1657_v9 = vld [vmem:[%s6643_s2 + $0x10f8] sm:$0xff]  ;;  %v1656_v16 = vld [vmem:[%s6643_s2 + $0x10f0] sm:$0xff] }
 0x1a5   :  { %2148 = vmatprep.subr.mxu0 %v1392_v19  ;;  %2045 = vmatprep.subr.mxu1 %v1152_v20  ;;  %v1252_v18 = vld [vmem:[%s6643_s2 + $0x450] sm:$0xff]  ;;  %v1251_v20 = vld [vmem:[%s6643_s2 + $0x448] sm:$0xff] }
 0x1a6   :  { %2149 = vmatpush2.msra.mxu0 %v1391_v10  ;;  %2046 = vmatpush1.msra.mxu1 %v1151_v11  ;;  %v1652_v19 = vld [vmem:[%s6643_s2 + $0x10d0] sm:$0xff]  ;;  %v1651_v10 = vld [vmem:[%s6643_s2 + $0x10c8] sm:$0xff] }
 0x1a7   :  { %2150 = vmatprep.subr.mxu0 %v1387_v14  ;;  %2047 = vmatprep.subr.mxu1 %v1147_v17  ;;  %v1247_v11 = vld [vmem:[%s6643_s2 + $0x428] sm:$0xff]  ;;  %v1246_v17 = vld [vmem:[%s6643_s2 + $0x420] sm:$0xff] }
 0x1a8   :  { %2151 = vmatpush2.msra.mxu0 %v1386_v21  ;;  %2048 = vmatpush1.msra.mxu1 %v1146_v22  ;;  %v1647_v14 = vld [vmem:[%s6643_s2 + $0x10a8] sm:$0xff]  ;;  %v1646_v21 = vld [vmem:[%s6643_s2 + $0x10a0] sm:$0xff] }
 0x1a9   :  { %2152 = vmatprep.subr.mxu0 %v1382_v23  ;;  %2049 = vmatprep.subr.mxu1 %v1142_v25  ;;  %v1242_v22 = vld [vmem:[%s6643_s2 + $0x400] sm:$0xff]  ;;  %v1241_v25 = vld [vmem:[%s6643_s2 + $0x3f8] sm:$0xff] }
 0x1aa   :  { %2153 = vmatpush2.msra.mxu0 %v1381_v27  ;;  %2050 = vmatpush1.msra.mxu1 %v1141_v42  ;;  %v1642_v23 = vld [vmem:[%s6643_s2 + $0x1080] sm:$0xff]  ;;  %v1641_v27 = vld [vmem:[%s6643_s2 + $0x1078] sm:$0xff] }
 0x1ab   :  { %2154 = vmatprep.subr.mxu0 %v1377_v28  ;;  %2051 = vmatprep.subr.mxu1 %v1137_v58  ;;  %v1237_v42 = vld [vmem:[%s6643_s2 + $0x3d8] sm:$0xff]  ;;  %v1236_v58 = vld [vmem:[%s6643_s2 + $0x3d0] sm:$0xff] }
 0x1ac   :  { %2155 = vmatpush2.msra.mxu0 %v1376_v29  ;;  %2052 = vmatpush1.msra.mxu1 %v1136_v33  ;;  %v1637_v28 = vld [vmem:[%s6643_s2 + $0x1058] sm:$0xff]  ;;  %v1636_v29 = vld [vmem:[%s6643_s2 + $0x1050] sm:$0xff] }
 0x1ad   :  { %2156 = vmatprep.subr.mxu0 %v1372_v36  ;;  %2053 = vmatprep.subr.mxu1 %v1132_v38  ;;  %v1232_v33 = vld [vmem:[%s6643_s2 + $0x3b0] sm:$0xff]  ;;  %v1231_v38 = vld [vmem:[%s6643_s2 + $0x3a8] sm:$0xff] }
 0x1ae   :  { %2157 = vmatpush2.msra.mxu0 %v1371_v40  ;;  %2054 = vmatpush1.msra.mxu1 %v1131_v24  ;;  %v1632_v36 = vld [vmem:[%s6643_s2 + $0x1030] sm:$0xff]  ;;  %v1631_v40 = vld [vmem:[%s6643_s2 + $0x1028] sm:$0xff] }
 0x1af   :  { %2158 = vmatprep.subr.mxu0 %v1367_v43  ;;  %2055 = vmatprep.subr.mxu1 %v1127_v46  ;;  %v1227_v24 = vld [vmem:[%s6643_s2 + $0x388] sm:$0xff]  ;;  %v1226_v46 = vld [vmem:[%s6643_s2 + $0x380] sm:$0xff] }
 0x1b0   :  { %2159 = vmatpush2.msra.mxu0 %v1366_v48  ;;  %2056 = vmatpush1.msra.mxu1 %v1126_v49  ;;  %v1627_v43 = vld [vmem:[%s6643_s2 + $0x1008] sm:$0xff]  ;;  %v1626_v48 = vld [vmem:[%s6643_s2 + $0x1000] sm:$0xff] }
 0x1b1   :  { %2160 = vmatprep.subr.mxu0 %v1362_v52  ;;  %2057 = vmatprep.subr.mxu1 %v1122_v53  ;;  %v1222_v49 = vld [vmem:[%s6643_s2 + $0x360] sm:$0xff]  ;;  %v1221_v53 = vld [vmem:[%s6643_s2 + $0x358] sm:$0xff] }
 0x1b2   :  { %2161 = vmatpush2.msra.mxu0 %v1361_v54  ;;  %2058 = vmatpush1.msra.mxu1 %v1121_v55  ;;  %v1622_v52 = vld [vmem:[%s6643_s2 + $0xfe0] sm:$0xff]  ;;  %v1621_v54 = vld [vmem:[%s6643_s2 + $0xfd8] sm:$0xff] }
 0x1b3   :  { %2162 = vmatprep.subr.mxu0 %v1357_v56  ;;  %2059 = vmatprep.subr.mxu1 %v1117_v57  ;;  %v1217_v55 = vld [vmem:[%s6643_s2 + $0x338] sm:$0xff]  ;;  %v1216_v57 = vld [vmem:[%s6643_s2 + $0x330] sm:$0xff] }
 0x1b4   :  { %2163 = vmatpush2.msra.mxu0 %v1356_v59  ;;  %2060 = vmatpush1.msra.mxu1 %v1116_v60  ;;  %v1617_v56 = vld [vmem:[%s6643_s2 + $0xfb8] sm:$0xff]  ;;  %v1616_v59 = vld [vmem:[%s6643_s2 + $0xfb0] sm:$0xff] }
 0x1b5   :  { %2165 = vmatmul.mubr.f32.vlgmr.msra.gmra.mxu0 %v4977_v31  ;;  %2061 = vmatprep.subr.mxu1 %v1272_v61  ;;  %v1212_v60 = vld [vmem:[%s6643_s2 + $0x310] sm:$0xff] }
 0x1b6   :  { %2242 = vmatprep.subr.mxu0 %v1672_v62  ;;  %2062 = vmatpush2.msra.mxu1 %v1271_v35  ;;  %v1612_v61 = vld [vmem:[%s6643_s2 + $0xf90] sm:$0xff]  ;;  %v1211_v62 = vld [vmem:[%s6643_s2 + $0x308] sm:$0xff] }
 0x1b7   :  { %2243 = vmatpush1.msra.mxu0 %v1671_v63  ;;  %2944 = vmatprep.mubr.msk.f32.mxu0 %vm1741_vm0, %v5334_v41  ;;  %v1611_v35 = vld [vmem:[%s6643_s2 + $0xf88] sm:$0xff] }
 0x1b8   :  { %2063 = vmatprep.subr.mxu1 %v1267_v37  ;;  %2244 = vmatprep.subr.mxu0 %v1667_v1  ;;  %v1207_v63 = vld [vmem:[%s6643_s2 + $0x2e8] sm:$0xff]  ;;  %v1206_v1 = vld [vmem:[%s6643_s2 + $0x2e0] sm:$0xff] }
 0x1b9   :  { %2064 = vmatpush2.msra.mxu1 %v1266_v2  ;;  %2245 = vmatpush1.msra.mxu0 %v1666_v3  ;;  %v1607_v37 = vld [vmem:[%s6643_s2 + $0xf68] sm:$0xff]  ;;  %v1606_v2 = vld [vmem:[%s6643_s2 + $0xf60] sm:$0xff] }
 0x1ba   :  { %2065 = vmatprep.subr.mxu1 %v1262_v4  ;;  %2246 = vmatprep.subr.mxu0 %v1662_v5  ;;  %v1202_v3 = vld [vmem:[%s6643_s2 + $0x2c0] sm:$0xff]  ;;  %v1201_v5 = vld [vmem:[%s6643_s2 + $0x2b8] sm:$0xff] }
 0x1bb   :  { %2066 = vmatpush2.msra.mxu1 %v1261_v6  ;;  %2247 = vmatpush1.msra.mxu0 %v1661_v7  ;;  %v1602_v4 = vld [vmem:[%s6643_s2 + $0xf40] sm:$0xff]  ;;  %v1601_v6 = vld [vmem:[%s6643_s2 + $0xf38] sm:$0xff] }
 0x1bc   :  { %2067 = vmatprep.subr.mxu1 %v1257_v8  ;;  %2248 = vmatprep.subr.mxu0 %v1657_v9  ;;  %v1197_v7 = vld [vmem:[%s6643_s2 + $0x298] sm:$0xff]  ;;  %v1196_v9 = vld [vmem:[%s6643_s2 + $0x290] sm:$0xff] }
 0x1bd   :  { %2068 = vmatpush2.msra.mxu1 %v1256_v12  ;;  %2249 = vmatpush1.msra.mxu0 %v1656_v16  ;;  %v1597_v8 = vld [vmem:[%s6643_s2 + $0xf18] sm:$0xff]  ;;  %v1596_v12 = vld [vmem:[%s6643_s2 + $0xf10] sm:$0xff] }
 0x1be   :  { %2069 = vmatprep.subr.mxu1 %v1252_v18  ;;  %2250 = vmatprep.subr.mxu0 %v1652_v19  ;;  %v1512_v16 = vld [vmem:[%s6643_s2 + $0xc70] sm:$0xff]  ;;  %v1511_v19 = vld [vmem:[%s6643_s2 + $0xc68] sm:$0xff] }
 0x1bf   :  { %2070 = vmatpush2.msra.mxu1 %v1251_v20  ;;  %2251 = vmatpush1.msra.mxu0 %v1651_v10  ;;  %v1712_v18 = vld [vmem:[%s6643_s2 + $0x12b0] sm:$0xff]  ;;  %v1711_v20 = vld [vmem:[%s6643_s2 + $0x12a8] sm:$0xff] }
 0x1c0   :  { %2071 = vmatprep.subr.mxu1 %v1247_v11  ;;  %2252 = vmatprep.subr.mxu0 %v1647_v14  ;;  %v1507_v10 = vld [vmem:[%s6643_s2 + $0xc48] sm:$0xff]  ;;  %v1506_v14 = vld [vmem:[%s6643_s2 + $0xc40] sm:$0xff] }
 0x1c1   :  { %2072 = vmatpush2.msra.mxu1 %v1246_v17  ;;  %2253 = vmatpush1.msra.mxu0 %v1646_v21  ;;  %v1707_v11 = vld [vmem:[%s6643_s2 + $0x1288] sm:$0xff]  ;;  %v1706_v17 = vld [vmem:[%s6643_s2 + $0x1280] sm:$0xff] }
 0x1c2   :  { %2073 = vmatprep.subr.mxu1 %v1242_v22  ;;  %2254 = vmatprep.subr.mxu0 %v1642_v23  ;;  %v1502_v21 = vld [vmem:[%s6643_s2 + $0xc20] sm:$0xff]  ;;  %v1501_v23 = vld [vmem:[%s6643_s2 + $0xc18] sm:$0xff] }
 0x1c3   :  { %2074 = vmatpush2.msra.mxu1 %v1241_v25  ;;  %2255 = vmatpush1.msra.mxu0 %v1641_v27  ;;  %v1702_v22 = vld [vmem:[%s6643_s2 + $0x1260] sm:$0xff]  ;;  %v1701_v25 = vld [vmem:[%s6643_s2 + $0x1258] sm:$0xff] }
 0x1c4   :  { %2075 = vmatprep.subr.mxu1 %v1237_v42  ;;  %2256 = vmatprep.subr.mxu0 %v1637_v28  ;;  %v1497_v27 = vld [vmem:[%s6643_s2 + $0xbf8] sm:$0xff]  ;;  %v1496_v28 = vld [vmem:[%s6643_s2 + $0xbf0] sm:$0xff] }
 0x1c5   :  { %2076 = vmatpush2.msra.mxu1 %v1236_v58  ;;  %2257 = vmatpush1.msra.mxu0 %v1636_v29  ;;  %v1697_v42 = vld [vmem:[%s6643_s2 + $0x1238] sm:$0xff]  ;;  %v1696_v58 = vld [vmem:[%s6643_s2 + $0x1230] sm:$0xff] }
 0x1c6   :  { %2077 = vmatprep.subr.mxu1 %v1232_v33  ;;  %2258 = vmatprep.subr.mxu0 %v1632_v36  ;;  %v1492_v29 = vld [vmem:[%s6643_s2 + $0xbd0] sm:$0xff]  ;;  %v1491_v36 = vld [vmem:[%s6643_s2 + $0xbc8] sm:$0xff] }
 0x1c7   :  { %2078 = vmatpush2.msra.mxu1 %v1231_v38  ;;  %2259 = vmatpush1.msra.mxu0 %v1631_v40  ;;  %v1692_v33 = vld [vmem:[%s6643_s2 + $0x1210] sm:$0xff]  ;;  %v1691_v38 = vld [vmem:[%s6643_s2 + $0x1208] sm:$0xff] }
 0x1c8   :  { %2079 = vmatprep.subr.mxu1 %v1227_v24  ;;  %2260 = vmatprep.subr.mxu0 %v1627_v43  ;;  %v1487_v40 = vld [vmem:[%s6643_s2 + $0xba8] sm:$0xff]  ;;  %v1486_v43 = vld [vmem:[%s6643_s2 + $0xba0] sm:$0xff] }
 0x1c9   :  { %2080 = vmatpush2.msra.mxu1 %v1226_v46  ;;  %2261 = vmatpush1.msra.mxu0 %v1626_v48  ;;  %v1687_v24 = vld [vmem:[%s6643_s2 + $0x11e8] sm:$0xff]  ;;  %v1686_v46 = vld [vmem:[%s6643_s2 + $0x11e0] sm:$0xff] }
 0x1ca   :  { %2081 = vmatprep.subr.mxu1 %v1222_v49  ;;  %2262 = vmatprep.subr.mxu0 %v1622_v52  ;;  %v1482_v48 = vld [vmem:[%s6643_s2 + $0xb80] sm:$0xff]  ;;  %v1481_v52 = vld [vmem:[%s6643_s2 + $0xb78] sm:$0xff] }
 0x1cb   :  { %2082 = vmatpush2.msra.mxu1 %v1221_v53  ;;  %2263 = vmatpush1.msra.mxu0 %v1621_v54  ;;  %v1682_v49 = vld [vmem:[%s6643_s2 + $0x11c0] sm:$0xff]  ;;  %v1681_v53 = vld [vmem:[%s6643_s2 + $0x11b8] sm:$0xff] }
 0x1cc   :  { %2083 = vmatprep.subr.mxu1 %v1217_v55  ;;  %2264 = vmatprep.subr.mxu0 %v1617_v56  ;;  %v1477_v54 = vld [vmem:[%s6643_s2 + $0xb58] sm:$0xff]  ;;  %v1476_v56 = vld [vmem:[%s6643_s2 + $0xb50] sm:$0xff] }
 0x1cd   :  { %2084 = vmatpush2.msra.mxu1 %v1216_v57  ;;  %2265 = vmatpush1.msra.mxu0 %v1616_v59  ;;  %v1677_v55 = vld [vmem:[%s6643_s2 + $0x1198] sm:$0xff]  ;;  %v1676_v57 = vld [vmem:[%s6643_s2 + $0x1190] sm:$0xff] }
 0x1ce   :  { %2085 = vmatprep.subr.mxu1 %v1212_v60  ;;  %2266 = vmatprep.subr.mxu0 %v1612_v61  ;;  %v1472_v59 = vld [vmem:[%s6643_s2 + $0xb30] sm:$0xff]  ;;  %v1273_v60 = vld [vmem:[%s6643_s2 + $0x4f8] sm:$0xff]  ;;  %v1471_v61 = vld [vmem:[%s6643_s2 + $0xb28] sm:$0xff] }
 0x1cf   :  { %2086 = vmatpush2.msra.mxu1 %v1211_v62  ;;  %2267 = vmatpush1.msra.mxu0 %v1611_v35  ;;  %v1193_v62 = vld [vmem:[%s6643_s2 + $0x278] sm:$0xff]  ;;  %v1467_v35 = vld [vmem:[%s6643_s2 + $0xb08] sm:$0xff] }
 0x1d0   :  { %2087 = vmatprep.subr.mxu1 %v1207_v63  ;;  %2268 = vmatprep.subr.mxu0 %v1607_v37  ;;  %v1268_v63 = vld [vmem:[%s6643_s2 + $0x4d0] sm:$0xff]  ;;  %v1466_v37 = vld [vmem:[%s6643_s2 + $0xb00] sm:$0xff] }
 0x1d1   :  { %2088 = vmatpush2.msra.mxu1 %v1206_v1  ;;  %2269 = vmatpush1.msra.mxu0 %v1606_v2  ;;  %v1188_v1 = vld [vmem:[%s6643_s2 + $0x250] sm:$0xff]  ;;  %v1462_v2 = vld [vmem:[%s6643_s2 + $0xae0] sm:$0xff] }
 0x1d2   :  { %2089 = vmatprep.subr.mxu1 %v1202_v3  ;;  %2270 = vmatprep.subr.mxu0 %v1602_v4  ;;  %v1263_v3 = vld [vmem:[%s6643_s2 + $0x4a8] sm:$0xff]  ;;  %v1461_v4 = vld [vmem:[%s6643_s2 + $0xad8] sm:$0xff] }
 0x1d3   :  { %2090 = vmatpush2.msra.mxu1 %v1201_v5  ;;  %2271 = vmatpush1.msra.mxu0 %v1601_v6  ;;  %v1183_v5 = vld [vmem:[%s6643_s2 + $0x228] sm:$0xff]  ;;  %v1457_v6 = vld [vmem:[%s6643_s2 + $0xab8] sm:$0xff] }
 0x1d4   :  { %2091 = vmatprep.subr.mxu1 %v1197_v7  ;;  %2272 = vmatprep.subr.mxu0 %v1597_v8  ;;  %v1456_v7 = vld [vmem:[%s6643_s2 + $0xab0] sm:$0xff]  ;;  %v1178_v8 = vld [vmem:[%s6643_s2 + $0x200] sm:$0xff] }
 0x1d5   :  { %2092 = vmatpush2.msra.mxu1 %v1196_v9  ;;  %2273 = vmatpush1.msra.mxu0 %v1596_v12  ;;  %v1452_v9 = vld [vmem:[%s6643_s2 + $0xa90] sm:$0xff]  ;;  %v1253_v12 = vld [vmem:[%s6643_s2 + $0x458] sm:$0xff] }
 0x1d6   :  { %2094 = vmatmul.mubr.f32.vlgmr.msra.gmra.mxu1 %v4864_v15  ;;  %2171 = vmatprep.subr.mxu1 %v1512_v16  ;;  %v1451_v16 = vld [vmem:[%s6643_s2 + $0xa88] sm:$0xff] }
 0x1d7   :  { %2290 = vmatprep.subr.mxu0 %v1712_v18  ;;  %2172 = vmatpush1.msra.mxu1 %v1511_v19  ;;  %v1173_v18 = vld [vmem:[%s6643_s2 + $0x1d8] sm:$0xff]  ;;  %v1447_v19 = vld [vmem:[%s6643_s2 + $0xa68] sm:$0xff] }
 0x1d8   :  { %2235 = vmatprep.mubr.f32.mxu1 %v5224_v50  ;;  %2291 = vmatpush2.msra.mxu0 %v1711_v20  ;;  %v1248_v20 = vld [vmem:[%s6643_s2 + $0x430] sm:$0xff] }
 0x1d9   :  { %2173 = vmatprep.subr.mxu1 %v1507_v10  ;;  %2292 = vmatprep.subr.mxu0 %v1707_v11  ;;  %v1446_v10 = vld [vmem:[%s6643_s2 + $0xa60] sm:$0xff]  ;;  %v1168_v11 = vld [vmem:[%s6643_s2 + $0x1b0] sm:$0xff] }
 0x1da   :  { %2174 = vmatpush1.msra.mxu1 %v1506_v14  ;;  %2293 = vmatpush2.msra.mxu0 %v1706_v17  ;;  %v1442_v14 = vld [vmem:[%s6643_s2 + $0xa40] sm:$0xff]  ;;  %v1243_v17 = vld [vmem:[%s6643_s2 + $0x408] sm:$0xff] }
 0x1db   :  { %2175 = vmatprep.subr.mxu1 %v1502_v21  ;;  %2294 = vmatprep.subr.mxu0 %v1702_v22  ;;  %v1441_v21 = vld [vmem:[%s6643_s2 + $0xa38] sm:$0xff]  ;;  %v1163_v22 = vld [vmem:[%s6643_s2 + $0x188] sm:$0xff] }
 0x1dc   :  { %2176 = vmatpush1.msra.mxu1 %v1501_v23  ;;  %2295 = vmatpush2.msra.mxu0 %v1701_v25  ;;  %v1437_v23 = vld [vmem:[%s6643_s2 + $0xa18] sm:$0xff]  ;;  %v1238_v25 = vld [vmem:[%s6643_s2 + $0x3e0] sm:$0xff] }
 0x1dd   :  { %2177 = vmatprep.subr.mxu1 %v1497_v27  ;;  %2296 = vmatprep.subr.mxu0 %v1697_v42  ;;  %v1436_v27 = vld [vmem:[%s6643_s2 + $0xa10] sm:$0xff]  ;;  %v1158_v42 = vld [vmem:[%s6643_s2 + $0x160] sm:$0xff] }
 0x1de   :  { %2178 = vmatpush1.msra.mxu1 %v1496_v28  ;;  %2297 = vmatpush2.msra.mxu0 %v1696_v58  ;;  %v1592_v28 = vld [vmem:[%s6643_s2 + $0xef0] sm:$0xff]  ;;  %v1233_v58 = vld [vmem:[%s6643_s2 + $0x3b8] sm:$0xff] }
 0x1df   :  { %2179 = vmatprep.subr.mxu1 %v1492_v29  ;;  %2298 = vmatprep.subr.mxu0 %v1692_v33  ;;  %v1591_v29 = vld [vmem:[%s6643_s2 + $0xee8] sm:$0xff]  ;;  %v1153_v33 = vld [vmem:[%s6643_s2 + $0x138] sm:$0xff] }
 0x1e0   :  { %2180 = vmatpush1.msra.mxu1 %v1491_v36  ;;  %2299 = vmatpush2.msra.mxu0 %v1691_v38  ;;  %v1587_v36 = vld [vmem:[%s6643_s2 + $0xec8] sm:$0xff]  ;;  %v1228_v38 = vld [vmem:[%s6643_s2 + $0x390] sm:$0xff] }
 0x1e1   :  { %2181 = vmatprep.subr.mxu1 %v1487_v40  ;;  %2300 = vmatprep.subr.mxu0 %v1687_v24  ;;  %v1586_v40 = vld [vmem:[%s6643_s2 + $0xec0] sm:$0xff]  ;;  %v1148_v24 = vld [vmem:[%s6643_s2 + $0x110] sm:$0xff] }
 0x1e2   :  { %2182 = vmatpush1.msra.mxu1 %v1486_v43  ;;  %2301 = vmatpush2.msra.mxu0 %v1686_v46  ;;  %v1582_v43 = vld [vmem:[%s6643_s2 + $0xea0] sm:$0xff]  ;;  %v1223_v46 = vld [vmem:[%s6643_s2 + $0x368] sm:$0xff] }
 0x1e3   :  { %2183 = vmatprep.subr.mxu1 %v1482_v48  ;;  %2302 = vmatprep.subr.mxu0 %v1682_v49  ;;  %v1581_v48 = vld [vmem:[%s6643_s2 + $0xe98] sm:$0xff]  ;;  %v1143_v49 = vld [vmem:[%s6643_s2 + $0xe8] sm:$0xff] }
 0x1e4   :  { %2184 = vmatpush1.msra.mxu1 %v1481_v52  ;;  %2303 = vmatpush2.msra.mxu0 %v1681_v53  ;;  %v1577_v52 = vld [vmem:[%s6643_s2 + $0xe78] sm:$0xff]  ;;  %v1218_v53 = vld [vmem:[%s6643_s2 + $0x340] sm:$0xff] }
 0x1e5   :  { %2185 = vmatprep.subr.mxu1 %v1477_v54  ;;  %2304 = vmatprep.subr.mxu0 %v1677_v55  ;;  %v1576_v54 = vld [vmem:[%s6643_s2 + $0xe70] sm:$0xff]  ;;  %v1138_v55 = vld [vmem:[%s6643_s2 + $0xc0] sm:$0xff] }
 0x1e6   :  { %2186 = vmatpush1.msra.mxu1 %v1476_v56  ;;  %2305 = vmatpush2.msra.mxu0 %v1676_v57  ;;  %v1572_v56 = vld [vmem:[%s6643_s2 + $0xe50] sm:$0xff]  ;;  %v1213_v57 = vld [vmem:[%s6643_s2 + $0x318] sm:$0xff] }
 0x1e7   :  { %2187 = vmatprep.subr.mxu1 %v1472_v59  ;;  %2307 = vmatmul.mubr.f32.vlgmr.msra.gmra.mxu0 %v5339_v45  ;;  %v1571_v59 = vld [vmem:[%s6643_s2 + $0xe48] sm:$0xff] }
 0x1e8   :  { %2947 = vmatprep.subr.mxu0 %v1273_v60  ;;  %2188 = vmatpush1.msra.mxu1 %v1471_v61  ;;  %v1133_v60 = vld [vmem:[%s6643_s2 + $0x98] sm:$0xff]  ;;  %v1567_v61 = vld [vmem:[%s6643_s2 + $0xe28] sm:$0xff] }
 0x1e9   :  { %2948 = vmatpush3.msra.mxu0 %v1193_v62  ;;  %2377 = vmatprep.mubr.f32.mxu0 %v4862_v13  ;;  %v1258_v13 = vld [vmem:[%s6643_s2 + $0x480] sm:$0xff]  ;;  %v1208_v62 = vld [vmem:[%s6643_s2 + $0x2f0] sm:$0xff] }
 0x1ea   :  { %2189 = vmatprep.subr.mxu1 %v1467_v35  ;;  %2949 = vmatprep.subr.mxu0 %v1268_v63  ;;  %v1566_v35 = vld [vmem:[%s6643_s2 + $0xe20] sm:$0xff]  ;;  %v1128_v63 = vld [vmem:[%s6643_s2 + $0x70] sm:$0xff] }
 0x1eb   :  { %2190 = vmatpush1.msra.mxu1 %v1466_v37  ;;  %2950 = vmatpush3.msra.mxu0 %v1188_v1  ;;  %v1562_v37 = vld [vmem:[%s6643_s2 + $0xe00] sm:$0xff]  ;;  %v1203_v1 = vld [vmem:[%s6643_s2 + $0x2c8] sm:$0xff] }
 0x1ec   :  { %2191 = vmatprep.subr.mxu1 %v1462_v2  ;;  %2951 = vmatprep.subr.mxu0 %v1263_v3  ;;  %v1561_v2 = vld [vmem:[%s6643_s2 + $0xdf8] sm:$0xff]  ;;  %v1123_v3 = vld [vmem:[%s6643_s2 + $0x48] sm:$0xff] }
 0x1ed   :  { %2192 = vmatpush1.msra.mxu1 %v1461_v4  ;;  %2952 = vmatpush3.msra.mxu0 %v1183_v5  ;;  %v1557_v4 = vld [vmem:[%s6643_s2 + $0xdd8] sm:$0xff]  ;;  %v1198_v5 = vld [vmem:[%s6643_s2 + $0x2a0] sm:$0xff] }
 0x1ee   :  { %2193 = vmatprep.subr.mxu1 %v1457_v6  ;;  %2953 = vmatprep.subr.mxu0 %v1258_v13  ;;  %v1556_v6 = vld [vmem:[%s6643_s2 + $0xdd0] sm:$0xff]  ;;  %v1118_v13 = vld [vmem:[%s6643_s2 + $0x20] sm:$0xff] }
 0x1ef   :  { %2194 = vmatpush1.msra.mxu1 %v1456_v7  ;;  %2954 = vmatpush3.msra.mxu0 %v1178_v8  ;;  %v1552_v7 = vld [vmem:[%s6643_s2 + $0xdb0] sm:$0xff]  ;;  %v1593_v8 = vld [vmem:[%s6643_s2 + $0xef8] sm:$0xff] }
 0x1f0   :  { %2195 = vmatprep.subr.mxu1 %v1452_v9  ;;  %2955 = vmatprep.subr.mxu0 %v1253_v12  ;;  %v1551_v9 = vld [vmem:[%s6643_s2 + $0xda8] sm:$0xff]  ;;  %v1513_v12 = vld [vmem:[%s6643_s2 + $0xc78] sm:$0xff] }
 0x1f1   :  { %2196 = vmatpush1.msra.mxu1 %v1451_v16  ;;  %2956 = vmatpush3.msra.mxu0 %v1173_v18  ;;  %v1547_v16 = vld [vmem:[%s6643_s2 + $0xd88] sm:$0xff]  ;;  %v1588_v18 = vld [vmem:[%s6643_s2 + $0xed0] sm:$0xff] }
 0x1f2   :  { %2197 = vmatprep.subr.mxu1 %v1447_v19  ;;  %2957 = vmatprep.subr.mxu0 %v1248_v20  ;;  %v1546_v19 = vld [vmem:[%s6643_s2 + $0xd80] sm:$0xff]  ;;  %v1508_v20 = vld [vmem:[%s6643_s2 + $0xc50] sm:$0xff] }
 0x1f3   :  { %2198 = vmatpush1.msra.mxu1 %v1446_v10  ;;  %2958 = vmatpush3.msra.mxu0 %v1168_v11  ;;  %v1542_v10 = vld [vmem:[%s6643_s2 + $0xd60] sm:$0xff]  ;;  %v1541_v11 = vld [vmem:[%s6643_s2 + $0xd58] sm:$0xff] }
 0x1f4   :  { %2199 = vmatprep.subr.mxu1 %v1442_v14  ;;  %2959 = vmatprep.subr.mxu0 %v1243_v17  ;;  %v1503_v14 = vld [vmem:[%s6643_s2 + $0xc28] sm:$0xff]  ;;  %v1537_v17 = vld [vmem:[%s6643_s2 + $0xd38] sm:$0xff] }
 0x1f5   :  { %2200 = vmatpush1.msra.mxu1 %v1441_v21  ;;  %2960 = vmatpush3.msra.mxu0 %v1163_v22  ;;  %v1536_v21 = vld [vmem:[%s6643_s2 + $0xd30] sm:$0xff]  ;;  %v1498_v22 = vld [vmem:[%s6643_s2 + $0xc00] sm:$0xff] }
 0x1f6   :  { %2201 = vmatprep.subr.mxu1 %v1437_v23  ;;  %2961 = vmatprep.subr.mxu0 %v1238_v25  ;;  %v1532_v23 = vld [vmem:[%s6643_s2 + $0xd10] sm:$0xff]  ;;  %v1573_v25 = vld [vmem:[%s6643_s2 + $0xe58] sm:$0xff] }
 0x1f7   :  { %2202 = vmatpush1.msra.mxu1 %v1436_v27  ;;  %2962 = vmatpush3.msra.mxu0 %v1158_v42  ;;  %v1531_v27 = vld [vmem:[%s6643_s2 + $0xd08] sm:$0xff]  ;;  %v1493_v42 = vld [vmem:[%s6643_s2 + $0xbd8] sm:$0xff] }
 0x1f8   :  { %2203 = vmatprep.subr.mxu1 %v1592_v28  ;;  %2963 = vmatprep.subr.mxu0 %v1233_v58  ;;  %v1527_v28 = vld [vmem:[%s6643_s2 + $0xce8] sm:$0xff]  ;;  %v1568_v58 = vld [vmem:[%s6643_s2 + $0xe30] sm:$0xff] }
 0x1f9   :  { %2204 = vmatpush2.msra.mxu1 %v1591_v29  ;;  %2964 = vmatpush3.msra.mxu0 %v1153_v33  ;;  %v1526_v29 = vld [vmem:[%s6643_s2 + $0xce0] sm:$0xff]  ;;  %v1488_v33 = vld [vmem:[%s6643_s2 + $0xbb0] sm:$0xff] }
 0x1fa   :  { %2205 = vmatprep.subr.mxu1 %v1587_v36  ;;  %2965 = vmatprep.subr.mxu0 %v1228_v38  ;;  %v1522_v36 = vld [vmem:[%s6643_s2 + $0xcc0] sm:$0xff]  ;;  %v1563_v38 = vld [vmem:[%s6643_s2 + $0xe08] sm:$0xff] }
 0x1fb   :  { %2206 = vmatpush2.msra.mxu1 %v1586_v40  ;;  %2966 = vmatpush3.msra.mxu0 %v1148_v24  ;;  %v1521_v40 = vld [vmem:[%s6643_s2 + $0xcb8] sm:$0xff]  ;;  %v1483_v24 = vld [vmem:[%s6643_s2 + $0xb88] sm:$0xff] }
 0x1fc   :  { %2207 = vmatprep.subr.mxu1 %v1582_v43  ;;  %2967 = vmatprep.subr.mxu0 %v1223_v46  ;;  %v1517_v43 = vld [vmem:[%s6643_s2 + $0xc98] sm:$0xff]  ;;  %v1558_v46 = vld [vmem:[%s6643_s2 + $0xde0] sm:$0xff] }
 0x1fd   :  { %2208 = vmatpush2.msra.mxu1 %v1581_v48  ;;  %2968 = vmatpush3.msra.mxu0 %v1143_v49  ;;  %v1516_v48 = vld [vmem:[%s6643_s2 + $0xc90] sm:$0xff]  ;;  %v1478_v49 = vld [vmem:[%s6643_s2 + $0xb60] sm:$0xff] }
 0x1fe   :  { %2209 = vmatprep.subr.mxu1 %v1577_v52  ;;  %2969 = vmatprep.subr.mxu0 %v1218_v53  ;;  %v1433_v52 = vld [vmem:[%s6643_s2 + $0x9f8] sm:$0xff] }
 0x1ff   :  { %2210 = vmatpush2.msra.mxu1 %v1576_v54  ;;  %2970 = vmatpush3.msra.mxu0 %v1138_v55  ;;  %v1553_v53 = vld [vmem:[%s6643_s2 + $0xdb8] sm:$0xff] }
 0x200   :  { %2211 = vmatprep.subr.mxu1 %v1572_v56  ;;  %2971 = vmatprep.subr.mxu0 %v1213_v57  ;;  %v1353_v54 = vld [vmem:[%s6643_s2 + $0x778] sm:$0xff]  ;;  %v1428_v56 = vld [vmem:[%s6643_s2 + $0x9d0] sm:$0xff] }
 0x201   :  { %2212 = vmatpush2.msra.mxu1 %v1571_v59  ;;  %2972 = vmatpush3.msra.mxu0 %v1133_v60  ;;  %v1473_v55 = vld [vmem:[%s6643_s2 + $0xb38] sm:$0xff]  ;;  %v1548_v57 = vld [vmem:[%s6643_s2 + $0xd90] sm:$0xff] }
 0x202   :  { %2213 = vmatprep.subr.mxu1 %v1567_v61  ;;  %2973 = vmatprep.subr.mxu0 %v1208_v62  ;;  %v1348_v59 = vld [vmem:[%s6643_s2 + $0x750] sm:$0xff]  ;;  %v1423_v61 = vld [vmem:[%s6643_s2 + $0x9a8] sm:$0xff] }
 0x203   :  { %2214 = vmatpush2.msra.mxu1 %v1566_v35  ;;  %2974 = vmatpush3.msra.mxu0 %v1128_v63  ;;  %v1468_v60 = vld [vmem:[%s6643_s2 + $0xb10] sm:$0xff]  ;;  %v1543_v62 = vld [vmem:[%s6643_s2 + $0xd68] sm:$0xff]  ;;  %v1418_v63 = vld [vmem:[%s6643_s2 + $0x980] sm:$0xff] }
 0x204   :  { %2215 = vmatprep.subr.mxu1 %v1562_v37  ;;  %2975 = vmatprep.subr.mxu0 %v1203_v1  ;;  %v1343_v35 = vld [vmem:[%s6643_s2 + $0x728] sm:$0xff]  ;;  %v1538_v37 = vld [vmem:[%s6643_s2 + $0xd40] sm:$0xff] }
 0x205   :  { %2216 = vmatpush2.msra.mxu1 %v1561_v2  ;;  %2976 = vmatpush3.msra.mxu0 %v1123_v3  ;;  %v1338_v1 = vld [vmem:[%s6643_s2 + $0x700] sm:$0xff]  ;;  %v1413_v3 = vld [vmem:[%s6643_s2 + $0x958] sm:$0xff] }
 0x206   :  { %2217 = vmatprep.subr.mxu1 %v1557_v4  ;;  %2977 = vmatprep.subr.mxu0 %v1198_v5  ;;  %v1458_v2 = vld [vmem:[%s6643_s2 + $0xac0] sm:$0xff]  ;;  %v1533_v4 = vld [vmem:[%s6643_s2 + $0xd18] sm:$0xff] }
 0x207   :  { %2218 = vmatpush2.msra.mxu1 %v1556_v6  ;;  %2978 = vmatpush3.msra.mxu0 %v1118_v13  ;;  %v1333_v5 = vld [vmem:[%s6643_s2 + $0x6d8] sm:$0xff]  ;;  %v1408_v13 = vld [vmem:[%s6643_s2 + $0x930] sm:$0xff] }
 0x208   :  { %2219 = vmatprep.subr.mxu1 %v1552_v7  ;;  %2378 = vmatmul.mubr.f32.vlgmr.msra.gmra.mxu0 %v4864_v15  ;;  %v1583_v15 = vld [vmem:[%s6643_s2 + $0xea8] sm:$0xff]  ;;  %v1453_v6 = vld [vmem:[%s6643_s2 + $0xa98] sm:$0xff]  ;;  %v1528_v7 = vld [vmem:[%s6643_s2 + $0xcf0] sm:$0xff] }
 0x209   :  { %3017 = vmatprep.subr.mxu0 %v1593_v8  ;;  %2220 = vmatpush2.msra.mxu1 %v1551_v9  ;;  %v1328_v8 = vld [vmem:[%s6643_s2 + $0x6b0] sm:$0xff] }
 0x20a   :  { %3018 = vmatpush3.msra.mxu0 %v1513_v12  ;;  %2517 = vmatprep.mubr.f32.mxu0 %v5224_v50  ;;  %v1578_v50 = vld [vmem:[%s6643_s2 + $0xe80] sm:$0xff]  ;;  %v1448_v9 = vld [vmem:[%s6643_s2 + $0xa70] sm:$0xff]  ;;  %v1403_v12 = vld [vmem:[%s6643_s2 + $0x908] sm:$0xff] }
 0x20b   :  { %2221 = vmatprep.subr.mxu1 %v1547_v16  ;;  %3019 = vmatprep.subr.mxu0 %v1588_v18  ;;  %v1523_v16 = vld [vmem:[%s6643_s2 + $0xcc8] sm:$0xff] }
 0x20c   :  { %2222 = vmatpush2.msra.mxu1 %v1546_v19  ;;  %3020 = vmatpush3.msra.mxu0 %v1508_v20  ;;  %v1323_v18 = vld [vmem:[%s6643_s2 + $0x688] sm:$0xff]  ;;  %v1398_v20 = vld [vmem:[%s6643_s2 + $0x8e0] sm:$0xff] }
 0x20d   :  { %2223 = vmatprep.subr.mxu1 %v1542_v10  ;;  %3021 = vmatprep.subr.mxu0 %v1583_v15  ;;  %v1443_v19 = vld [vmem:[%s6643_s2 + $0xa48] sm:$0xff]  ;;  %v1518_v10 = vld [vmem:[%s6643_s2 + $0xca0] sm:$0xff] }
 0x20e   :  { %2224 = vmatpush2.msra.mxu1 %v1541_v11  ;;  %3022 = vmatpush3.msra.mxu0 %v1503_v14  ;;  %v1318_v15 = vld [vmem:[%s6643_s2 + $0x660] sm:$0xff]  ;;  %v1393_v14 = vld [vmem:[%s6643_s2 + $0x8b8] sm:$0xff] }
 0x20f   :  { %2225 = vmatprep.subr.mxu1 %v1537_v17  ;;  %3023 = vmatprep.subr.mxu0 %v1578_v50  ;;  %v1438_v11 = vld [vmem:[%s6643_s2 + $0xa20] sm:$0xff]  ;;  %v1313_v17 = vld [vmem:[%s6643_s2 + $0x638] sm:$0xff]  ;;  %v1388_v50 = vld [vmem:[%s6643_s2 + $0x890] sm:$0xff] }
 0x210   :  { %2226 = vmatpush2.msra.mxu1 %v1536_v21  ;;  %3024 = vmatpush3.msra.mxu0 %v1498_v22  ;;  %v2629_v21 = vld [vmem:[%s6644_s3 + $0xf8] sm:$0xff]  ;;  %v1308_v22 = vld [vmem:[%s6643_s2 + $0x610] sm:$0xff] }
 0x211   :  { %2227 = vmatprep.subr.mxu1 %v1532_v23  ;;  %3025 = vmatprep.subr.mxu0 %v1573_v25  ;;  %v2613_v23 = vld [vmem:[%s6644_s3 + $0x78] sm:$0xff]  ;;  %v1383_v25 = vld [vmem:[%s6643_s2 + $0x868] sm:$0xff] }
 0x212   :  { %2228 = vmatpush2.msra.mxu1 %v1531_v27  ;;  %3026 = vmatpush3.msra.mxu0 %v1493_v42  ;;  %v2628_v27 = vld [vmem:[%s6644_s3 + $0xf0] sm:$0xff]  ;;  %v1303_v42 = vld [vmem:[%s6643_s2 + $0x5e8] sm:$0xff] }
 0x213   :  { %2229 = vmatprep.subr.mxu1 %v1527_v28  ;;  %3027 = vmatprep.subr.mxu0 %v1568_v58  ;;  %v2612_v28 = vld [vmem:[%s6644_s3 + $0x70] sm:$0xff]  ;;  %v2627_v58 = vld [vmem:[%s6644_s3 + $0xe8] sm:$0xff] }
 0x214   :  { %2230 = vmatpush2.msra.mxu1 %v1526_v29  ;;  %3028 = vmatpush3.msra.mxu0 %v1488_v33  ;;  %v1298_v29 = vld [vmem:[%s6643_s2 + $0x5c0] sm:$0xff]  ;;  %v2611_v33 = vld [vmem:[%s6644_s3 + $0x68] sm:$0xff] }
 0x215   :  { %2231 = vmatprep.subr.mxu1 %v1522_v36  ;;  %3029 = vmatprep.subr.mxu0 %v1563_v38  ;;  %v1373_v36 = vld [vmem:[%s6643_s2 + $0x818] sm:$0xff]  ;;  %v2626_v38 = vld [vmem:[%s6644_s3 + $0xe0] sm:$0xff] }
 0x216   :  { %2232 = vmatpush2.msra.mxu1 %v1521_v40  ;;  %3030 = vmatpush3.msra.mxu0 %v1483_v24  ;;  %v1293_v40 = vld [vmem:[%s6643_s2 + $0x598] sm:$0xff]  ;;  %v2610_v24 = vld [vmem:[%s6644_s3 + $0x60] sm:$0xff] }
 0x217   :  { %2233 = vmatprep.subr.mxu1 %v1517_v43  ;;  %3031 = vmatprep.subr.mxu0 %v1558_v46  ;;  %v1368_v43 = vld [vmem:[%s6643_s2 + $0x7f0] sm:$0xff]  ;;  %v2625_v46 = vld [vmem:[%s6644_s3 + $0xd8] sm:$0xff] }
 0x218   :  { %2234 = vmatpush2.msra.mxu1 %v1516_v48  ;;  %3032 = vmatpush3.msra.mxu0 %v1478_v49  ;;  %v1288_v48 = vld [vmem:[%s6643_s2 + $0x570] sm:$0xff]  ;;  %v2609_v49 = vld [vmem:[%s6644_s3 + $0x58] sm:$0xff] }
 0x219   :  { %2236 = vmatmul.mubr.f32.vlgmr.msra.gmra.mxu1 %v5226_v51  ;;  %2982 = vmatprep.subr.mxu1 %v1433_v52  ;;  %v1363_v52 = vld [vmem:[%s6643_s2 + $0x7c8] sm:$0xff] }
 0x21a   :  { %3033 = vmatprep.subr.mxu0 %v1553_v53  ;;  %2983 = vmatpush3.msra.mxu1 %v1353_v54  ;;  %v2624_v53 = vld [vmem:[%s6644_s3 + $0xd0] sm:$0xff]  ;;  %v1283_v54 = vld [vmem:[%s6643_s2 + $0x548] sm:$0xff] }
 0x21b   :  { %2447 = vmatprep.mubr.f32.mxu1 %v4972_v0  ;;  %3034 = vmatpush3.msra.mxu0 %v1473_v55  ;;  %v1463_v0 = vld [vmem:[%s6643_s2 + $0xae8] sm:$0xff]  ;;  %v2608_v55 = vld [vmem:[%s6644_s3 + $0x50] sm:$0xff] }
 0x21c   :  { %2984 = vmatprep.subr.mxu1 %v1428_v56  ;;  %3035 = vmatprep.subr.mxu0 %v1548_v57  ;;  %v1358_v56 = vld [vmem:[%s6643_s2 + $0x7a0] sm:$0xff]  ;;  %v2623_v57 = vld [vmem:[%s6644_s3 + $0xc8] sm:$0xff] }
 0x21d   :  { %2985 = vmatpush3.msra.mxu1 %v1348_v59  ;;  %3036 = vmatpush3.msra.mxu0 %v1468_v60  ;;  %v1278_v59 = vld [vmem:[%s6643_s2 + $0x520] sm:$0xff]  ;;  %v2607_v60 = vld [vmem:[%s6644_s3 + $0x48] sm:$0xff] }
 0x21e   :  { %2986 = vmatprep.subr.mxu1 %v1423_v61  ;;  %3037 = vmatprep.subr.mxu0 %v1543_v62  ;;  %v1673_v61 = vld [vmem:[%s6643_s2 + $0x1178] sm:$0xff]  ;;  %v2622_v62 = vld [vmem:[%s6644_s3 + $0xc0] sm:$0xff] }
 0x21f   :  { %2987 = vmatpush3.msra.mxu1 %v1343_v35  ;;  %3038 = vmatpush3.msra.mxu0 %v1463_v0  ;;  %v1668_v35 = vld [vmem:[%s6643_s2 + $0x1150] sm:$0xff]  ;;  %v2606_v0 = vld [vmem:[%s6644_s3 + $0x40] sm:$0xff] }
 0x220   :  { %2988 = vmatprep.subr.mxu1 %v1418_v63  ;;  %3039 = vmatprep.subr.mxu0 %v1538_v37  ;;  %v2621_v63 = vld [vmem:[%s6644_s3 + $0xb8] sm:$0xff] }
 0x221   :  { %2989 = vmatpush3.msra.mxu1 %v1338_v1  ;;  %3040 = vmatpush3.msra.mxu0 %v1458_v2  ;;  %v2605_v37 = vld [vmem:[%s6644_s3 + $0x38] sm:$0xff]  ;;  %v1658_v1 = vld [vmem:[%s6643_s2 + $0x1100] sm:$0xff]  ;;  %v2604_v2 = vld [vmem:[%s6644_s3 + $0x30] sm:$0xff] }
 0x222   :  { %2990 = vmatprep.subr.mxu1 %v1413_v3  ;;  %3041 = vmatprep.subr.mxu0 %v1533_v4  ;;  %v2619_v3 = vld [vmem:[%s6644_s3 + $0xa8] sm:$0xff]  ;;  %v1653_v4 = vld [vmem:[%s6643_s2 + $0x10d8] sm:$0xff] }
 0x223   :  { %2991 = vmatpush3.msra.mxu1 %v1333_v5  ;;  %3042 = vmatpush3.msra.mxu0 %v1453_v6  ;;  %v2603_v5 = vld [vmem:[%s6644_s3 + $0x28] sm:$0xff]  ;;  %v2618_v6 = vld [vmem:[%s6644_s3 + $0xa0] sm:$0xff] }
 0x224   :  { %2992 = vmatprep.subr.mxu1 %v1408_v13  ;;  %3043 = vmatprep.subr.mxu0 %v1528_v7  ;;  %v1648_v13 = vld [vmem:[%s6643_s2 + $0x10b0] sm:$0xff]  ;;  %v2602_v7 = vld [vmem:[%s6644_s3 + $0x20] sm:$0xff] }
 0x225   :  { %2993 = vmatpush3.msra.mxu1 %v1328_v8  ;;  %3044 = vmatpush3.msra.mxu0 %v1448_v9  ;;  %v2617_v8 = vld [vmem:[%s6644_s3 + $0x98] sm:$0xff]  ;;  %v1643_v9 = vld [vmem:[%s6643_s2 + $0x1088] sm:$0xff] }
 0x226   :  { %2994 = vmatprep.subr.mxu1 %v1403_v12  ;;  %3045 = vmatprep.subr.mxu0 %v1523_v16  ;;  %v2601_v12 = vld [vmem:[%s6644_s3 + $0x18] sm:$0xff]  ;;  %v2616_v16 = vld [vmem:[%s6644_s3 + $0x90] sm:$0xff] }
 0x227   :  { %2995 = vmatpush3.msra.mxu1 %v1323_v18  ;;  %3046 = vmatpush3.msra.mxu0 %v1443_v19  ;;  %v1638_v18 = vld [vmem:[%s6643_s2 + $0x1060] sm:$0xff]  ;;  %v2600_v19 = vld [vmem:[%s6644_s3 + $0x10] sm:$0xff] }
 0x228   :  { %2996 = vmatprep.subr.mxu1 %v1398_v20  ;;  %3047 = vmatprep.subr.mxu0 %v1518_v10  ;;  %v2615_v20 = vld [vmem:[%s6644_s3 + $0x88] sm:$0xff]  ;;  %v1633_v10 = vld [vmem:[%s6643_s2 + $0x1038] sm:$0xff] }
 0x229   :  { %2997 = vmatpush3.msra.mxu1 %v1318_v15  ;;  %3048 = vmatpush3.msra.mxu0 %v1438_v11  ;;  %v2599_v15 = vld [vmem:[%s6644_s3 + $0x8] sm:$0xff]  ;;  %v2614_v11 = vld [vmem:[%s6644_s3 + $0x80] sm:$0xff] }
 0x22a   :  { %2998 = vmatprep.subr.mxu1 %v1393_v14  ;;  %2518 = vmatmul.mubr.f32.vlgmr.msra.gmra.mxu0 %v5226_v51  ;;  %v1378_v51 = vld [vmem:[%s6643_s2 + $0x840] sm:$0xff]  ;;  %v1811_v14 = vpop.f32.mrf.mxu0 }
 0x22b   :  { %2999 = vmatpush3.msra.mxu1 %v1313_v17  ;;  %3052 = vmatprep.subr.mxu0 %v2629_v21  ;;  %v1628_v17 = vld [vmem:[%s6643_s2 + $0x1010] sm:$0xff]  ;;  %v6398_v21 = vld [vmem:[%s6646_s5] sm:$0x1f] }
 0x22c   :  { %3000 = vmatprep.subr.mxu1 %v1388_v50  ;;  %3053 = vmatpush3.msra.mxu0 %v2613_v23  ;;  %v2598_v50 = vld [vmem:[%s6644_s3] sm:$0xff]  ;;  %v1719_v23 = vrot.slane %v6398_v21, %v422_v26  ;;  %v1613_v26 = vld [vmem:[%s6643_s2 + $0xf98] sm:$0xff] }
 0x22d   :  { %3001 = vmatpush3.msra.mxu1 %v1308_v22  ;;  %3054 = vmatprep.subr.mxu0 %v2628_v27  ;;  %v1623_v22 = vld [vmem:[%s6643_s2 + $0xfe8] sm:$0xff]  ;;  %v1882_v27 = vpop.f32.mrf.mxu1 }
 0x22e   :  { %3002 = vmatprep.subr.mxu1 %v1383_v25  ;;  %3055 = vmatpush3.msra.mxu0 %v2612_v28  ;;  %v1813_v25 = vpop.f32.mrf.mxu0  ;;  %v1723_v28 = vrot.slane %v6398_v21, %v426_v47 }
 0x22f   :  { %3003 = vmatpush3.msra.mxu1 %v1303_v42  ;;  %3056 = vmatprep.subr.mxu0 %v2627_v58  ;;  %v1618_v42 = vld [vmem:[%s6643_s2 + $0xfc0] sm:$0xff]  ;;  %v1812_v58 = vadd.f32 %v1811_v14, %v1719_v23  ;;  %v2676_v23 = vld [vmem:[%s6644_s3 + $0x270] sm:$0xff] }
 0x230   :  { %3004 = vmatprep.subr.mxu1 %v1378_v51  ;;  %3057 = vmatpush3.msra.mxu0 %v2611_v33  ;;  %v1608_v33 = vld [vmem:[%s6643_s2 + $0xf70] sm:$0xff]  ;;  %v2650_v14 = vld [vmem:[%s6644_s3 + $0x1a0] sm:$0xff] }
 0x231   :  { %3005 = vmatpush3.msra.mxu1 %v1298_v29  ;;  %3058 = vmatprep.subr.mxu0 %v2626_v38  ;;  %v1884_v29 = vpop.f32.mrf.mxu1  ;;  %v1883_v47 = vadd.f32 %v1882_v27, %v1812_v58  ;;  %v2648_v27 = vld [vmem:[%s6644_s3 + $0x190] sm:$0xff]  ;;  %v2631_v58 = vld [vmem:[%s6644_s3 + $0x108] sm:$0xff] }
 0x232   :  { %3006 = vmatprep.subr.mxu1 %v1373_v36  ;;  %3059 = vmatpush3.msra.mxu0 %v2610_v24  ;;  %v1814_v36 = vadd.f32 %v1813_v25, %v1723_v28  ;;  %v2633_v25 = vld [vmem:[%s6644_s3 + $0x118] sm:$0xff]  ;;  %v2632_v28 = vld [vmem:[%s6644_s3 + $0x110] sm:$0xff] }
 0x233   :  { %3007 = vmatpush3.msra.mxu1 %v1293_v40  ;;  %3060 = vmatprep.subr.mxu0 %v2625_v46  ;;  %v1603_v40 = vld [vmem:[%s6643_s2 + $0xf48] sm:$0xff]  ;;  %v1598_v46 = vld [vmem:[%s6643_s2 + $0xf20] sm:$0xff] }
 0x234   :  { %3008 = vmatprep.subr.mxu1 %v1368_v43  ;;  %3061 = vmatpush3.msra.mxu0 %v2609_v49  ;;  %v1953_v51 = vpop.f32.mrf.mxu0  ;;  %v1885_v24 = vadd.f32 %v1884_v29, %v1814_v36  ;;  %v2646_v29 = vld [vmem:[%s6644_s3 + $0x180] sm:$0xff] }
 0x235   :  { %3009 = vmatpush3.msra.mxu1 %v1288_v48  ;;  %3062 = vmatprep.subr.mxu0 %v2624_v53  ;;  %v1954_v43 = vadd.f32 %v1953_v51, %v1883_v47  ;;  %v1713_v53 = vld [vmem:[%s6643_s2 + $0x12b8] sm:$0xff]  ;;  %v2647_v51 = vld [vmem:[%s6644_s3 + $0x188] sm:$0xff]  ;;  %v2630_v36 = vld [vmem:[%s6644_s3 + $0x100] sm:$0xff] }
 0x236   :  { %3010 = vmatprep.subr.mxu1 %v1363_v52  ;;  %3063 = vmatpush3.msra.mxu0 %v2608_v55  ;;  %v1955_v38 = vpop.f32.mrf.mxu0  ;;  %v2672_v47 = vld [vmem:[%s6644_s3 + $0x250] sm:$0xff] }
 0x237   :  { %3011 = vmatpush3.msra.mxu1 %v1283_v54  ;;  %3064 = vmatprep.subr.mxu0 %v2623_v57  ;;  %v1956_v49 = vadd.f32 %v1955_v38, %v1885_v24  ;;  %v2671_v38 = vld [vmem:[%s6644_s3 + $0x248] sm:$0xff]  ;;  %v2669_v24 = vld [vmem:[%s6644_s3 + $0x238] sm:$0xff] }
 0x238   :  { %3012 = vmatprep.subr.mxu1 %v1358_v56  ;;  %3065 = vmatpush3.msra.mxu0 %v2607_v60  ;;  %v1708_v56 = vld [vmem:[%s6643_s2 + $0x1290] sm:$0xff]  ;;  %v1703_v60 = vld [vmem:[%s6643_s2 + $0x1268] sm:$0xff] }
 0x239   :  { %3013 = vmatpush3.msra.mxu1 %v1278_v59  ;;  %3066 = vmatprep.subr.mxu0 %v2622_v62  ;;  %v1693_v62 = vld [vmem:[%s6643_s2 + $0x1218] sm:$0xff] }
 0x23a   :  { %2448 = vmatmul.mubr.f32.vlgmr.msra.gmra.mxu1 %v4977_v31  ;;  %2523 = vmatprep.subr.mxu1 %v3182_v30  ;;  %v1663_v31 = vld [vmem:[%s6643_s2 + $0x1128] sm:$0xff] }
 0x23b   :  { %2524 = vmatpush1.msra.mxu1 %v1673_v61  ;;  %2945 = vmatprep.mubr.msk.f32.mxu1 %vm1741_vm0, %v5334_v41  ;;  %v2620_v41 = vld [vmem:[%s6644_s3 + $0xb0] sm:$0xff]  ;;  %v1698_v61 = vld [vmem:[%s6643_s2 + $0x1240] sm:$0xff] }
 0x23c   :  { %2525 = vmatprep.subr.mxu1 %v3182_v30  ;;  %3067 = vmatpush3.msra.mxu0 %v2606_v0  ;;  %v1683_v0 = vld [vmem:[%s6643_s2 + $0x11c8] sm:$0xff] }
 0x23d   :  { %2526 = vmatpush1.msra.mxu1 %v1668_v35  ;;  %3068 = vmatprep.subr.mxu0 %v2621_v63  ;;  %v1688_v35 = vld [vmem:[%s6643_s2 + $0x11f0] sm:$0xff]  ;;  %v1678_v63 = vld [vmem:[%s6643_s2 + $0x11a0] sm:$0xff] }
 0x23e   :  { %2527 = vmatprep.subr.mxu1 %v3182_v30  ;;  %3069 = vmatpush3.msra.mxu0 %v2605_v37  ;;  %v2645_v37 = vld [vmem:[%s6644_s3 + $0x178] sm:$0xff] }
 0x23f   :  { %2528 = vmatpush1.msra.mxu1 %v1663_v31  ;;  %3070 = vmatprep.subr.mxu0 %v2620_v41  ;;  %v2661_v31 = vld [vmem:[%s6644_s3 + $0x1f8] sm:$0xff]  ;;  %v2660_v41 = vld [vmem:[%s6644_s3 + $0x1f0] sm:$0xff] }
 0x240   :  { %2529 = vmatprep.subr.mxu1 %v3182_v30  ;;  %3071 = vmatpush3.msra.mxu0 %v2604_v2  ;;  %v2659_v2 = vld [vmem:[%s6644_s3 + $0x1e8] sm:$0xff] }
 0x241   :  { %2530 = vmatpush1.msra.mxu1 %v1658_v1  ;;  %3072 = vmatprep.subr.mxu0 %v2619_v3  ;;  %v2644_v1 = vld [vmem:[%s6644_s3 + $0x170] sm:$0xff]  ;;  %v2643_v3 = vld [vmem:[%s6644_s3 + $0x168] sm:$0xff] }
 0x242   :  { %2531 = vmatprep.subr.mxu1 %v3182_v30  ;;  %3073 = vmatpush3.msra.mxu0 %v2603_v5  ;;  %v2657_v5 = vld [vmem:[%s6644_s3 + $0x1d8] sm:$0xff] }
 0x243   :  { %2532 = vmatpush1.msra.mxu1 %v1653_v4  ;;  %3074 = vmatprep.subr.mxu0 %v2618_v6  ;;  %v2642_v4 = vld [vmem:[%s6644_s3 + $0x160] sm:$0xff]  ;;  %v2641_v6 = vld [vmem:[%s6644_s3 + $0x158] sm:$0xff] }
 0x244   :  { %2533 = vmatprep.subr.mxu1 %v3182_v30  ;;  %3075 = vmatpush3.msra.mxu0 %v2602_v7  ;;  %v2640_v7 = vld [vmem:[%s6644_s3 + $0x150] sm:$0xff] }
 0x245   :  { %2534 = vmatpush1.msra.mxu1 %v1648_v13  ;;  %3076 = vmatprep.subr.mxu0 %v2617_v8  ;;  %v2656_v13 = vld [vmem:[%s6644_s3 + $0x1d0] sm:$0xff]  ;;  %v2655_v8 = vld [vmem:[%s6644_s3 + $0x1c8] sm:$0xff] }
 0x246   :  { %2535 = vmatprep.subr.mxu1 %v3182_v30  ;;  %3077 = vmatpush3.msra.mxu0 %v2601_v12  ;;  %v2654_v12 = vld [vmem:[%s6644_s3 + $0x1c0] sm:$0xff] }
 0x247   :  { %2536 = vmatpush1.msra.mxu1 %v1643_v9  ;;  %3078 = vmatprep.subr.mxu0 %v2616_v16  ;;  %v2639_v9 = vld [vmem:[%s6644_s3 + $0x148] sm:$0xff]  ;;  %v2638_v16 = vld [vmem:[%s6644_s3 + $0x140] sm:$0xff] }
 0x248   :  { %2537 = vmatprep.subr.mxu1 %v3182_v30  ;;  %3079 = vmatpush3.msra.mxu0 %v2600_v19  ;;  %v2637_v19 = vld [vmem:[%s6644_s3 + $0x138] sm:$0xff] }
 0x249   :  { %2538 = vmatpush1.msra.mxu1 %v1638_v18  ;;  %3080 = vmatprep.subr.mxu0 %v2615_v20  ;;  %v2653_v18 = vld [vmem:[%s6644_s3 + $0x1b8] sm:$0xff]  ;;  %v2652_v20 = vld [vmem:[%s6644_s3 + $0x1b0] sm:$0xff] }
 0x24a   :  { %2539 = vmatprep.subr.mxu1 %v3182_v30  ;;  %3081 = vmatpush3.msra.mxu0 %v2599_v15  ;;  %v2651_v15 = vld [vmem:[%s6644_s3 + $0x1a8] sm:$0xff] }
 0x24b   :  { %2540 = vmatpush1.msra.mxu1 %v1633_v10  ;;  %3082 = vmatprep.subr.mxu0 %v2614_v11  ;;  %v2636_v10 = vld [vmem:[%s6644_s3 + $0x130] sm:$0xff]  ;;  %v2635_v11 = vld [vmem:[%s6644_s3 + $0x128] sm:$0xff] }
 0x24c   :  { %2541 = vmatprep.subr.mxu1 %v3182_v30  ;;  %3083 = vmatpush3.msra.mxu0 %v2598_v50  ;;  %v2649_v50 = vld [vmem:[%s6644_s3 + $0x198] sm:$0xff] }
 0x24d   :  { %2542 = vmatpush1.msra.mxu1 %v1628_v17  ;;  %3139 = vmatprep.subr.mxu0 %v3182_v30  ;;  %v2634_v17 = vld [vmem:[%s6644_s3 + $0x120] sm:$0xff] }
 0x24e   :  { %2543 = vmatprep.subr.mxu1 %v3182_v30 }
 0x24f   :  { %2544 = vmatpush1.msra.mxu1 %v1623_v22  ;;  %v2677_v22 = vld [vmem:[%s6644_s3 + $0x278] sm:$0xff] }
 0x250   :  { %2545 = vmatprep.subr.mxu1 %v3182_v30 }
 0x251   :  { %2546 = vmatpush1.msra.mxu1 %v1618_v42  ;;  %v2675_v42 = vld [vmem:[%s6644_s3 + $0x268] sm:$0xff] }
 0x252   :  { %2547 = vmatprep.subr.mxu1 %v3182_v30 }
 0x253   :  { %2548 = vmatpush1.msra.mxu1 %v1613_v26  ;;  %v2674_v26 = vld [vmem:[%s6644_s3 + $0x260] sm:$0xff] }
 0x254   :  { %2549 = vmatprep.subr.mxu1 %v3182_v30 }
 0x255   :  { %2550 = vmatpush1.msra.mxu1 %v1608_v33  ;;  %v2024_v48 = vpop.f32.mrf.mxu1  ;;  %v2673_v33 = vld [vmem:[%s6644_s3 + $0x258] sm:$0xff] }
 0x256   :  { %2551 = vmatprep.subr.mxu1 %v3182_v30  ;;  %v2025_v52 = vadd.f32 %v2024_v48, %v1954_v43  ;;  %v2668_v43 = vld [vmem:[%s6644_s3 + $0x230] sm:$0xff]  ;;  %v2666_v48 = vld [vmem:[%s6644_s3 + $0x220] sm:$0xff] }
 0x257   :  { %2552 = vmatpush1.msra.mxu1 %v1603_v40  ;;  %v2026_v54 = vpop.f32.mrf.mxu1  ;;  %v2670_v40 = vld [vmem:[%s6644_s3 + $0x240] sm:$0xff] }
 0x258   :  { %2553 = vmatprep.subr.mxu1 %v3182_v30  ;;  %v2027_v55 = vadd.f32 %v2026_v54, %v1956_v49  ;;  %v2593_v59 = vmax.f32 %v2025_v52, 0.0  ;;  %v2665_v49 = vld [vmem:[%s6644_s3 + $0x218] sm:$0xff]  ;;  %v2664_v52 = vld [vmem:[%s6644_s3 + $0x210] sm:$0xff]  ;;  %v2662_v54 = vld [vmem:[%s6644_s3 + $0x200] sm:$0xff] }
 0x259   :  { %2554 = vmatpush1.msra.mxu1 %v1598_v46  ;;  %v2667_v46 = vld [vmem:[%s6644_s3 + $0x228] sm:$0xff] }
 0x25a   :  { %2571 = vmatprep.subr.mxu1 %v3182_v30  ;;  %v2594_v57 = vmax.f32 %v2027_v55, 0.0 }
 0x25b   :  { %2572 = vmatpush2.msra.mxu1 %v1713_v53  ;;  %v2663_v53 = vld [vmem:[%s6644_s3 + $0x208] sm:$0xff] }
 0x25c   :  { %2573 = vmatprep.subr.mxu1 %v3182_v30  ;;  %2749 = vmatprep.mubr.f32.mxu0 %v2594_v57  ;;  %v1731_v57 = vrot.slane %v6398_v21, %v434_v39 }
 0x25d   :  { %2574 = vmatpush2.msra.mxu1 %v1708_v56  ;;  %2750 = vmatmul.mubr.f32.vlgmr.msra.gmra.mxu0 %v2593_v59  ;;  %v1727_v56 = vrot.slane %v6398_v21, %v430_v34 }
 0x25e   :  { %2575 = vmatprep.subr.mxu1 %v3182_v30  ;;  %3140 = vmatpush3.msra.mxu0 %v2677_v22 }
 0x25f   :  { %2576 = vmatpush2.msra.mxu1 %v1703_v60  ;;  %3141 = vmatprep.subr.mxu0 %v3182_v30 }
 0x260   :  { %2577 = vmatprep.subr.mxu1 %v3182_v30  ;;  %3142 = vmatpush3.msra.mxu0 %v2676_v23 }
 0x261   :  { %2578 = vmatpush2.msra.mxu1 %v1698_v61  ;;  %3143 = vmatprep.subr.mxu0 %v3182_v30 }
 0x262   :  { %2579 = vmatprep.subr.mxu1 %v3182_v30  ;;  %3144 = vmatpush3.msra.mxu0 %v2675_v42 }
 0x263   :  { %2580 = vmatpush2.msra.mxu1 %v1693_v62  ;;  %3145 = vmatprep.subr.mxu0 %v3182_v30 }
 0x264   :  { %2581 = vmatprep.subr.mxu1 %v3182_v30  ;;  %3146 = vmatpush3.msra.mxu0 %v2674_v26 }
 0x265   :  { %2582 = vmatpush2.msra.mxu1 %v1688_v35  ;;  %3147 = vmatprep.subr.mxu0 %v3182_v30 }
 0x266   :  { %2583 = vmatprep.subr.mxu1 %v3182_v30  ;;  %3148 = vmatpush3.msra.mxu0 %v2673_v33 }
 0x267   :  { %2584 = vmatpush2.msra.mxu1 %v1683_v0  ;;  %3149 = vmatprep.subr.mxu0 %v3182_v30 }
 0x268   :  { %2585 = vmatprep.subr.mxu1 %v3182_v30  ;;  %3150 = vmatpush3.msra.mxu0 %v2672_v47 }
 0x269   :  { %2586 = vmatpush2.msra.mxu1 %v1678_v63  ;;  %3151 = vmatprep.subr.mxu0 %v3182_v30 }
 0x26a   :  { %2588 = vmatmul.mubr.f32.vlgmr.msra.gmra.mxu1 %v5339_v45  ;;  %3087 = vmatprep.subr.mxu1 %v2661_v31  ;;  %v2658_v45 = vld [vmem:[%s6644_s3 + $0x1e0] sm:$0xff] }
 0x26b   :  { %3088 = vmatpush3.msra.mxu1 %v2645_v37  ;;  %3152 = vmatpush3.msra.mxu0 %v2671_v38 }
 0x26c   :  { %3089 = vmatprep.subr.mxu1 %v2660_v41  ;;  %3153 = vmatprep.subr.mxu0 %v3182_v30 }
 0x26d   :  { %3090 = vmatpush3.msra.mxu1 %v2644_v1  ;;  %3154 = vmatpush3.msra.mxu0 %v2670_v40 }
 0x26e   :  { %3091 = vmatprep.subr.mxu1 %v2659_v2  ;;  %3155 = vmatprep.subr.mxu0 %v3182_v30 }
 0x26f   :  { %3092 = vmatpush3.msra.mxu1 %v2643_v3  ;;  %3156 = vmatpush3.msra.mxu0 %v2669_v24 }
 0x270   :  { %3093 = vmatprep.subr.mxu1 %v2658_v45  ;;  %3157 = vmatprep.subr.mxu0 %v3182_v30 }
 0x271   :  { %3094 = vmatpush3.msra.mxu1 %v2642_v4  ;;  %3158 = vmatpush3.msra.mxu0 %v2668_v43 }
 0x272   :  { %3095 = vmatprep.subr.mxu1 %v2657_v5  ;;  %3159 = vmatprep.subr.mxu0 %v3182_v30 }
 0x273   :  { %3096 = vmatpush3.msra.mxu1 %v2641_v6  ;;  %3160 = vmatpush3.msra.mxu0 %v2667_v46 }
 0x274   :  { %3097 = vmatprep.subr.mxu1 %v2656_v13  ;;  %3161 = vmatprep.subr.mxu0 %v3182_v30 }
 0x275   :  { %3098 = vmatpush3.msra.mxu1 %v2640_v7  ;;  %3162 = vmatpush3.msra.mxu0 %v2666_v48  ;;  %v2166_v59 = vpop.f32.mrf.mxu0  ;;  %v1735_v7 = vrot.slane %v6398_v21, %v438_v32  ;;  %v2946_v32 = vld [vmem:[%s6647_s6] ss:$0 sm:$0xff] }
 0x276   :  { %3099 = vmatprep.subr.mxu1 %v2655_v8  ;;  %3163 = vmatprep.subr.mxu0 %v3182_v30 }
 0x277   :  { %3100 = vmatpush3.msra.mxu1 %v2639_v9  ;;  %3164 = vmatpush3.msra.mxu0 %v2665_v49  ;;  %v2168_v35 = vpop.f32.mrf.mxu0 }
 0x278   :  { %3101 = vmatprep.subr.mxu1 %v2654_v12  ;;  %3165 = vmatprep.subr.mxu0 %v3182_v30 }
 0x279   :  { %3102 = vmatpush3.msra.mxu1 %v2638_v16  ;;  %3166 = vmatpush3.msra.mxu0 %v2664_v52 }
 0x27a   :  { %3103 = vmatprep.subr.mxu1 %v2653_v18  ;;  %3167 = vmatprep.subr.mxu0 %v3182_v30 }
 0x27b   :  { %3104 = vmatpush3.msra.mxu1 %v2637_v19  ;;  %3168 = vmatpush3.msra.mxu0 %v2663_v53 }
 0x27c   :  { %3105 = vmatprep.subr.mxu1 %v2652_v20  ;;  %3169 = vmatprep.subr.mxu0 %v3182_v30 }
 0x27d   :  { %3106 = vmatpush3.msra.mxu1 %v2636_v10  ;;  %3171 = vmatprep.mubr.msk.f32.mxu0 %vm3183_vm1, %v3182_v30 }
 0x27e   :  { %3107 = vmatprep.subr.mxu1 %v2651_v15  ;;  %3170 = vmatpush3.msra.mxu0 %v2662_v54 }
 0x27f   :  { %3108 = vmatpush3.msra.mxu1 %v2635_v11 }
 0x280   :  { %3109 = vmatprep.subr.mxu1 %v2650_v14 }
 0x281   :  { %3110 = vmatpush3.msra.mxu1 %v2634_v17 }
 0x282   :  { %3111 = vmatprep.subr.mxu1 %v2649_v50 }
 0x283   :  { %3112 = vmatpush3.msra.mxu1 %v2633_v25 }
 0x284   :  { %3113 = vmatprep.subr.mxu1 %v2648_v27 }
 0x285   :  { %3114 = vmatpush3.msra.mxu1 %v2632_v28 }
 0x286   :  { %3115 = vmatprep.subr.mxu1 %v2647_v51 }
 0x287   :  { %3116 = vmatpush3.msra.mxu1 %v2631_v58 }
 0x288   :  { %3117 = vmatprep.subr.mxu1 %v2646_v29 }
 0x289   :  { %3118 = vmatpush3.msra.mxu1 %v2630_v36 }
 0x296   :  { %v2095_v55 = vpop.f32.mrf.mxu1 }
 0x297   :  { %v2096_v61 = vadd.f32 %v2095_v55, %v1727_v56 }
 0x298   :  { %v2097_v60 = vpop.f32.mrf.mxu1 }
 0x299   :  { %v2098_v62 = vadd.f32 %v2097_v60, %v1731_v57  ;;  %v2167_v0 = vadd.f32 %v2166_v59, %v2096_v61 }
 0x29b   :  { %v2169_v30 = vadd.f32 %v2168_v35, %v2098_v62 }
 0x2a7   :  { %v2308_v63 = vpop.f32.mrf.mxu0 }
 0x2a9   :  { %v2310_v2 = vpop.f32.mrf.mxu0 }
 0x2c8   :  { %v2979_v39 = vpop.f32.mrf.mxu0 }
 0x2ca   :  { %v2980_v6 = vpop.f32.mrf.mxu0 }
 0x2cb   :  { %v2981_v8 = vadd.f32 %v2980_v6, %v2979_v39 }
 0x2cd   :  { %v2380_v16 = vadd.f32 %v2981_v8, %v1735_v7 }
 0x2d9   :  { %v2237_v31 = vpop.f32.mrf.mxu1 }
 0x2da   :  { %v2238_v37 = vadd.f32 %v2237_v31, %v2167_v0 }
 0x2db   :  { %v2239_v41 = vpop.f32.mrf.mxu1 }
 0x2dc   :  { %v2240_v1 = vadd.f32 %v2239_v41, %v2169_v30  ;;  %v2309_v3 = vadd.f32 %v2308_v63, %v2238_v37 }
 0x2de   :  { %v2311_v45 = vadd.f32 %v2310_v2, %v2240_v1  ;;  %v2595_v4 = vmax.f32 %v2309_v3, 0.0 }
 0x2e0   :  { %v2596_v34 = vmax.f32 %v2311_v45, 0.0 }
 0x2e2   :  { %2819 = vmatprep.mubr.f32.mxu1 %v2596_v34 }
 0x2e3   :  { %2820 = vmatmul.mubr.f32.vlgmr.msra.gmra.mxu1 %v2595_v4 }
 0x2ea   :  { %v3049_v9 = vpop.f32.mrf.mxu0 }
 0x2ec   :  { %v3050_v18 = vpop.f32.mrf.mxu0 }
 0x2ed   :  { %v3051_v20 = vadd.f32 %v3050_v18, %v3049_v9 }
 0x2fa   :  { %v3014_v5 = vpop.f32.mrf.mxu1 }
 0x2fc   :  { %v3015_v13 = vpop.f32.mrf.mxu1 }
 0x2fd   :  { %v3016_v12 = vadd.f32 %v3015_v13, %v3014_v5 }
 0x2ff   :  { %v2450_v19 = vadd.f32 %v3016_v12, %v2380_v16 }
 0x301   :  { %v2520_v10 = vadd.f32 %v3051_v20, %v2450_v19 }
 0x31d   :  { %v3084_v50 = vpop.f32.mrf.mxu0 }
 0x31f   :  { %v3085_v23 = vpop.f32.mrf.mxu0 }
 0x320   :  { %v3086_v44 = vadd.f32 %v3085_v23, %v3084_v50 }
 0x322   :  { %v2752_v27 = vadd.f32 %v3086_v44, %v2946_v32 }
 0x32a   :  { %v2589_v15 = vpop.f32.mrf.mxu1 }
 0x32b   :  { %v2590_v11 = vadd.f32 %v2589_v15, %v2520_v10 }
 0x32c   :  { %v2591_v14 = vpop.f32.mrf.mxu1 }
 0x32d   :  { %v2597_v17 = vmax.f32 %v2590_v11, 0.0 }
 0x32f   :  { %3172 = vmatmul.mubr.f32.vlgmr.msra.gmra.mxu0 %v2597_v17 }
 0x3a3   :  { %v3119_v22 = vpop.f32.mrf.mxu1 }
 0x3a5   :  { %v3120_v25 = vpop.f32.mrf.mxu1 }
 0x3a6   :  { %v3121_v21 = vadd.f32 %v3120_v25, %v3119_v22 }
 0x3a8   :  { %v2822_v42 = vadd.f32 %v3121_v21, %v2752_v27 }
 0x3ef   :  { %v2891_v28 = vpop.f32.mrf.mxu0 }
 0x3f0   :  { %v2892_v51 = vadd.f32 %v2891_v28, %v2822_v42 }
 0x3f1   :  { %v3173_v26 = vpop.f32.mrf.mxu0 }
 0x3f2   :  { %v2895_v58 = vsub.f32 0.0, %v2892_v51 }
 0x3f4   :  { %v2896_v29 = vmul.f32 1.442695, %v2895_v58 }
 0x3f6   :  { %3177 = vpow2.f32 %v2896_v29 }
 0x403   :  { %v3178_v33 = vpop.eup %3177 }
 0x404   :  { %v2898_v36 = vadd.f32 1.0, %v3178_v33 }
 0x406   :  { %3179 = vrcp.f32 %v2898_v36 }
 0x413   :  { %v3180_v47 = vpop.eup %3179 }
 0x414   :  { %2901 = vst.msk [vmem:[#allocation2] sm:$0xff] %vm1741_vm0, %v3180_v47 }
 0x41b   :  { %v2920_v38 = vld [vmem:[#allocation2] sm:$0x1] }
 0x41c   :  { %2921 = vst [vmem:[%s6648_s7] sm:$0x1] %v2920_v38 }

</bundles_post_ra>
